<compile_context>
chip_gen: v6e
topology: v6e:2x2x1
jax: 0.10.0
libtpu: 0.0.40
codegen_flags: <defaults>
</compile_context>

<pallas_src>
import functools

import numpy as np
import jax
import jax.numpy as jnp
from jax import lax
from jax.experimental import pallas as pl
from jax.experimental.pallas import tpu as pltpu

MXU_DTYPE = jnp.bfloat16   # MXU operand / at-rest weight dtype
ACT_DTYPE = jnp.bfloat16   # inter-kernel activation dtype
LN_EPS = 1e-6
_SQRT_2_OVER_PI = 0.7978845608028654


def _gelu(x):
    # tanh-approx GELU (EUP tanh): review -- exact erf burns VPU slots in an already
    # store/VALU-bound epilogue; delta is below the accepted bf16-MXU noise.
    return 0.5 * x * (1.0 + jnp.tanh(_SQRT_2_OVER_PI * (x + 0.044715 * x * x * x)))


def _apply_act(x, act):
    if act == "gelu":
        return _gelu(x)
    if act == "tanh":
        return jnp.tanh(x)
    return x


# ---------------------------------------------------------------------------
# In-kernel convolution building blocks (shift-the-LHS im2col, one MXU matmul)
# ---------------------------------------------------------------------------

def _tap_masks(H, W, KH, KW, pad):
    """(T,1) f32 validity masks (one per tap) emulating zero padding on the dense
    flat (row = h*W + w) layout.  None for the always-valid centre tap."""
    T = H * W
    r = lax.broadcasted_iota(jnp.int32, (T, 1), 0)
    if W & (W - 1) == 0:                       # always true in this network
        shift = int(W).bit_length() - 1
        h = r >> shift
        w = r & (W - 1)
    else:
        h = r // W
        w = r - h * W
    masks = []
    for kh in range(KH):
        dh = kh - pad
        for kw in range(KW):
            dw = kw - pad
            if dh == 0 and dw == 0:
                masks.append(None)
                continue
            ok = (h + dh >= 0) & (h + dh < H) & (w + dw >= 0) & (w + dw < W)
            masks.append(ok.astype(jnp.float32))
    return masks


def _conv_taps(x, masks, W_img, KH, KW, pad):
    """Shift-the-LHS im2col pieces: per tap, roll the *input* (not the f32 product)
    by the tap offset, zero the rows that would read outside the image, cast to bf16.
    Concatenated along K they feed a single MXU matmul (tap reduction inside the MXU)."""
    T = x.shape[0]
    pieces = []
    for kh in range(KH):
        for kw in range(KW):
            d = (kh - pad) * W_img + (kw - pad)
            p = x if d == 0 else pltpu.roll(x, shift=(-d) % T, axis=0)
            m = masks[kh * KW + kw]
            if m is not None:
                p = p * m
            pieces.append(p.astype(MXU_DTYPE))
    return pieces


def _tap_matmul(pieces, w):
    lhs = pieces[0] if len(pieces) == 1 else jnp.concatenate(pieces, axis=-1)
    return jnp.dot(lhs, w, preferred_element_type=jnp.float32)


# ---------------------------------------------------------------------------
# Standalone conv kernel (in_proj, downsample, decoder convs, out_proj)
# ---------------------------------------------------------------------------

def _conv_kernel(*refs, nparts, H, W, KH, KW, pad, act, has_pre, has_post):
    i = 0
    part_refs = refs[i:i + nparts]; i += nparts
    w_ref = refs[i]; i += 1
    pre_ref = refs[i] if has_pre else None; i += int(has_pre)
    post_ref = refs[i] if has_post else None; i += int(has_post)
    o_ref = refs[i]

    masks = _tap_masks(H, W, KH, KW, pad)
    parts = []
    for p_ref in part_refs:
        p = p_ref[...]
        if pre_ref is not None:
            # fused 2x nearest-neighbour upsample: constant 0/1 selection matmul
            p = jnp.dot(pre_ref[...], p.astype(MXU_DTYPE),
                        preferred_element_type=jnp.float32)
        else:
            p = p.astype(jnp.float32)
        parts.append(p)

    pieces = []
    for p in parts:
        pieces += _conv_taps(p, masks, W, KH, KW, pad)
    resp = _tap_matmul(pieces, w_ref[...])               # (T, Cout) f32
    resp = _apply_act(resp, act)
    if post_ref is not None:
        # fused stride-2 subsample: only the strided rows get stored
        resp = jnp.dot(post_ref[...], resp.astype(MXU_DTYPE),
                       preferred_element_type=jnp.float32)
    o_ref[...] = resp.astype(o_ref.dtype)


def _const_spec(a):
    nd = a.ndim
    return pl.BlockSpec(tuple(a.shape), lambda n, _d=nd: (0,) * _d)


def conv_call(x_parts, w_i2c, *, H, W, KH, KW, pad, act="none",
              pre=None, post=None, out_dtype=ACT_DTYPE):
    """Bias-free conv.  x_parts: list of (N, T_in, Cp) bf16 dense-flat activations
    whose channel concat is the conv input.  w_i2c: (KH*KW*sum(Cp), Cout) bf16."""
    N = x_parts[0].shape[0]
    T = H * W
    T_out = post.shape[0] if post is not None else T
    Cout = w_i2c.shape[-1]
    args = list(x_parts) + [w_i2c]
    in_specs = [pl.BlockSpec((None,) + tuple(p.shape[1:]), lambda n: (n, 0, 0))
                for p in x_parts]
    in_specs.append(_const_spec(w_i2c))
    if pre is not None:
        args.append(pre); in_specs.append(_const_spec(pre))
    if post is not None:
        args.append(post); in_specs.append(_const_spec(post))
    return pl.pallas_call(
        functools.partial(_conv_kernel, nparts=len(x_parts), H=H, W=W, KH=KH,
                          KW=KW, pad=pad, act=act,
                          has_pre=pre is not None, has_post=post is not None),
        out_shape=jax.ShapeDtypeStruct((N, T_out, Cout), out_dtype),
        grid_spec=pltpu.PrefetchScalarGridSpec(
            num_scalar_prefetch=0, grid=(N,),
            in_specs=in_specs,
            out_specs=pl.BlockSpec((None, T_out, Cout), lambda n: (n, 0, 0))),
        compiler_params=pltpu.CompilerParams(dimension_semantics=("parallel",)),
    )(*args)


# ---------------------------------------------------------------------------
# Fused ConvSequence / Block2 kernel
#   dwconv1 -> dwconv2(cat) -> LayerNorm -> Linear -> GELU -> Linear -> gamma ->
#   + residual, repeated `nblocks` times, optionally followed by `out*0.2 + x0`.
# ---------------------------------------------------------------------------

def _convseq_kernel(*refs, nparts, nblocks, H, W, seq_residual):
    part_refs = refs[:nparts]
    dw1_ref, dw2_ref, lnw_ref, lnb_ref, w1_ref, w2_ref, g_ref, o_ref = refs[nparts:]

    masks = _tap_masks(H, W, 5, 5, 2)
    parts = [p[...].astype(jnp.float32) for p in part_refs]
    # decoder skip-connection channel concat folded into the kernel
    x0 = parts[0] if nparts == 1 else jnp.concatenate(parts, axis=-1)

    x = x0
    for b in range(nblocks):
        x_taps = _conv_taps(x, masks, W, 5, 5, 2)        # reused by dw1 AND dw2
        x1 = _tap_matmul(x_taps, dw1_ref[b])             # dwconv1
        x1_taps = _conv_taps(x1, masks, W, 5, 5, 2)
        x2 = _tap_matmul(x1_taps + x_taps, dw2_ref[b])   # dwconv2 on cat([x1, x])
        # LayerNorm (channels_last, eps=1e-6) in f32
        mu = jnp.mean(x2, axis=-1, keepdims=True)
        xc = x2 - mu
        var = jnp.mean(xc * xc, axis=-1, keepdims=True)
        xn = xc * lax.rsqrt(var + LN_EPS) * lnw_ref[b] + lnb_ref[b]
        # pointwise MLP on the MXU
        h = jnp.dot(xn.astype(MXU_DTYPE), w1_ref[b], preferred_element_type=jnp.float32)
        h = _gelu(h)
        y = jnp.dot(h.astype(MXU_DTYPE), w2_ref[b], preferred_element_type=jnp.float32)
        x = x + g_ref[b] * y                             # layer scale + residual
    if seq_residual:
        x = x * 0.2 + x0                                 # ConvSequence residual, fused
    o_ref[...] = x.astype(o_ref.dtype)


def convseq_call(x_parts, wp, *, H, W, seq_residual):
    N = x_parts[0].shape[0]
    T = H * W
    C = sum(p.shape[-1] for p in x_parts)
    nblocks = wp["dw1"].shape[0]
    weights = [wp["dw1"], wp["dw2"], wp["ln_w"], wp["ln_b"],
               wp["w1"], wp["w2"], wp["gamma"]]
    in_specs = [pl.BlockSpec((None,) + tuple(p.shape[1:]), lambda n: (n, 0, 0))
                for p in x_parts]
    in_specs += [_const_spec(a) for a in weights]
    return pl.pallas_call(
        functools.partial(_convseq_kernel, nparts=len(x_parts), nblocks=nblocks,
                          H=H, W=W, seq_residual=seq_residual),
        out_shape=jax.ShapeDtypeStruct((N, T, C), ACT_DTYPE),
        grid_spec=pltpu.PrefetchScalarGridSpec(
            num_scalar_prefetch=0, grid=(N,),
            in_specs=in_specs,
            out_specs=pl.BlockSpec((None, T, C), lambda n: (n, 0, 0))),
        compiler_params=pltpu.CompilerParams(dimension_semantics=("parallel",)),
    )(*x_parts, *weights)


# ---------------------------------------------------------------------------
# Parameters (deterministic init; use_bias=False default -> no conv/linear biases)
# ---------------------------------------------------------------------------

class KeyGen:
    def __init__(self, key):
        self.key = key

    def __call__(self):
        self.key, sub = jax.random.split(self.key)
        return sub


def init_conv_hwio(kg, kh, kw, cin, cout, groups=1):
    fan_in = (kh * kw * cin) // groups
    scale = 1.0 / (fan_in ** 0.5)
    if groups == 1:
        return jax.random.normal(kg(), (kh, kw, cin, cout), jnp.float32) * scale
    cig, cog = cin // groups, cout // groups
    wg = jax.random.normal(kg(), (groups, kh, kw, cig, cog), jnp.float32) * scale
    # TODO(synk): grouped convs embedded as dense block-diagonal weights (exact math,
    #             up to `groups`x extra MXU work); per-group matmuls would remove it.
    w = jnp.zeros((kh, kw, cin, cout), jnp.float32)
    for g in range(groups):
        w = w.at[:, :, g * cig:(g + 1) * cig, g * cog:(g + 1) * cog].set(wg[g])
    return w


def im2col_weight(w_hwio, part_cins, cout_pad=None):
    """HWIO -> (sum_p KH*KW*Cin_p, Cout) bf16, row order matching _conv_taps
    (input parts outer, (kh,kw) taps next, input channel inner)."""
    KH, KW, Cin, Cout = w_hwio.shape
    assert sum(part_cins) == Cin
    rows, c0 = [], 0
    for cp in part_cins:
        rows.append(w_hwio[:, :, c0:c0 + cp, :].reshape(KH * KW * cp, Cout))
        c0 += cp
    w = jnp.concatenate(rows, axis=0)
    if cout_pad is not None and cout_pad > Cout:
        w = jnp.pad(w, ((0, 0), (0, cout_pad - Cout)))
    return w.astype(MXU_DTYPE)


def downsample_select(H, W):
    """0/1 matrix picking the stride-2 rows of the dense conv response, so only the
    strided output is stored by the downsample kernel (no XLA slicing)."""
    Ho, Wo = H // 2, W // 2
    S = np.zeros((Ho * Wo, H * W), np.float32)
    for ho in range(Ho):
        for wo in range(Wo):
            S[ho * Wo + wo, (2 * ho) * W + 2 * wo] = 1.0
    return jnp.asarray(S, MXU_DTYPE)


def upsample_select(H, W):
    """0/1 matrix implementing 2x nearest-neighbour upsampling, fused into the next
    decoder conv as a pre-matmul (no jnp.repeat glue)."""
    H2, W2 = 2 * H, 2 * W
    U = np.zeros((H2 * W2, H * W), np.float32)
    for h2 in range(H2):
        for w2 in range(W2):
            U[h2 * W2 + w2, (h2 // 2) * W + (w2 // 2)] = 1.0
    return jnp.asarray(U, MXU_DTYPE)


def init_block2_hwio(kg, dim, lsiv):
    g = max(dim // 8, 1)
    return dict(
        dw1=init_conv_hwio(kg, 5, 5, dim, dim, groups=g),
        dw2=init_conv_hwio(kg, 5, 5, 2 * dim, dim, groups=g),
        ln_w=jnp.ones((dim,), jnp.float32),
        ln_b=jnp.zeros((dim,), jnp.float32),
        w1=jax.random.normal(kg(), (dim, 2 * dim), jnp.float32) / (dim ** 0.5),
        w2=jax.random.normal(kg(), (2 * dim, dim), jnp.float32) / ((2 * dim) ** 0.5),
        gamma=jnp.full((dim,), lsiv, jnp.float32),
    )


def stack_block2(blocks, dim):
    """Stack per-Block2 weights along a leading axis so one fused pallas_call runs a
    whole ConvSequence.  Weights bf16 at rest, im2col layout (prepared once)."""
    return dict(
        dw1=jnp.stack([im2col_weight(b["dw1"], [dim]) for b in blocks]),
        dw2=jnp.stack([im2col_weight(b["dw2"], [dim, dim]) for b in blocks]),
        ln_w=jnp.stack([b["ln_w"].reshape(1, dim) for b in blocks]),
        ln_b=jnp.stack([b["ln_b"].reshape(1, dim) for b in blocks]),
        w1=jnp.stack([b["w1"].astype(MXU_DTYPE) for b in blocks]),
        w2=jnp.stack([b["w2"].astype(MXU_DTYPE) for b in blocks]),
        gamma=jnp.stack([b["gamma"].reshape(1, dim) for b in blocks]),
    )


def init_umseg(key, dim=16, stage=2, out_chan=1, neck_blocks=1, lsiv=1e-5, H=16, W=16):
    kg = KeyGen(key)
    prep = {}
    w_in = init_conv_hwio(kg, 5, 5, 3, dim)
    w_in = jnp.pad(w_in, ((0, 0), (0, 0), (0, 5), (0, 0)))          # Cin 3 -> 8
    prep["in_proj"] = im2col_weight(w_in, [8])

    enc = []
    ds, h, w = dim, H, W
    for _ in range(stage):
        blocks = [init_block2_hwio(kg, ds, lsiv) for _ in range(3)]
        down = init_conv_hwio(kg, 4, 4, ds, 2 * ds)
        enc.append((stack_block2(blocks, ds), im2col_weight(down, [ds]),
                    downsample_select(h, w)))
        ds, h, w = 2 * ds, h // 2, w // 2
    prep["encoder"] = enc

    prep["bottleneck"] = [
        stack_block2([init_block2_hwio(kg, ds, lsiv) for _ in range(3)], ds)
        for _ in range(neck_blocks)]

    dec = []
    conv_w = init_conv_hwio(kg, 3, 3, ds, ds // 2)
    dec.append((upsample_select(h, w), im2col_weight(conv_w, [ds]),
                stack_block2([init_block2_hwio(kg, ds, lsiv)], ds)))
    h, w = 2 * h, 2 * w
    for _ in range(stage - 1):
        conv_w = init_conv_hwio(kg, 3, 3, ds, ds // 4)
        dec.append((upsample_select(h, w), im2col_weight(conv_w, [ds]),
                    stack_block2([init_block2_hwio(kg, ds // 2, lsiv)], ds // 2)))
        ds, h, w = ds // 2, 2 * h, 2 * w
    prep["decoder"] = dec

    w_out = init_conv_hwio(kg, 5, 5, dim * 2, out_chan)
    prep["out_proj"] = im2col_weight(w_out, [dim * 2], cout_pad=8)
    return prep


# ---------------------------------------------------------------------------
# Forward pass
# ---------------------------------------------------------------------------

def umseg_forward(x_nchw, prep, *, out_chan):
    N, Cin, H, W = x_nchw.shape
    # entry glue only: NCHW -> dense flat (N, H*W, 8) bf16 (channels padded 3 -> 8)
    x = jnp.transpose(x_nchw, (0, 2, 3, 1)).reshape(N, H * W, Cin)
    x = jnp.pad(x, ((0, 0), (0, 0), (0, 8 - Cin))).astype(ACT_DTYPE)

    fea = conv_call([x], prep["in_proj"], H=H, W=W, KH=5, KW=5, pad=2, act="gelu")
    h, w = H, W
    skips = []
    for seq_w, down_w, down_sel in prep["encoder"]:
        fea = convseq_call([fea], seq_w, H=h, W=w, seq_residual=True)
        skips.append(fea)
        fea = conv_call([fea], down_w, H=h, W=w, KH=4, KW=4, pad=1, post=down_sel)
        h, w = h // 2, w // 2
    for seq_w in prep["bottleneck"]:
        fea = convseq_call([fea], seq_w, H=h, W=w, seq_residual=True)
    for (up_mat, conv_w, blk_w), skip in zip(prep["decoder"], reversed(skips)):
        h, w = 2 * h, 2 * w
        fea = conv_call([fea], conv_w, H=h, W=w, KH=3, KW=3, pad=1, pre=up_mat)
        # channel concat with the encoder skip is folded into the Block2 kernel
        fea = convseq_call([fea, skip], blk_w, H=h, W=w, seq_residual=False)
    out = conv_call([fea], prep["out_proj"], H=h, W=w, KH=5, KW=5, pad=2,
                    act="tanh", out_dtype=jnp.float32)
    out = out[..., :out_chan].reshape(N, h, w, out_chan)
    return jnp.transpose(out, (0, 3, 1, 2))


# ---------------------------------------------------------------------------
# References for self-checks
# ---------------------------------------------------------------------------

def _conv_ref(x_parts, w_hwio, stride, pad):
    x = x_parts[0] if len(x_parts) == 1 else jnp.concatenate(x_parts, axis=-1)
    return lax.conv_general_dilated(
        x, w_hwio, window_strides=(stride, stride),
        padding=((pad, pad), (pad, pad)),
        dimension_numbers=("NHWC", "HWIO", "NHWC"))


def _block2_ref(x_nhwc, p):
    inp = x_nhwc
    x1 = _conv_ref([x_nhwc], p["dw1"], 1, 2)
    x2 = _conv_ref([x1, inp], p["dw2"], 1, 2)
    mu = jnp.mean(x2, axis=-1, keepdims=True)
    var = jnp.mean((x2 - mu) ** 2, axis=-1, keepdims=True)
    xn = (x2 - mu) * lax.rsqrt(var + LN_EPS) * p["ln_w"] + p["ln_b"]
    y = _gelu(xn @ p["w1"]) @ p["w2"]
    return inp + p["gamma"] * y


# ---------------------------------------------------------------------------
# Main
# ---------------------------------------------------------------------------

if __name__ == "__main__":
    DIM, STAGE, OUT_CHAN, NECKS = 16, 2, 1, 1
    key = jax.random.PRNGKey(0)
    k_in, k_par, k_chk = jax.random.split(key, 3)
    kc = KeyGen(k_chk)
    f32 = jnp.float32
    bf = lambda a: a.astype(MXU_DTYPE).astype(f32)

    # --- check 1: fused im2col conv (5x5 pad 2) vs lax.conv (bf16-prerounded ref)
    xa = jax.random.normal(kc(), (2, 8, 8, 16), f32)
    wa = jax.random.normal(kc(), (5, 5, 16, 24), f32) * 0.05
    got = conv_call([xa.astype(ACT_DTYPE).reshape(2, 64, 16)],
                    im2col_weight(wa, [16]), H=8, W=8, KH=5, KW=5, pad=2)
    got = got.astype(f32).reshape(2, 8, 8, 24)
    ref = _conv_ref([bf(xa)], bf(wa), 1, 2)
    err = float(jnp.max(jnp.abs(got - ref)))
    assert err < 5e-2, f"conv check failed: {err}"

    # --- check 2: stride-2 downsample (4x4 pad 1, in-kernel strided store)
    xb = jax.random.normal(kc(), (2, 8, 8, 16), f32)
    wb = jax.random.normal(kc(), (4, 4, 16, 32), f32) * 0.06
    got = conv_call([xb.astype(ACT_DTYPE).reshape(2, 64, 16)],
                    im2col_weight(wb, [16]), H=8, W=8, KH=4, KW=4, pad=1,
                    post=downsample_select(8, 8))
    got = got.astype(f32).reshape(2, 4, 4, 32)
    ref = _conv_ref([bf(xb)], bf(wb), 2, 1)
    err = float(jnp.max(jnp.abs(got - ref)))
    assert err < 5e-2, f"downsample check failed: {err}"

    # --- check 3: fused 2x nearest upsample + 3x3 conv
    xc = jax.random.normal(kc(), (2, 4, 4, 32), f32)
    wc = jax.random.normal(kc(), (3, 3, 32, 16), f32) * 0.06
    got = conv_call([xc.astype(ACT_DTYPE).reshape(2, 16, 32)],
                    im2col_weight(wc, [32]), H=8, W=8, KH=3, KW=3, pad=1,
                    pre=upsample_select(4, 4))
    got = got.astype(f32).reshape(2, 8, 8, 16)
    x_up = jnp.repeat(jnp.repeat(bf(xc), 2, axis=1), 2, axis=2)
    ref = _conv_ref([x_up], bf(wc), 1, 1)
    err = float(jnp.max(jnp.abs(got - ref)))
    assert err < 5e-2, f"upsample+conv check failed: {err}"

    # --- check 4: fused Block2 kernel vs pure-JAX f32 reference
    C, Hc, Wc = 16, 8, 8
    xd = jax.random.normal(kc(), (2, Hc, Wc, C), f32)
    p_chk = dict(
        dw1=jax.random.normal(kc(), (5, 5, C, C), f32) * 0.05,
        dw2=jax.random.normal(kc(), (5, 5, 2 * C, C), f32) * 0.035,
        ln_w=1.0 + 0.1 * jax.random.normal(kc(), (C,), f32),
        ln_b=0.1 * jax.random.normal(kc(), (C,), f32),
        w1=jax.random.normal(kc(), (C, 2 * C), f32) * 0.25,
        w2=jax.random.normal(kc(), (2 * C, C), f32) * 0.18,
        gamma=jnp.full((C,), 0.5, f32),
    )
    xd_b = xd.astype(ACT_DTYPE)
    got = convseq_call([xd_b.reshape(2, Hc * Wc, C)], stack_block2([p_chk], C),
                       H=Hc, W=Wc, seq_residual=False)
    got = got.astype(f32).reshape(2, Hc, Wc, C)
    ref = _block2_ref(xd_b.astype(f32), p_chk)
    err = float(jnp.max(jnp.abs(got - ref)))
    assert err < 2e-1, f"block2 check failed: {err}"

    # --- full UMSeg forward
    x = jax.random.normal(k_in, (2, 3, 16, 16), f32)          # NCHW like PyTorch
    prep = init_umseg(k_par, dim=DIM, stage=STAGE, out_chan=OUT_CHAN,
                      neck_blocks=NECKS, H=16, W=16)
    fwd = jax.jit(functools.partial(umseg_forward, out_chan=OUT_CHAN))
    out = jax.block_until_ready(fwd(x, prep))

    assert out.shape == (2, OUT_CHAN, 16, 16), out.shape
    assert bool(jnp.all(jnp.isfinite(out)))
    print("KERNEL_OK")
</pallas_src>

<mosaic_0001>
module attributes {stable_mosaic.version = 11 : i64} {
  func.func @_conv_kernel(%arg0: i32, %arg1: memref<1x64x16xbf16, #tpu.memory_space<vmem>>, %arg2: memref<400x24xbf16, #tpu.memory_space<vmem>>, %arg3: memref<1x64x24xbf16, #tpu.memory_space<vmem>>) attributes {dimension_semantics = [#tpu.dimension_semantics<parallel>], iteration_bounds = array<i64: 2>, scalar_prefetch = 0 : i64, scratch_operands = 0 : i64, tpu.core_type = #tpu.core_type<tc>, window_params = [{transform_indices = @transform_0, window_bounds = array<i64: 1, 64, 16>}, {pipeline_mode = #tpu.pipeline_mode<synchronous>, transform_indices = @transform_1, window_bounds = array<i64: 400, 24>}, {transform_indices = @transform_2, window_bounds = array<i64: 1, 64, 24>}]} {
    %0 = tpu.iota {dimensions = array<i32: 0>} : vector<64x1xi32>
    %c3_i32 = arith.constant 3 : i32
    %1 = vector.broadcast %c3_i32 : i32 to vector<64x1xi32>
    %2 = arith.shrsi %0, %1 : vector<64x1xi32>
    %c7_i32 = arith.constant 7 : i32
    %3 = vector.broadcast %c7_i32 : i32 to vector<64x1xi32>
    %4 = arith.andi %0, %3 : vector<64x1xi32>
    %c-2_i32 = arith.constant -2 : i32
    %5 = vector.broadcast %c-2_i32 : i32 to vector<64x1xi32>
    %6 = arith.addi %2, %5 : vector<64x1xi32>
    %c0_i32 = arith.constant 0 : i32
    %7 = vector.broadcast %c0_i32 : i32 to vector<64x1xi32>
    %8 = arith.cmpi sge, %6, %7 : vector<64x1xi32>
    %c-2_i32_0 = arith.constant -2 : i32
    %9 = vector.broadcast %c-2_i32_0 : i32 to vector<64x1xi32>
    %10 = arith.addi %2, %9 : vector<64x1xi32>
    %c8_i32 = arith.constant 8 : i32
    %11 = vector.broadcast %c8_i32 : i32 to vector<64x1xi32>
    %12 = arith.cmpi slt, %10, %11 : vector<64x1xi32>
    %13 = arith.andi %8, %12 : vector<64x1xi1>
    %c-2_i32_1 = arith.constant -2 : i32
    %14 = vector.broadcast %c-2_i32_1 : i32 to vector<64x1xi32>
    %15 = arith.addi %4, %14 : vector<64x1xi32>
    %c0_i32_2 = arith.constant 0 : i32
    %16 = vector.broadcast %c0_i32_2 : i32 to vector<64x1xi32>
    %17 = arith.cmpi sge, %15, %16 : vector<64x1xi32>
    %18 = arith.andi %13, %17 : vector<64x1xi1>
    %c-2_i32_3 = arith.constant -2 : i32
    %19 = vector.broadcast %c-2_i32_3 : i32 to vector<64x1xi32>
    %20 = arith.addi %4, %19 : vector<64x1xi32>
    %c8_i32_4 = arith.constant 8 : i32
    %21 = vector.broadcast %c8_i32_4 : i32 to vector<64x1xi32>
    %22 = arith.cmpi slt, %20, %21 : vector<64x1xi32>
    %23 = arith.andi %18, %22 : vector<64x1xi1>
    %24 = arith.extui %23 : vector<64x1xi1> to vector<64x1xi32>
    %25 = arith.sitofp %24 : vector<64x1xi32> to vector<64x1xf32>
    %c-2_i32_5 = arith.constant -2 : i32
    %26 = vector.broadcast %c-2_i32_5 : i32 to vector<64x1xi32>
    %27 = arith.addi %2, %26 : vector<64x1xi32>
    %c0_i32_6 = arith.constant 0 : i32
    %28 = vector.broadcast %c0_i32_6 : i32 to vector<64x1xi32>
    %29 = arith.cmpi sge, %27, %28 : vector<64x1xi32>
    %c-2_i32_7 = arith.constant -2 : i32
    %30 = vector.broadcast %c-2_i32_7 : i32 to vector<64x1xi32>
    %31 = arith.addi %2, %30 : vector<64x1xi32>
    %c8_i32_8 = arith.constant 8 : i32
    %32 = vector.broadcast %c8_i32_8 : i32 to vector<64x1xi32>
    %33 = arith.cmpi slt, %31, %32 : vector<64x1xi32>
    %34 = arith.andi %29, %33 : vector<64x1xi1>
    %c-1_i32 = arith.constant -1 : i32
    %35 = vector.broadcast %c-1_i32 : i32 to vector<64x1xi32>
    %36 = arith.addi %4, %35 : vector<64x1xi32>
    %c0_i32_9 = arith.constant 0 : i32
    %37 = vector.broadcast %c0_i32_9 : i32 to vector<64x1xi32>
    %38 = arith.cmpi sge, %36, %37 : vector<64x1xi32>
    %39 = arith.andi %34, %38 : vector<64x1xi1>
    %c-1_i32_10 = arith.constant -1 : i32
    %40 = vector.broadcast %c-1_i32_10 : i32 to vector<64x1xi32>
    %41 = arith.addi %4, %40 : vector<64x1xi32>
    %c8_i32_11 = arith.constant 8 : i32
    %42 = vector.broadcast %c8_i32_11 : i32 to vector<64x1xi32>
    %43 = arith.cmpi slt, %41, %42 : vector<64x1xi32>
    %44 = arith.andi %39, %43 : vector<64x1xi1>
    %45 = arith.extui %44 : vector<64x1xi1> to vector<64x1xi32>
    %46 = arith.sitofp %45 : vector<64x1xi32> to vector<64x1xf32>
    %c-2_i32_12 = arith.constant -2 : i32
    %47 = vector.broadcast %c-2_i32_12 : i32 to vector<64x1xi32>
    %48 = arith.addi %2, %47 : vector<64x1xi32>
    %c0_i32_13 = arith.constant 0 : i32
    %49 = vector.broadcast %c0_i32_13 : i32 to vector<64x1xi32>
    %50 = arith.cmpi sge, %48, %49 : vector<64x1xi32>
    %c-2_i32_14 = arith.constant -2 : i32
    %51 = vector.broadcast %c-2_i32_14 : i32 to vector<64x1xi32>
    %52 = arith.addi %2, %51 : vector<64x1xi32>
    %c8_i32_15 = arith.constant 8 : i32
    %53 = vector.broadcast %c8_i32_15 : i32 to vector<64x1xi32>
    %54 = arith.cmpi slt, %52, %53 : vector<64x1xi32>
    %55 = arith.andi %50, %54 : vector<64x1xi1>
    %c0_i32_16 = arith.constant 0 : i32
    %56 = vector.broadcast %c0_i32_16 : i32 to vector<64x1xi32>
    %57 = arith.addi %4, %56 : vector<64x1xi32>
    %c0_i32_17 = arith.constant 0 : i32
    %58 = vector.broadcast %c0_i32_17 : i32 to vector<64x1xi32>
    %59 = arith.cmpi sge, %57, %58 : vector<64x1xi32>
    %60 = arith.andi %55, %59 : vector<64x1xi1>
    %c0_i32_18 = arith.constant 0 : i32
    %61 = vector.broadcast %c0_i32_18 : i32 to vector<64x1xi32>
    %62 = arith.addi %4, %61 : vector<64x1xi32>
    %c8_i32_19 = arith.constant 8 : i32
    %63 = vector.broadcast %c8_i32_19 : i32 to vector<64x1xi32>
    %64 = arith.cmpi slt, %62, %63 : vector<64x1xi32>
    %65 = arith.andi %60, %64 : vector<64x1xi1>
    %66 = arith.extui %65 : vector<64x1xi1> to vector<64x1xi32>
    %67 = arith.sitofp %66 : vector<64x1xi32> to vector<64x1xf32>
    %c-2_i32_20 = arith.constant -2 : i32
    %68 = vector.broadcast %c-2_i32_20 : i32 to vector<64x1xi32>
    %69 = arith.addi %2, %68 : vector<64x1xi32>
    %c0_i32_21 = arith.constant 0 : i32
    %70 = vector.broadcast %c0_i32_21 : i32 to vector<64x1xi32>
    %71 = arith.cmpi sge, %69, %70 : vector<64x1xi32>
    %c-2_i32_22 = arith.constant -2 : i32
    %72 = vector.broadcast %c-2_i32_22 : i32 to vector<64x1xi32>
    %73 = arith.addi %2, %72 : vector<64x1xi32>
    %c8_i32_23 = arith.constant 8 : i32
    %74 = vector.broadcast %c8_i32_23 : i32 to vector<64x1xi32>
    %75 = arith.cmpi slt, %73, %74 : vector<64x1xi32>
    %76 = arith.andi %71, %75 : vector<64x1xi1>
    %c1_i32 = arith.constant 1 : i32
    %77 = vector.broadcast %c1_i32 : i32 to vector<64x1xi32>
    %78 = arith.addi %4, %77 : vector<64x1xi32>
    %c0_i32_24 = arith.constant 0 : i32
    %79 = vector.broadcast %c0_i32_24 : i32 to vector<64x1xi32>
    %80 = arith.cmpi sge, %78, %79 : vector<64x1xi32>
    %81 = arith.andi %76, %80 : vector<64x1xi1>
    %c1_i32_25 = arith.constant 1 : i32
    %82 = vector.broadcast %c1_i32_25 : i32 to vector<64x1xi32>
    %83 = arith.addi %4, %82 : vector<64x1xi32>
    %c8_i32_26 = arith.constant 8 : i32
    %84 = vector.broadcast %c8_i32_26 : i32 to vector<64x1xi32>
    %85 = arith.cmpi slt, %83, %84 : vector<64x1xi32>
    %86 = arith.andi %81, %85 : vector<64x1xi1>
    %87 = arith.extui %86 : vector<64x1xi1> to vector<64x1xi32>
    %88 = arith.sitofp %87 : vector<64x1xi32> to vector<64x1xf32>
    %c-2_i32_27 = arith.constant -2 : i32
    %89 = vector.broadcast %c-2_i32_27 : i32 to vector<64x1xi32>
    %90 = arith.addi %2, %89 : vector<64x1xi32>
    %c0_i32_28 = arith.constant 0 : i32
    %91 = vector.broadcast %c0_i32_28 : i32 to vector<64x1xi32>
    %92 = arith.cmpi sge, %90, %91 : vector<64x1xi32>
    %c-2_i32_29 = arith.constant -2 : i32
    %93 = vector.broadcast %c-2_i32_29 : i32 to vector<64x1xi32>
    %94 = arith.addi %2, %93 : vector<64x1xi32>
    %c8_i32_30 = arith.constant 8 : i32
    %95 = vector.broadcast %c8_i32_30 : i32 to vector<64x1xi32>
    %96 = arith.cmpi slt, %94, %95 : vector<64x1xi32>
    %97 = arith.andi %92, %96 : vector<64x1xi1>
    %c2_i32 = arith.constant 2 : i32
    %98 = vector.broadcast %c2_i32 : i32 to vector<64x1xi32>
    %99 = arith.addi %4, %98 : vector<64x1xi32>
    %c0_i32_31 = arith.constant 0 : i32
    %100 = vector.broadcast %c0_i32_31 : i32 to vector<64x1xi32>
    %101 = arith.cmpi sge, %99, %100 : vector<64x1xi32>
    %102 = arith.andi %97, %101 : vector<64x1xi1>
    %c2_i32_32 = arith.constant 2 : i32
    %103 = vector.broadcast %c2_i32_32 : i32 to vector<64x1xi32>
    %104 = arith.addi %4, %103 : vector<64x1xi32>
    %c8_i32_33 = arith.constant 8 : i32
    %105 = vector.broadcast %c8_i32_33 : i32 to vector<64x1xi32>
    %106 = arith.cmpi slt, %104, %105 : vector<64x1xi32>
    %107 = arith.andi %102, %106 : vector<64x1xi1>
    %108 = arith.extui %107 : vector<64x1xi1> to vector<64x1xi32>
    %109 = arith.sitofp %108 : vector<64x1xi32> to vector<64x1xf32>
    %c-1_i32_34 = arith.constant -1 : i32
    %110 = vector.broadcast %c-1_i32_34 : i32 to vector<64x1xi32>
    %111 = arith.addi %2, %110 : vector<64x1xi32>
    %c0_i32_35 = arith.constant 0 : i32
    %112 = vector.broadcast %c0_i32_35 : i32 to vector<64x1xi32>
    %113 = arith.cmpi sge, %111, %112 : vector<64x1xi32>
    %c-1_i32_36 = arith.constant -1 : i32
    %114 = vector.broadcast %c-1_i32_36 : i32 to vector<64x1xi32>
    %115 = arith.addi %2, %114 : vector<64x1xi32>
    %c8_i32_37 = arith.constant 8 : i32
    %116 = vector.broadcast %c8_i32_37 : i32 to vector<64x1xi32>
    %117 = arith.cmpi slt, %115, %116 : vector<64x1xi32>
    %118 = arith.andi %113, %117 : vector<64x1xi1>
    %c-2_i32_38 = arith.constant -2 : i32
    %119 = vector.broadcast %c-2_i32_38 : i32 to vector<64x1xi32>
    %120 = arith.addi %4, %119 : vector<64x1xi32>
    %c0_i32_39 = arith.constant 0 : i32
    %121 = vector.broadcast %c0_i32_39 : i32 to vector<64x1xi32>
    %122 = arith.cmpi sge, %120, %121 : vector<64x1xi32>
    %123 = arith.andi %118, %122 : vector<64x1xi1>
    %c-2_i32_40 = arith.constant -2 : i32
    %124 = vector.broadcast %c-2_i32_40 : i32 to vector<64x1xi32>
    %125 = arith.addi %4, %124 : vector<64x1xi32>
    %c8_i32_41 = arith.constant 8 : i32
    %126 = vector.broadcast %c8_i32_41 : i32 to vector<64x1xi32>
    %127 = arith.cmpi slt, %125, %126 : vector<64x1xi32>
    %128 = arith.andi %123, %127 : vector<64x1xi1>
    %129 = arith.extui %128 : vector<64x1xi1> to vector<64x1xi32>
    %130 = arith.sitofp %129 : vector<64x1xi32> to vector<64x1xf32>
    %c-1_i32_42 = arith.constant -1 : i32
    %131 = vector.broadcast %c-1_i32_42 : i32 to vector<64x1xi32>
    %132 = arith.addi %2, %131 : vector<64x1xi32>
    %c0_i32_43 = arith.constant 0 : i32
    %133 = vector.broadcast %c0_i32_43 : i32 to vector<64x1xi32>
    %134 = arith.cmpi sge, %132, %133 : vector<64x1xi32>
    %c-1_i32_44 = arith.constant -1 : i32
    %135 = vector.broadcast %c-1_i32_44 : i32 to vector<64x1xi32>
    %136 = arith.addi %2, %135 : vector<64x1xi32>
    %c8_i32_45 = arith.constant 8 : i32
    %137 = vector.broadcast %c8_i32_45 : i32 to vector<64x1xi32>
    %138 = arith.cmpi slt, %136, %137 : vector<64x1xi32>
    %139 = arith.andi %134, %138 : vector<64x1xi1>
    %c-1_i32_46 = arith.constant -1 : i32
    %140 = vector.broadcast %c-1_i32_46 : i32 to vector<64x1xi32>
    %141 = arith.addi %4, %140 : vector<64x1xi32>
    %c0_i32_47 = arith.constant 0 : i32
    %142 = vector.broadcast %c0_i32_47 : i32 to vector<64x1xi32>
    %143 = arith.cmpi sge, %141, %142 : vector<64x1xi32>
    %144 = arith.andi %139, %143 : vector<64x1xi1>
    %c-1_i32_48 = arith.constant -1 : i32
    %145 = vector.broadcast %c-1_i32_48 : i32 to vector<64x1xi32>
    %146 = arith.addi %4, %145 : vector<64x1xi32>
    %c8_i32_49 = arith.constant 8 : i32
    %147 = vector.broadcast %c8_i32_49 : i32 to vector<64x1xi32>
    %148 = arith.cmpi slt, %146, %147 : vector<64x1xi32>
    %149 = arith.andi %144, %148 : vector<64x1xi1>
    %150 = arith.extui %149 : vector<64x1xi1> to vector<64x1xi32>
    %151 = arith.sitofp %150 : vector<64x1xi32> to vector<64x1xf32>
    %c-1_i32_50 = arith.constant -1 : i32
    %152 = vector.broadcast %c-1_i32_50 : i32 to vector<64x1xi32>
    %153 = arith.addi %2, %152 : vector<64x1xi32>
    %c0_i32_51 = arith.constant 0 : i32
    %154 = vector.broadcast %c0_i32_51 : i32 to vector<64x1xi32>
    %155 = arith.cmpi sge, %153, %154 : vector<64x1xi32>
    %c-1_i32_52 = arith.constant -1 : i32
    %156 = vector.broadcast %c-1_i32_52 : i32 to vector<64x1xi32>
    %157 = arith.addi %2, %156 : vector<64x1xi32>
    %c8_i32_53 = arith.constant 8 : i32
    %158 = vector.broadcast %c8_i32_53 : i32 to vector<64x1xi32>
    %159 = arith.cmpi slt, %157, %158 : vector<64x1xi32>
    %160 = arith.andi %155, %159 : vector<64x1xi1>
    %c0_i32_54 = arith.constant 0 : i32
    %161 = vector.broadcast %c0_i32_54 : i32 to vector<64x1xi32>
    %162 = arith.addi %4, %161 : vector<64x1xi32>
    %c0_i32_55 = arith.constant 0 : i32
    %163 = vector.broadcast %c0_i32_55 : i32 to vector<64x1xi32>
    %164 = arith.cmpi sge, %162, %163 : vector<64x1xi32>
    %165 = arith.andi %160, %164 : vector<64x1xi1>
    %c0_i32_56 = arith.constant 0 : i32
    %166 = vector.broadcast %c0_i32_56 : i32 to vector<64x1xi32>
    %167 = arith.addi %4, %166 : vector<64x1xi32>
    %c8_i32_57 = arith.constant 8 : i32
    %168 = vector.broadcast %c8_i32_57 : i32 to vector<64x1xi32>
    %169 = arith.cmpi slt, %167, %168 : vector<64x1xi32>
    %170 = arith.andi %165, %169 : vector<64x1xi1>
    %171 = arith.extui %170 : vector<64x1xi1> to vector<64x1xi32>
    %172 = arith.sitofp %171 : vector<64x1xi32> to vector<64x1xf32>
    %c-1_i32_58 = arith.constant -1 : i32
    %173 = vector.broadcast %c-1_i32_58 : i32 to vector<64x1xi32>
    %174 = arith.addi %2, %173 : vector<64x1xi32>
    %c0_i32_59 = arith.constant 0 : i32
    %175 = vector.broadcast %c0_i32_59 : i32 to vector<64x1xi32>
    %176 = arith.cmpi sge, %174, %175 : vector<64x1xi32>
    %c-1_i32_60 = arith.constant -1 : i32
    %177 = vector.broadcast %c-1_i32_60 : i32 to vector<64x1xi32>
    %178 = arith.addi %2, %177 : vector<64x1xi32>
    %c8_i32_61 = arith.constant 8 : i32
    %179 = vector.broadcast %c8_i32_61 : i32 to vector<64x1xi32>
    %180 = arith.cmpi slt, %178, %179 : vector<64x1xi32>
    %181 = arith.andi %176, %180 : vector<64x1xi1>
    %c1_i32_62 = arith.constant 1 : i32
    %182 = vector.broadcast %c1_i32_62 : i32 to vector<64x1xi32>
    %183 = arith.addi %4, %182 : vector<64x1xi32>
    %c0_i32_63 = arith.constant 0 : i32
    %184 = vector.broadcast %c0_i32_63 : i32 to vector<64x1xi32>
    %185 = arith.cmpi sge, %183, %184 : vector<64x1xi32>
    %186 = arith.andi %181, %185 : vector<64x1xi1>
    %c1_i32_64 = arith.constant 1 : i32
    %187 = vector.broadcast %c1_i32_64 : i32 to vector<64x1xi32>
    %188 = arith.addi %4, %187 : vector<64x1xi32>
    %c8_i32_65 = arith.constant 8 : i32
    %189 = vector.broadcast %c8_i32_65 : i32 to vector<64x1xi32>
    %190 = arith.cmpi slt, %188, %189 : vector<64x1xi32>
    %191 = arith.andi %186, %190 : vector<64x1xi1>
    %192 = arith.extui %191 : vector<64x1xi1> to vector<64x1xi32>
    %193 = arith.sitofp %192 : vector<64x1xi32> to vector<64x1xf32>
    %c-1_i32_66 = arith.constant -1 : i32
    %194 = vector.broadcast %c-1_i32_66 : i32 to vector<64x1xi32>
    %195 = arith.addi %2, %194 : vector<64x1xi32>
    %c0_i32_67 = arith.constant 0 : i32
    %196 = vector.broadcast %c0_i32_67 : i32 to vector<64x1xi32>
    %197 = arith.cmpi sge, %195, %196 : vector<64x1xi32>
    %c-1_i32_68 = arith.constant -1 : i32
    %198 = vector.broadcast %c-1_i32_68 : i32 to vector<64x1xi32>
    %199 = arith.addi %2, %198 : vector<64x1xi32>
    %c8_i32_69 = arith.constant 8 : i32
    %200 = vector.broadcast %c8_i32_69 : i32 to vector<64x1xi32>
    %201 = arith.cmpi slt, %199, %200 : vector<64x1xi32>
    %202 = arith.andi %197, %201 : vector<64x1xi1>
    %c2_i32_70 = arith.constant 2 : i32
    %203 = vector.broadcast %c2_i32_70 : i32 to vector<64x1xi32>
    %204 = arith.addi %4, %203 : vector<64x1xi32>
    %c0_i32_71 = arith.constant 0 : i32
    %205 = vector.broadcast %c0_i32_71 : i32 to vector<64x1xi32>
    %206 = arith.cmpi sge, %204, %205 : vector<64x1xi32>
    %207 = arith.andi %202, %206 : vector<64x1xi1>
    %c2_i32_72 = arith.constant 2 : i32
    %208 = vector.broadcast %c2_i32_72 : i32 to vector<64x1xi32>
    %209 = arith.addi %4, %208 : vector<64x1xi32>
    %c8_i32_73 = arith.constant 8 : i32
    %210 = vector.broadcast %c8_i32_73 : i32 to vector<64x1xi32>
    %211 = arith.cmpi slt, %209, %210 : vector<64x1xi32>
    %212 = arith.andi %207, %211 : vector<64x1xi1>
    %213 = arith.extui %212 : vector<64x1xi1> to vector<64x1xi32>
    %214 = arith.sitofp %213 : vector<64x1xi32> to vector<64x1xf32>
    %c0_i32_74 = arith.constant 0 : i32
    %215 = vector.broadcast %c0_i32_74 : i32 to vector<64x1xi32>
    %216 = arith.addi %2, %215 : vector<64x1xi32>
    %c0_i32_75 = arith.constant 0 : i32
    %217 = vector.broadcast %c0_i32_75 : i32 to vector<64x1xi32>
    %218 = arith.cmpi sge, %216, %217 : vector<64x1xi32>
    %c0_i32_76 = arith.constant 0 : i32
    %219 = vector.broadcast %c0_i32_76 : i32 to vector<64x1xi32>
    %220 = arith.addi %2, %219 : vector<64x1xi32>
    %c8_i32_77 = arith.constant 8 : i32
    %221 = vector.broadcast %c8_i32_77 : i32 to vector<64x1xi32>
    %222 = arith.cmpi slt, %220, %221 : vector<64x1xi32>
    %223 = arith.andi %218, %222 : vector<64x1xi1>
    %c-2_i32_78 = arith.constant -2 : i32
    %224 = vector.broadcast %c-2_i32_78 : i32 to vector<64x1xi32>
    %225 = arith.addi %4, %224 : vector<64x1xi32>
    %c0_i32_79 = arith.constant 0 : i32
    %226 = vector.broadcast %c0_i32_79 : i32 to vector<64x1xi32>
    %227 = arith.cmpi sge, %225, %226 : vector<64x1xi32>
    %228 = arith.andi %223, %227 : vector<64x1xi1>
    %c-2_i32_80 = arith.constant -2 : i32
    %229 = vector.broadcast %c-2_i32_80 : i32 to vector<64x1xi32>
    %230 = arith.addi %4, %229 : vector<64x1xi32>
    %c8_i32_81 = arith.constant 8 : i32
    %231 = vector.broadcast %c8_i32_81 : i32 to vector<64x1xi32>
    %232 = arith.cmpi slt, %230, %231 : vector<64x1xi32>
    %233 = arith.andi %228, %232 : vector<64x1xi1>
    %234 = arith.extui %233 : vector<64x1xi1> to vector<64x1xi32>
    %235 = arith.sitofp %234 : vector<64x1xi32> to vector<64x1xf32>
    %c0_i32_82 = arith.constant 0 : i32
    %236 = vector.broadcast %c0_i32_82 : i32 to vector<64x1xi32>
    %237 = arith.addi %2, %236 : vector<64x1xi32>
    %c0_i32_83 = arith.constant 0 : i32
    %238 = vector.broadcast %c0_i32_83 : i32 to vector<64x1xi32>
    %239 = arith.cmpi sge, %237, %238 : vector<64x1xi32>
    %c0_i32_84 = arith.constant 0 : i32
    %240 = vector.broadcast %c0_i32_84 : i32 to vector<64x1xi32>
    %241 = arith.addi %2, %240 : vector<64x1xi32>
    %c8_i32_85 = arith.constant 8 : i32
    %242 = vector.broadcast %c8_i32_85 : i32 to vector<64x1xi32>
    %243 = arith.cmpi slt, %241, %242 : vector<64x1xi32>
    %244 = arith.andi %239, %243 : vector<64x1xi1>
    %c-1_i32_86 = arith.constant -1 : i32
    %245 = vector.broadcast %c-1_i32_86 : i32 to vector<64x1xi32>
    %246 = arith.addi %4, %245 : vector<64x1xi32>
    %c0_i32_87 = arith.constant 0 : i32
    %247 = vector.broadcast %c0_i32_87 : i32 to vector<64x1xi32>
    %248 = arith.cmpi sge, %246, %247 : vector<64x1xi32>
    %249 = arith.andi %244, %248 : vector<64x1xi1>
    %c-1_i32_88 = arith.constant -1 : i32
    %250 = vector.broadcast %c-1_i32_88 : i32 to vector<64x1xi32>
    %251 = arith.addi %4, %250 : vector<64x1xi32>
    %c8_i32_89 = arith.constant 8 : i32
    %252 = vector.broadcast %c8_i32_89 : i32 to vector<64x1xi32>
    %253 = arith.cmpi slt, %251, %252 : vector<64x1xi32>
    %254 = arith.andi %249, %253 : vector<64x1xi1>
    %255 = arith.extui %254 : vector<64x1xi1> to vector<64x1xi32>
    %256 = arith.sitofp %255 : vector<64x1xi32> to vector<64x1xf32>
    %c0_i32_90 = arith.constant 0 : i32
    %257 = vector.broadcast %c0_i32_90 : i32 to vector<64x1xi32>
    %258 = arith.addi %2, %257 : vector<64x1xi32>
    %c0_i32_91 = arith.constant 0 : i32
    %259 = vector.broadcast %c0_i32_91 : i32 to vector<64x1xi32>
    %260 = arith.cmpi sge, %258, %259 : vector<64x1xi32>
    %c0_i32_92 = arith.constant 0 : i32
    %261 = vector.broadcast %c0_i32_92 : i32 to vector<64x1xi32>
    %262 = arith.addi %2, %261 : vector<64x1xi32>
    %c8_i32_93 = arith.constant 8 : i32
    %263 = vector.broadcast %c8_i32_93 : i32 to vector<64x1xi32>
    %264 = arith.cmpi slt, %262, %263 : vector<64x1xi32>
    %265 = arith.andi %260, %264 : vector<64x1xi1>
    %c1_i32_94 = arith.constant 1 : i32
    %266 = vector.broadcast %c1_i32_94 : i32 to vector<64x1xi32>
    %267 = arith.addi %4, %266 : vector<64x1xi32>
    %c0_i32_95 = arith.constant 0 : i32
    %268 = vector.broadcast %c0_i32_95 : i32 to vector<64x1xi32>
    %269 = arith.cmpi sge, %267, %268 : vector<64x1xi32>
    %270 = arith.andi %265, %269 : vector<64x1xi1>
    %c1_i32_96 = arith.constant 1 : i32
    %271 = vector.broadcast %c1_i32_96 : i32 to vector<64x1xi32>
    %272 = arith.addi %4, %271 : vector<64x1xi32>
    %c8_i32_97 = arith.constant 8 : i32
    %273 = vector.broadcast %c8_i32_97 : i32 to vector<64x1xi32>
    %274 = arith.cmpi slt, %272, %273 : vector<64x1xi32>
    %275 = arith.andi %270, %274 : vector<64x1xi1>
    %276 = arith.extui %275 : vector<64x1xi1> to vector<64x1xi32>
    %277 = arith.sitofp %276 : vector<64x1xi32> to vector<64x1xf32>
    %c0_i32_98 = arith.constant 0 : i32
    %278 = vector.broadcast %c0_i32_98 : i32 to vector<64x1xi32>
    %279 = arith.addi %2, %278 : vector<64x1xi32>
    %c0_i32_99 = arith.constant 0 : i32
    %280 = vector.broadcast %c0_i32_99 : i32 to vector<64x1xi32>
    %281 = arith.cmpi sge, %279, %280 : vector<64x1xi32>
    %c0_i32_100 = arith.constant 0 : i32
    %282 = vector.broadcast %c0_i32_100 : i32 to vector<64x1xi32>
    %283 = arith.addi %2, %282 : vector<64x1xi32>
    %c8_i32_101 = arith.constant 8 : i32
    %284 = vector.broadcast %c8_i32_101 : i32 to vector<64x1xi32>
    %285 = arith.cmpi slt, %283, %284 : vector<64x1xi32>
    %286 = arith.andi %281, %285 : vector<64x1xi1>
    %c2_i32_102 = arith.constant 2 : i32
    %287 = vector.broadcast %c2_i32_102 : i32 to vector<64x1xi32>
    %288 = arith.addi %4, %287 : vector<64x1xi32>
    %c0_i32_103 = arith.constant 0 : i32
    %289 = vector.broadcast %c0_i32_103 : i32 to vector<64x1xi32>
    %290 = arith.cmpi sge, %288, %289 : vector<64x1xi32>
    %291 = arith.andi %286, %290 : vector<64x1xi1>
    %c2_i32_104 = arith.constant 2 : i32
    %292 = vector.broadcast %c2_i32_104 : i32 to vector<64x1xi32>
    %293 = arith.addi %4, %292 : vector<64x1xi32>
    %c8_i32_105 = arith.constant 8 : i32
    %294 = vector.broadcast %c8_i32_105 : i32 to vector<64x1xi32>
    %295 = arith.cmpi slt, %293, %294 : vector<64x1xi32>
    %296 = arith.andi %291, %295 : vector<64x1xi1>
    %297 = arith.extui %296 : vector<64x1xi1> to vector<64x1xi32>
    %298 = arith.sitofp %297 : vector<64x1xi32> to vector<64x1xf32>
    %c1_i32_106 = arith.constant 1 : i32
    %299 = vector.broadcast %c1_i32_106 : i32 to vector<64x1xi32>
    %300 = arith.addi %2, %299 : vector<64x1xi32>
    %c0_i32_107 = arith.constant 0 : i32
    %301 = vector.broadcast %c0_i32_107 : i32 to vector<64x1xi32>
    %302 = arith.cmpi sge, %300, %301 : vector<64x1xi32>
    %c1_i32_108 = arith.constant 1 : i32
    %303 = vector.broadcast %c1_i32_108 : i32 to vector<64x1xi32>
    %304 = arith.addi %2, %303 : vector<64x1xi32>
    %c8_i32_109 = arith.constant 8 : i32
    %305 = vector.broadcast %c8_i32_109 : i32 to vector<64x1xi32>
    %306 = arith.cmpi slt, %304, %305 : vector<64x1xi32>
    %307 = arith.andi %302, %306 : vector<64x1xi1>
    %c-2_i32_110 = arith.constant -2 : i32
    %308 = vector.broadcast %c-2_i32_110 : i32 to vector<64x1xi32>
    %309 = arith.addi %4, %308 : vector<64x1xi32>
    %c0_i32_111 = arith.constant 0 : i32
    %310 = vector.broadcast %c0_i32_111 : i32 to vector<64x1xi32>
    %311 = arith.cmpi sge, %309, %310 : vector<64x1xi32>
    %312 = arith.andi %307, %311 : vector<64x1xi1>
    %c-2_i32_112 = arith.constant -2 : i32
    %313 = vector.broadcast %c-2_i32_112 : i32 to vector<64x1xi32>
    %314 = arith.addi %4, %313 : vector<64x1xi32>
    %c8_i32_113 = arith.constant 8 : i32
    %315 = vector.broadcast %c8_i32_113 : i32 to vector<64x1xi32>
    %316 = arith.cmpi slt, %314, %315 : vector<64x1xi32>
    %317 = arith.andi %312, %316 : vector<64x1xi1>
    %318 = arith.extui %317 : vector<64x1xi1> to vector<64x1xi32>
    %319 = arith.sitofp %318 : vector<64x1xi32> to vector<64x1xf32>
    %c1_i32_114 = arith.constant 1 : i32
    %320 = vector.broadcast %c1_i32_114 : i32 to vector<64x1xi32>
    %321 = arith.addi %2, %320 : vector<64x1xi32>
    %c0_i32_115 = arith.constant 0 : i32
    %322 = vector.broadcast %c0_i32_115 : i32 to vector<64x1xi32>
    %323 = arith.cmpi sge, %321, %322 : vector<64x1xi32>
    %c1_i32_116 = arith.constant 1 : i32
    %324 = vector.broadcast %c1_i32_116 : i32 to vector<64x1xi32>
    %325 = arith.addi %2, %324 : vector<64x1xi32>
    %c8_i32_117 = arith.constant 8 : i32
    %326 = vector.broadcast %c8_i32_117 : i32 to vector<64x1xi32>
    %327 = arith.cmpi slt, %325, %326 : vector<64x1xi32>
    %328 = arith.andi %323, %327 : vector<64x1xi1>
    %c-1_i32_118 = arith.constant -1 : i32
    %329 = vector.broadcast %c-1_i32_118 : i32 to vector<64x1xi32>
    %330 = arith.addi %4, %329 : vector<64x1xi32>
    %c0_i32_119 = arith.constant 0 : i32
    %331 = vector.broadcast %c0_i32_119 : i32 to vector<64x1xi32>
    %332 = arith.cmpi sge, %330, %331 : vector<64x1xi32>
    %333 = arith.andi %328, %332 : vector<64x1xi1>
    %c-1_i32_120 = arith.constant -1 : i32
    %334 = vector.broadcast %c-1_i32_120 : i32 to vector<64x1xi32>
    %335 = arith.addi %4, %334 : vector<64x1xi32>
    %c8_i32_121 = arith.constant 8 : i32
    %336 = vector.broadcast %c8_i32_121 : i32 to vector<64x1xi32>
    %337 = arith.cmpi slt, %335, %336 : vector<64x1xi32>
    %338 = arith.andi %333, %337 : vector<64x1xi1>
    %339 = arith.extui %338 : vector<64x1xi1> to vector<64x1xi32>
    %340 = arith.sitofp %339 : vector<64x1xi32> to vector<64x1xf32>
    %c1_i32_122 = arith.constant 1 : i32
    %341 = vector.broadcast %c1_i32_122 : i32 to vector<64x1xi32>
    %342 = arith.addi %2, %341 : vector<64x1xi32>
    %c0_i32_123 = arith.constant 0 : i32
    %343 = vector.broadcast %c0_i32_123 : i32 to vector<64x1xi32>
    %344 = arith.cmpi sge, %342, %343 : vector<64x1xi32>
    %c1_i32_124 = arith.constant 1 : i32
    %345 = vector.broadcast %c1_i32_124 : i32 to vector<64x1xi32>
    %346 = arith.addi %2, %345 : vector<64x1xi32>
    %c8_i32_125 = arith.constant 8 : i32
    %347 = vector.broadcast %c8_i32_125 : i32 to vector<64x1xi32>
    %348 = arith.cmpi slt, %346, %347 : vector<64x1xi32>
    %349 = arith.andi %344, %348 : vector<64x1xi1>
    %c0_i32_126 = arith.constant 0 : i32
    %350 = vector.broadcast %c0_i32_126 : i32 to vector<64x1xi32>
    %351 = arith.addi %4, %350 : vector<64x1xi32>
    %c0_i32_127 = arith.constant 0 : i32
    %352 = vector.broadcast %c0_i32_127 : i32 to vector<64x1xi32>
    %353 = arith.cmpi sge, %351, %352 : vector<64x1xi32>
    %354 = arith.andi %349, %353 : vector<64x1xi1>
    %c0_i32_128 = arith.constant 0 : i32
    %355 = vector.broadcast %c0_i32_128 : i32 to vector<64x1xi32>
    %356 = arith.addi %4, %355 : vector<64x1xi32>
    %c8_i32_129 = arith.constant 8 : i32
    %357 = vector.broadcast %c8_i32_129 : i32 to vector<64x1xi32>
    %358 = arith.cmpi slt, %356, %357 : vector<64x1xi32>
    %359 = arith.andi %354, %358 : vector<64x1xi1>
    %360 = arith.extui %359 : vector<64x1xi1> to vector<64x1xi32>
    %361 = arith.sitofp %360 : vector<64x1xi32> to vector<64x1xf32>
    %c1_i32_130 = arith.constant 1 : i32
    %362 = vector.broadcast %c1_i32_130 : i32 to vector<64x1xi32>
    %363 = arith.addi %2, %362 : vector<64x1xi32>
    %c0_i32_131 = arith.constant 0 : i32
    %364 = vector.broadcast %c0_i32_131 : i32 to vector<64x1xi32>
    %365 = arith.cmpi sge, %363, %364 : vector<64x1xi32>
    %c1_i32_132 = arith.constant 1 : i32
    %366 = vector.broadcast %c1_i32_132 : i32 to vector<64x1xi32>
    %367 = arith.addi %2, %366 : vector<64x1xi32>
    %c8_i32_133 = arith.constant 8 : i32
    %368 = vector.broadcast %c8_i32_133 : i32 to vector<64x1xi32>
    %369 = arith.cmpi slt, %367, %368 : vector<64x1xi32>
    %370 = arith.andi %365, %369 : vector<64x1xi1>
    %c1_i32_134 = arith.constant 1 : i32
    %371 = vector.broadcast %c1_i32_134 : i32 to vector<64x1xi32>
    %372 = arith.addi %4, %371 : vector<64x1xi32>
    %c0_i32_135 = arith.constant 0 : i32
    %373 = vector.broadcast %c0_i32_135 : i32 to vector<64x1xi32>
    %374 = arith.cmpi sge, %372, %373 : vector<64x1xi32>
    %375 = arith.andi %370, %374 : vector<64x1xi1>
    %c1_i32_136 = arith.constant 1 : i32
    %376 = vector.broadcast %c1_i32_136 : i32 to vector<64x1xi32>
    %377 = arith.addi %4, %376 : vector<64x1xi32>
    %c8_i32_137 = arith.constant 8 : i32
    %378 = vector.broadcast %c8_i32_137 : i32 to vector<64x1xi32>
    %379 = arith.cmpi slt, %377, %378 : vector<64x1xi32>
    %380 = arith.andi %375, %379 : vector<64x1xi1>
    %381 = arith.extui %380 : vector<64x1xi1> to vector<64x1xi32>
    %382 = arith.sitofp %381 : vector<64x1xi32> to vector<64x1xf32>
    %c1_i32_138 = arith.constant 1 : i32
    %383 = vector.broadcast %c1_i32_138 : i32 to vector<64x1xi32>
    %384 = arith.addi %2, %383 : vector<64x1xi32>
    %c0_i32_139 = arith.constant 0 : i32
    %385 = vector.broadcast %c0_i32_139 : i32 to vector<64x1xi32>
    %386 = arith.cmpi sge, %384, %385 : vector<64x1xi32>
    %c1_i32_140 = arith.constant 1 : i32
    %387 = vector.broadcast %c1_i32_140 : i32 to vector<64x1xi32>
    %388 = arith.addi %2, %387 : vector<64x1xi32>
    %c8_i32_141 = arith.constant 8 : i32
    %389 = vector.broadcast %c8_i32_141 : i32 to vector<64x1xi32>
    %390 = arith.cmpi slt, %388, %389 : vector<64x1xi32>
    %391 = arith.andi %386, %390 : vector<64x1xi1>
    %c2_i32_142 = arith.constant 2 : i32
    %392 = vector.broadcast %c2_i32_142 : i32 to vector<64x1xi32>
    %393 = arith.addi %4, %392 : vector<64x1xi32>
    %c0_i32_143 = arith.constant 0 : i32
    %394 = vector.broadcast %c0_i32_143 : i32 to vector<64x1xi32>
    %395 = arith.cmpi sge, %393, %394 : vector<64x1xi32>
    %396 = arith.andi %391, %395 : vector<64x1xi1>
    %c2_i32_144 = arith.constant 2 : i32
    %397 = vector.broadcast %c2_i32_144 : i32 to vector<64x1xi32>
    %398 = arith.addi %4, %397 : vector<64x1xi32>
    %c8_i32_145 = arith.constant 8 : i32
    %399 = vector.broadcast %c8_i32_145 : i32 to vector<64x1xi32>
    %400 = arith.cmpi slt, %398, %399 : vector<64x1xi32>
    %401 = arith.andi %396, %400 : vector<64x1xi1>
    %402 = arith.extui %401 : vector<64x1xi1> to vector<64x1xi32>
    %403 = arith.sitofp %402 : vector<64x1xi32> to vector<64x1xf32>
    %c2_i32_146 = arith.constant 2 : i32
    %404 = vector.broadcast %c2_i32_146 : i32 to vector<64x1xi32>
    %405 = arith.addi %2, %404 : vector<64x1xi32>
    %c0_i32_147 = arith.constant 0 : i32
    %406 = vector.broadcast %c0_i32_147 : i32 to vector<64x1xi32>
    %407 = arith.cmpi sge, %405, %406 : vector<64x1xi32>
    %c2_i32_148 = arith.constant 2 : i32
    %408 = vector.broadcast %c2_i32_148 : i32 to vector<64x1xi32>
    %409 = arith.addi %2, %408 : vector<64x1xi32>
    %c8_i32_149 = arith.constant 8 : i32
    %410 = vector.broadcast %c8_i32_149 : i32 to vector<64x1xi32>
    %411 = arith.cmpi slt, %409, %410 : vector<64x1xi32>
    %412 = arith.andi %407, %411 : vector<64x1xi1>
    %c-2_i32_150 = arith.constant -2 : i32
    %413 = vector.broadcast %c-2_i32_150 : i32 to vector<64x1xi32>
    %414 = arith.addi %4, %413 : vector<64x1xi32>
    %c0_i32_151 = arith.constant 0 : i32
    %415 = vector.broadcast %c0_i32_151 : i32 to vector<64x1xi32>
    %416 = arith.cmpi sge, %414, %415 : vector<64x1xi32>
    %417 = arith.andi %412, %416 : vector<64x1xi1>
    %c-2_i32_152 = arith.constant -2 : i32
    %418 = vector.broadcast %c-2_i32_152 : i32 to vector<64x1xi32>
    %419 = arith.addi %4, %418 : vector<64x1xi32>
    %c8_i32_153 = arith.constant 8 : i32
    %420 = vector.broadcast %c8_i32_153 : i32 to vector<64x1xi32>
    %421 = arith.cmpi slt, %419, %420 : vector<64x1xi32>
    %422 = arith.andi %417, %421 : vector<64x1xi1>
    %423 = arith.extui %422 : vector<64x1xi1> to vector<64x1xi32>
    %424 = arith.sitofp %423 : vector<64x1xi32> to vector<64x1xf32>
    %c2_i32_154 = arith.constant 2 : i32
    %425 = vector.broadcast %c2_i32_154 : i32 to vector<64x1xi32>
    %426 = arith.addi %2, %425 : vector<64x1xi32>
    %c0_i32_155 = arith.constant 0 : i32
    %427 = vector.broadcast %c0_i32_155 : i32 to vector<64x1xi32>
    %428 = arith.cmpi sge, %426, %427 : vector<64x1xi32>
    %c2_i32_156 = arith.constant 2 : i32
    %429 = vector.broadcast %c2_i32_156 : i32 to vector<64x1xi32>
    %430 = arith.addi %2, %429 : vector<64x1xi32>
    %c8_i32_157 = arith.constant 8 : i32
    %431 = vector.broadcast %c8_i32_157 : i32 to vector<64x1xi32>
    %432 = arith.cmpi slt, %430, %431 : vector<64x1xi32>
    %433 = arith.andi %428, %432 : vector<64x1xi1>
    %c-1_i32_158 = arith.constant -1 : i32
    %434 = vector.broadcast %c-1_i32_158 : i32 to vector<64x1xi32>
    %435 = arith.addi %4, %434 : vector<64x1xi32>
    %c0_i32_159 = arith.constant 0 : i32
    %436 = vector.broadcast %c0_i32_159 : i32 to vector<64x1xi32>
    %437 = arith.cmpi sge, %435, %436 : vector<64x1xi32>
    %438 = arith.andi %433, %437 : vector<64x1xi1>
    %c-1_i32_160 = arith.constant -1 : i32
    %439 = vector.broadcast %c-1_i32_160 : i32 to vector<64x1xi32>
    %440 = arith.addi %4, %439 : vector<64x1xi32>
    %c8_i32_161 = arith.constant 8 : i32
    %441 = vector.broadcast %c8_i32_161 : i32 to vector<64x1xi32>
    %442 = arith.cmpi slt, %440, %441 : vector<64x1xi32>
    %443 = arith.andi %438, %442 : vector<64x1xi1>
    %444 = arith.extui %443 : vector<64x1xi1> to vector<64x1xi32>
    %445 = arith.sitofp %444 : vector<64x1xi32> to vector<64x1xf32>
    %c2_i32_162 = arith.constant 2 : i32
    %446 = vector.broadcast %c2_i32_162 : i32 to vector<64x1xi32>
    %447 = arith.addi %2, %446 : vector<64x1xi32>
    %c0_i32_163 = arith.constant 0 : i32
    %448 = vector.broadcast %c0_i32_163 : i32 to vector<64x1xi32>
    %449 = arith.cmpi sge, %447, %448 : vector<64x1xi32>
    %c2_i32_164 = arith.constant 2 : i32
    %450 = vector.broadcast %c2_i32_164 : i32 to vector<64x1xi32>
    %451 = arith.addi %2, %450 : vector<64x1xi32>
    %c8_i32_165 = arith.constant 8 : i32
    %452 = vector.broadcast %c8_i32_165 : i32 to vector<64x1xi32>
    %453 = arith.cmpi slt, %451, %452 : vector<64x1xi32>
    %454 = arith.andi %449, %453 : vector<64x1xi1>
    %c0_i32_166 = arith.constant 0 : i32
    %455 = vector.broadcast %c0_i32_166 : i32 to vector<64x1xi32>
    %456 = arith.addi %4, %455 : vector<64x1xi32>
    %c0_i32_167 = arith.constant 0 : i32
    %457 = vector.broadcast %c0_i32_167 : i32 to vector<64x1xi32>
    %458 = arith.cmpi sge, %456, %457 : vector<64x1xi32>
    %459 = arith.andi %454, %458 : vector<64x1xi1>
    %c0_i32_168 = arith.constant 0 : i32
    %460 = vector.broadcast %c0_i32_168 : i32 to vector<64x1xi32>
    %461 = arith.addi %4, %460 : vector<64x1xi32>
    %c8_i32_169 = arith.constant 8 : i32
    %462 = vector.broadcast %c8_i32_169 : i32 to vector<64x1xi32>
    %463 = arith.cmpi slt, %461, %462 : vector<64x1xi32>
    %464 = arith.andi %459, %463 : vector<64x1xi1>
    %465 = arith.extui %464 : vector<64x1xi1> to vector<64x1xi32>
    %466 = arith.sitofp %465 : vector<64x1xi32> to vector<64x1xf32>
    %c2_i32_170 = arith.constant 2 : i32
    %467 = vector.broadcast %c2_i32_170 : i32 to vector<64x1xi32>
    %468 = arith.addi %2, %467 : vector<64x1xi32>
    %c0_i32_171 = arith.constant 0 : i32
    %469 = vector.broadcast %c0_i32_171 : i32 to vector<64x1xi32>
    %470 = arith.cmpi sge, %468, %469 : vector<64x1xi32>
    %c2_i32_172 = arith.constant 2 : i32
    %471 = vector.broadcast %c2_i32_172 : i32 to vector<64x1xi32>
    %472 = arith.addi %2, %471 : vector<64x1xi32>
    %c8_i32_173 = arith.constant 8 : i32
    %473 = vector.broadcast %c8_i32_173 : i32 to vector<64x1xi32>
    %474 = arith.cmpi slt, %472, %473 : vector<64x1xi32>
    %475 = arith.andi %470, %474 : vector<64x1xi1>
    %c1_i32_174 = arith.constant 1 : i32
    %476 = vector.broadcast %c1_i32_174 : i32 to vector<64x1xi32>
    %477 = arith.addi %4, %476 : vector<64x1xi32>
    %c0_i32_175 = arith.constant 0 : i32
    %478 = vector.broadcast %c0_i32_175 : i32 to vector<64x1xi32>
    %479 = arith.cmpi sge, %477, %478 : vector<64x1xi32>
    %480 = arith.andi %475, %479 : vector<64x1xi1>
    %c1_i32_176 = arith.constant 1 : i32
    %481 = vector.broadcast %c1_i32_176 : i32 to vector<64x1xi32>
    %482 = arith.addi %4, %481 : vector<64x1xi32>
    %c8_i32_177 = arith.constant 8 : i32
    %483 = vector.broadcast %c8_i32_177 : i32 to vector<64x1xi32>
    %484 = arith.cmpi slt, %482, %483 : vector<64x1xi32>
    %485 = arith.andi %480, %484 : vector<64x1xi1>
    %486 = arith.extui %485 : vector<64x1xi1> to vector<64x1xi32>
    %487 = arith.sitofp %486 : vector<64x1xi32> to vector<64x1xf32>
    %c2_i32_178 = arith.constant 2 : i32
    %488 = vector.broadcast %c2_i32_178 : i32 to vector<64x1xi32>
    %489 = arith.addi %2, %488 : vector<64x1xi32>
    %c0_i32_179 = arith.constant 0 : i32
    %490 = vector.broadcast %c0_i32_179 : i32 to vector<64x1xi32>
    %491 = arith.cmpi sge, %489, %490 : vector<64x1xi32>
    %c2_i32_180 = arith.constant 2 : i32
    %492 = vector.broadcast %c2_i32_180 : i32 to vector<64x1xi32>
    %493 = arith.addi %2, %492 : vector<64x1xi32>
    %c8_i32_181 = arith.constant 8 : i32
    %494 = vector.broadcast %c8_i32_181 : i32 to vector<64x1xi32>
    %495 = arith.cmpi slt, %493, %494 : vector<64x1xi32>
    %496 = arith.andi %491, %495 : vector<64x1xi1>
    %c2_i32_182 = arith.constant 2 : i32
    %497 = vector.broadcast %c2_i32_182 : i32 to vector<64x1xi32>
    %498 = arith.addi %4, %497 : vector<64x1xi32>
    %c0_i32_183 = arith.constant 0 : i32
    %499 = vector.broadcast %c0_i32_183 : i32 to vector<64x1xi32>
    %500 = arith.cmpi sge, %498, %499 : vector<64x1xi32>
    %501 = arith.andi %496, %500 : vector<64x1xi1>
    %c2_i32_184 = arith.constant 2 : i32
    %502 = vector.broadcast %c2_i32_184 : i32 to vector<64x1xi32>
    %503 = arith.addi %4, %502 : vector<64x1xi32>
    %c8_i32_185 = arith.constant 8 : i32
    %504 = vector.broadcast %c8_i32_185 : i32 to vector<64x1xi32>
    %505 = arith.cmpi slt, %503, %504 : vector<64x1xi32>
    %506 = arith.andi %501, %505 : vector<64x1xi1>
    %507 = arith.extui %506 : vector<64x1xi1> to vector<64x1xi32>
    %508 = arith.sitofp %507 : vector<64x1xi32> to vector<64x1xf32>
    %c0 = arith.constant 0 : index
    %c0_186 = arith.constant 0 : index
    %c0_187 = arith.constant 0 : index
    %509 = vector.load %arg1[%c0, %c0_186, %c0_187] : memref<1x64x16xbf16, #tpu.memory_space<vmem>>, vector<1x64x16xbf16>
    %510 = vector.shape_cast %509 : vector<1x64x16xbf16> to vector<64x16xbf16>
    %511 = arith.extf %510 : vector<64x16xbf16> to vector<64x16xf32>
    %c18_i32 = arith.constant 18 : i32
    %512 = tpu.dynamic_rotate %511 by %c18_i32 dim 0 : vector<64x16xf32>, i32 -> vector<64x16xf32>
    %513 = vector.broadcast %25 : vector<64x1xf32> to vector<64x16xf32>
    %514 = arith.mulf %512, %513 : vector<64x16xf32>
    %515 = arith.truncf %514 : vector<64x16xf32> to vector<64x16xbf16>
    %c17_i32 = arith.constant 17 : i32
    %516 = tpu.dynamic_rotate %511 by %c17_i32 dim 0 : vector<64x16xf32>, i32 -> vector<64x16xf32>
    %517 = vector.broadcast %46 : vector<64x1xf32> to vector<64x16xf32>
    %518 = arith.mulf %516, %517 : vector<64x16xf32>
    %519 = arith.truncf %518 : vector<64x16xf32> to vector<64x16xbf16>
    %c16_i32 = arith.constant 16 : i32
    %520 = tpu.dynamic_rotate %511 by %c16_i32 dim 0 : vector<64x16xf32>, i32 -> vector<64x16xf32>
    %521 = vector.broadcast %67 : vector<64x1xf32> to vector<64x16xf32>
    %522 = arith.mulf %520, %521 : vector<64x16xf32>
    %523 = arith.truncf %522 : vector<64x16xf32> to vector<64x16xbf16>
    %c15_i32 = arith.constant 15 : i32
    %524 = tpu.dynamic_rotate %511 by %c15_i32 dim 0 : vector<64x16xf32>, i32 -> vector<64x16xf32>
    %525 = vector.broadcast %88 : vector<64x1xf32> to vector<64x16xf32>
    %526 = arith.mulf %524, %525 : vector<64x16xf32>
    %527 = arith.truncf %526 : vector<64x16xf32> to vector<64x16xbf16>
    %c14_i32 = arith.constant 14 : i32
    %528 = tpu.dynamic_rotate %511 by %c14_i32 dim 0 : vector<64x16xf32>, i32 -> vector<64x16xf32>
    %529 = vector.broadcast %109 : vector<64x1xf32> to vector<64x16xf32>
    %530 = arith.mulf %528, %529 : vector<64x16xf32>
    %531 = arith.truncf %530 : vector<64x16xf32> to vector<64x16xbf16>
    %c10_i32 = arith.constant 10 : i32
    %532 = tpu.dynamic_rotate %511 by %c10_i32 dim 0 : vector<64x16xf32>, i32 -> vector<64x16xf32>
    %533 = vector.broadcast %130 : vector<64x1xf32> to vector<64x16xf32>
    %534 = arith.mulf %532, %533 : vector<64x16xf32>
    %535 = arith.truncf %534 : vector<64x16xf32> to vector<64x16xbf16>
    %c9_i32 = arith.constant 9 : i32
    %536 = tpu.dynamic_rotate %511 by %c9_i32 dim 0 : vector<64x16xf32>, i32 -> vector<64x16xf32>
    %537 = vector.broadcast %151 : vector<64x1xf32> to vector<64x16xf32>
    %538 = arith.mulf %536, %537 : vector<64x16xf32>
    %539 = arith.truncf %538 : vector<64x16xf32> to vector<64x16xbf16>
    %c8_i32_188 = arith.constant 8 : i32
    %540 = tpu.dynamic_rotate %511 by %c8_i32_188 dim 0 : vector<64x16xf32>, i32 -> vector<64x16xf32>
    %541 = vector.broadcast %172 : vector<64x1xf32> to vector<64x16xf32>
    %542 = arith.mulf %540, %541 : vector<64x16xf32>
    %543 = arith.truncf %542 : vector<64x16xf32> to vector<64x16xbf16>
    %c7_i32_189 = arith.constant 7 : i32
    %544 = tpu.dynamic_rotate %511 by %c7_i32_189 dim 0 : vector<64x16xf32>, i32 -> vector<64x16xf32>
    %545 = vector.broadcast %193 : vector<64x1xf32> to vector<64x16xf32>
    %546 = arith.mulf %544, %545 : vector<64x16xf32>
    %547 = arith.truncf %546 : vector<64x16xf32> to vector<64x16xbf16>
    %c6_i32 = arith.constant 6 : i32
    %548 = tpu.dynamic_rotate %511 by %c6_i32 dim 0 : vector<64x16xf32>, i32 -> vector<64x16xf32>
    %549 = vector.broadcast %214 : vector<64x1xf32> to vector<64x16xf32>
    %550 = arith.mulf %548, %549 : vector<64x16xf32>
    %551 = arith.truncf %550 : vector<64x16xf32> to vector<64x16xbf16>
    %c2_i32_190 = arith.constant 2 : i32
    %552 = tpu.dynamic_rotate %511 by %c2_i32_190 dim 0 : vector<64x16xf32>, i32 -> vector<64x16xf32>
    %553 = vector.broadcast %235 : vector<64x1xf32> to vector<64x16xf32>
    %554 = arith.mulf %552, %553 : vector<64x16xf32>
    %555 = arith.truncf %554 : vector<64x16xf32> to vector<64x16xbf16>
    %c1_i32_191 = arith.constant 1 : i32
    %556 = tpu.dynamic_rotate %511 by %c1_i32_191 dim 0 : vector<64x16xf32>, i32 -> vector<64x16xf32>
    %557 = vector.broadcast %256 : vector<64x1xf32> to vector<64x16xf32>
    %558 = arith.mulf %556, %557 : vector<64x16xf32>
    %559 = arith.truncf %558 : vector<64x16xf32> to vector<64x16xbf16>
    %560 = arith.truncf %511 : vector<64x16xf32> to vector<64x16xbf16>
    %c63_i32 = arith.constant 63 : i32
    %561 = tpu.dynamic_rotate %511 by %c63_i32 dim 0 : vector<64x16xf32>, i32 -> vector<64x16xf32>
    %562 = vector.broadcast %277 : vector<64x1xf32> to vector<64x16xf32>
    %563 = arith.mulf %561, %562 : vector<64x16xf32>
    %564 = arith.truncf %563 : vector<64x16xf32> to vector<64x16xbf16>
    %c62_i32 = arith.constant 62 : i32
    %565 = tpu.dynamic_rotate %511 by %c62_i32 dim 0 : vector<64x16xf32>, i32 -> vector<64x16xf32>
    %566 = vector.broadcast %298 : vector<64x1xf32> to vector<64x16xf32>
    %567 = arith.mulf %565, %566 : vector<64x16xf32>
    %568 = arith.truncf %567 : vector<64x16xf32> to vector<64x16xbf16>
    %c58_i32 = arith.constant 58 : i32
    %569 = tpu.dynamic_rotate %511 by %c58_i32 dim 0 : vector<64x16xf32>, i32 -> vector<64x16xf32>
    %570 = vector.broadcast %319 : vector<64x1xf32> to vector<64x16xf32>
    %571 = arith.mulf %569, %570 : vector<64x16xf32>
    %572 = arith.truncf %571 : vector<64x16xf32> to vector<64x16xbf16>
    %c57_i32 = arith.constant 57 : i32
    %573 = tpu.dynamic_rotate %511 by %c57_i32 dim 0 : vector<64x16xf32>, i32 -> vector<64x16xf32>
    %574 = vector.broadcast %340 : vector<64x1xf32> to vector<64x16xf32>
    %575 = arith.mulf %573, %574 : vector<64x16xf32>
    %576 = arith.truncf %575 : vector<64x16xf32> to vector<64x16xbf16>
    %c56_i32 = arith.constant 56 : i32
    %577 = tpu.dynamic_rotate %511 by %c56_i32 dim 0 : vector<64x16xf32>, i32 -> vector<64x16xf32>
    %578 = vector.broadcast %361 : vector<64x1xf32> to vector<64x16xf32>
    %579 = arith.mulf %577, %578 : vector<64x16xf32>
    %580 = arith.truncf %579 : vector<64x16xf32> to vector<64x16xbf16>
    %c55_i32 = arith.constant 55 : i32
    %581 = tpu.dynamic_rotate %511 by %c55_i32 dim 0 : vector<64x16xf32>, i32 -> vector<64x16xf32>
    %582 = vector.broadcast %382 : vector<64x1xf32> to vector<64x16xf32>
    %583 = arith.mulf %581, %582 : vector<64x16xf32>
    %584 = arith.truncf %583 : vector<64x16xf32> to vector<64x16xbf16>
    %c54_i32 = arith.constant 54 : i32
    %585 = tpu.dynamic_rotate %511 by %c54_i32 dim 0 : vector<64x16xf32>, i32 -> vector<64x16xf32>
    %586 = vector.broadcast %403 : vector<64x1xf32> to vector<64x16xf32>
    %587 = arith.mulf %585, %586 : vector<64x16xf32>
    %588 = arith.truncf %587 : vector<64x16xf32> to vector<64x16xbf16>
    %c50_i32 = arith.constant 50 : i32
    %589 = tpu.dynamic_rotate %511 by %c50_i32 dim 0 : vector<64x16xf32>, i32 -> vector<64x16xf32>
    %590 = vector.broadcast %424 : vector<64x1xf32> to vector<64x16xf32>
    %591 = arith.mulf %589, %590 : vector<64x16xf32>
    %592 = arith.truncf %591 : vector<64x16xf32> to vector<64x16xbf16>
    %c49_i32 = arith.constant 49 : i32
    %593 = tpu.dynamic_rotate %511 by %c49_i32 dim 0 : vector<64x16xf32>, i32 -> vector<64x16xf32>
    %594 = vector.broadcast %445 : vector<64x1xf32> to vector<64x16xf32>
    %595 = arith.mulf %593, %594 : vector<64x16xf32>
    %596 = arith.truncf %595 : vector<64x16xf32> to vector<64x16xbf16>
    %c48_i32 = arith.constant 48 : i32
    %597 = tpu.dynamic_rotate %511 by %c48_i32 dim 0 : vector<64x16xf32>, i32 -> vector<64x16xf32>
    %598 = vector.broadcast %466 : vector<64x1xf32> to vector<64x16xf32>
    %599 = arith.mulf %597, %598 : vector<64x16xf32>
    %600 = arith.truncf %599 : vector<64x16xf32> to vector<64x16xbf16>
    %c47_i32 = arith.constant 47 : i32
    %601 = tpu.dynamic_rotate %511 by %c47_i32 dim 0 : vector<64x16xf32>, i32 -> vector<64x16xf32>
    %602 = vector.broadcast %487 : vector<64x1xf32> to vector<64x16xf32>
    %603 = arith.mulf %601, %602 : vector<64x16xf32>
    %604 = arith.truncf %603 : vector<64x16xf32> to vector<64x16xbf16>
    %c46_i32 = arith.constant 46 : i32
    %605 = tpu.dynamic_rotate %511 by %c46_i32 dim 0 : vector<64x16xf32>, i32 -> vector<64x16xf32>
    %606 = vector.broadcast %508 : vector<64x1xf32> to vector<64x16xf32>
    %607 = arith.mulf %605, %606 : vector<64x16xf32>
    %608 = arith.truncf %607 : vector<64x16xf32> to vector<64x16xbf16>
    %c0_192 = arith.constant 0 : index
    %c0_193 = arith.constant 0 : index
    %609 = vector.load %arg2[%c0_192, %c0_193] : memref<400x24xbf16, #tpu.memory_space<vmem>>, vector<400x24xbf16>
    %610 = tpu.concatenate %515, %519, %523, %527, %531, %535, %539, %543, %547, %551, %555, %559, %560, %564, %568, %572 in 1 : vector<64x16xbf16>, vector<64x16xbf16>, vector<64x16xbf16>, vector<64x16xbf16>, vector<64x16xbf16>, vector<64x16xbf16>, vector<64x16xbf16>, vector<64x16xbf16>, vector<64x16xbf16>, vector<64x16xbf16>, vector<64x16xbf16>, vector<64x16xbf16>, vector<64x16xbf16>, vector<64x16xbf16>, vector<64x16xbf16>, vector<64x16xbf16> -> vector<64x256xbf16>
    %611 = tpu.concatenate %576, %580, %584, %588, %592, %596, %600, %604, %608 in 1 : vector<64x16xbf16>, vector<64x16xbf16>, vector<64x16xbf16>, vector<64x16xbf16>, vector<64x16xbf16>, vector<64x16xbf16>, vector<64x16xbf16>, vector<64x16xbf16>, vector<64x16xbf16> -> vector<64x144xbf16>
    %612 = tpu.concatenate %610, %611 in 1 : vector<64x256xbf16>, vector<64x144xbf16> -> vector<64x400xbf16>
    %cst = arith.constant dense<0.000000e+00> : vector<64x24xf32>
    %613 = tpu.matmul %612, %609, %cst {dimension_numbers = #tpu.dot_dimension_numbers<[1], [0], [0], [1], [0, 0, 1, 1], [], []>} : vector<64x400xbf16>, vector<400x24xbf16>, vector<64x24xf32> -> vector<64x24xf32>
    %614 = arith.truncf %613 : vector<64x24xf32> to vector<64x24xbf16>
    %c0_194 = arith.constant 0 : index
    %c0_195 = arith.constant 0 : index
    %c0_196 = arith.constant 0 : index
    %615 = vector.load %arg3[%c0_194, %c0_195, %c0_196] : memref<1x64x24xbf16, #tpu.memory_space<vmem>>, vector<1x64x24xbf16>
    %616 = vector.shape_cast %615 : vector<1x64x24xbf16> to vector<64x24xbf16>
    %617 = vector.shape_cast %614 : vector<64x24xbf16> to vector<1x64x24xbf16>
    tpu.vector_store %arg3[%c0_194, %c0_195, %c0_196], %617 {strides = array<i32>} : memref<1x64x24xbf16, #tpu.memory_space<vmem>>, vector<1x64x24xbf16>,
    return
  }
  func.func @transform_0(%arg0: i32) -> (i32, i32, i32) {
    %c0_i32 = arith.constant 0 : i32
    %c0_i32_0 = arith.constant 0 : i32
    %c0_i32_1 = arith.constant 0 : i32
    return %arg0, %c0_i32, %c0_i32_0 : i32, i32, i32
  }
  func.func @transform_1(%arg0: i32) -> (i32, i32) {
    %c0_i32 = arith.constant 0 : i32
    %c0_i32_0 = arith.constant 0 : i32
    %c0_i32_1 = arith.constant 0 : i32
    return %c0_i32, %c0_i32_0 : i32, i32
  }
  func.func @transform_2(%arg0: i32) -> (i32, i32, i32) {
    %c0_i32 = arith.constant 0 : i32
    %c0_i32_0 = arith.constant 0 : i32
    %c0_i32_1 = arith.constant 0 : i32
    return %arg0, %c0_i32, %c0_i32_0 : i32, i32, i32
  }
}

</mosaic_0001>

<bundles_post_ra>
// kernel: tpu_custom_call.1
= control target key start
LH: loop header
LB: loop body
LE: loop exit
PB: predicated region body
PF: predicated region fallthrough
CT: control target
= control target key end

     0   :  { %s2857_s9 = smov 0   ;;  %s5246_s0 = inlined_call_operand.vmem [shape: bf16[2,64,16], index: 0, kind: input, shape index: {}]   ;;  %s5247_s1 = inlined_call_operand.vmem [shape: bf16[400,24], index: 1, kind: input, shape index: {}]   ;;  %s5248_s2 = inlined_call_operand.vmem [shape: bf16[2,64,24], index: 2, kind: output, shape index: {}]  }
   0x1 LB: > { %s2479_s10 = sadd.s32 4294967295, %s2831_s9   ;;  %p2483_p0 = scmp.ge.s32.totalorder %s2831_s9, 1  ;;  %s2831_s9 = sphi %s2857_s9, %s12_s9  }
   0x2   : > { %p112_p1 = scmp.lt.s32.totalorder %s2831_s9, 3 }
   0x4   : > { %p113_p2 = pnand %p2483_p0, %p112_p1 }
   0x6   : > { %116 = sbr.rel (%p113_p2) target bundleno = 565 (0x235), region = 28 }
   0xb   : > { %p134_p3 = scmp.lt.s32.totalorder %s2479_s10, 1  ;;  %v145_v0 = vlaneseq  ;;  %s2833_s15 = smov 64   ;;  %v5314_v33 = vmov 0.0   ;;  %v2793_v47 = vld [vmem:[%s5247_s1 + $0x78] sm:$0xff]   ;;  %v2795_v63 = vld [vmem:[%s5247_s1 + $0x70] sm:$0xff]  }
   0xc   : > { %2733 = vmatprep.subr.bf16.mxu0 %v2793_v47  ;;  %s2835_s18 = smov 48   ;;  %v2794_v60 = vld [vmem:[%s5247_s1 + $0x38] sm:$0xff]   ;;  %s2836_s23 = smov 32  }
   0xd   : > { %s5954_s10 = smov (!%p134_p3, %s2479_s10), 1  ;;  %v2867_v1 = vshrl.u32 %v145_v0, 7  ;;  %2734 = vmatpush3.bf16.msra.mxu0 %v2794_v60  ;;  %s2837_s24 = smov 80   ;;  %v2798_v60 = vld [vmem:[%s5247_s1 + $0x28] sm:$0xff]   ;;  %v2802_v25 = vld [vmem:[%s5247_s1 + $0x18] sm:$0xff]  }
   0xe   : > { %s2723_s11 = sshll.u32 %s5954_s10, 5  ;;  %2735 = vmatprep.subr.bf16.mxu0 %v2795_v63  ;;  %s2838_s12 = smov 16  }
   0xf   : > { %v147_v2 = vadd.s32 8, %v2867_v1  ;;  %v2872_v3 = vand.u32 7, %v2867_v1  ;;  %s2879_s14 = scalar_lea.vmem %s5246_s0, %s2723_s11  ;;  %v2882_v4 = vshra.s32 %v2867_v1, 3  ;;  %vm5254_vm0 = vcmp.lt.s32.totalorder %v2867_v1, 1  ;;  %s2839_s26 = smov 96  }
  0x10   : > { %vm5251_vm1 = vcmp.lt.s32.totalorder %v2867_v1, 2  ;;  %v1202_v5 = vld [vmem:[%s2879_s14] sm:$0xff]   ;;  %v2888_v6 = vld [vmem:[%s2879_s14 + $0x8] sm:$0xff]   ;;  %v2891_v7 = vld [vmem:[%s2879_s14 + $0x10] sm:$0xff]   ;;  %vm5265_vm2 = vcmp.lt.s32.totalorder %v2867_v1, 7  ;;  %s2840_s5 = smov 112  }
  0x11   : > { %v2893_v8 = vshra.s32 %v147_v2, 3  ;;  %v2895_v9 = vand.u32 7, %v147_v2  ;;  %v2898_v10 = vadd.s32 4294967295, %v2872_v3  ;;  %v1208_v11 = vld [vmem:[%s2879_s14 + $0x18] sm:$0xff]   ;;  %v2901_v12 = vunpack.c.h.bf16 %v1202_v5  ;;  %1764 = vrot.lane.b32.xlu0 %v1202_v5, %s2833_s15 }
  0x12   : > { %v2904_v13 = vunpack.c.l.bf16 %v2888_v6  ;;  %v2907_v14 = vunpack.c.h.bf16 %v2888_v6  ;;  %v2911_v15 = vunpack.c.h.bf16 %v2891_v7  ;;  %v2913_v16 = vunpack.c.l.bf16 %v1208_v11 }
  0x13   : > { %5408 = vst [vmem:[#allocation2_spill] sm:$0xff] %v2898_v10  ;;  %5409 = vst [vmem:[#allocation3_spill] sm:$0xff] %v2901_v12  ;;  %v2915_v17 = vunpack.c.h.bf16 %v1208_v11  ;;  %v2917_v18 = vunpack.c.l.bf16 %v1202_v5  ;;  %v2920_v19 = vadd.s32 4294967295, %v2895_v9  ;;  %vm5253_vm3 = vcmp.ge.s32.totalorder %v2898_v10, 0 }
  0x14   : > { %vm666_vm4 = vcmp.ge.s32.totalorder %v2882_v4, 0  ;;  %vm667_vm5 = vcmp.ge.s32.totalorder %v2893_v8, 0  ;;  %vm674_vm6 = vcmp.lt.s32.totalorder %v2882_v4, 8  ;;  %vm675_vm7 = vcmp.lt.s32.totalorder %v2893_v8, 8 }
  0x15   : > { %5410 = vst [vmem:[#allocation4_spill] sm:$0xff] %v2915_v17  ;;  %5411 = vst [vmem:[#allocation5_spill] sm:$0xff] %v2917_v18  ;;  %v5271_v20 = vrot.slane %v2901_v12, 7  ;;  %vm5252_vm8 = vcmp.ge.s32.totalorder %v2920_v19, 0  ;;  %v1247_v22 = vrot.slane %v2917_v18, 7  ;;  %v1254_v23 = vrot.slane %v2915_v17, 7 }
  0x16   : > { %5412 = vst [vmem:[#allocation6_spill] sm:$0xff] %v2920_v19  ;;  %vm2930_vm9 = vmand %vm666_vm4, %vm674_vm6  ;;  %v2937_v24 = vadd.s32 4294967294, %v2872_v3  ;;  %v2944_v26 = vadd.s32 4294967294, %v2895_v9  ;;  %v1218_v27 = vrot.slane %v2917_v18, 6  ;;  %v1219_v28 = vrot.slane %v2901_v12, 6 }
  0x17   : > { %vm2939_vm10 = vmand %vm667_vm5, %vm675_vm7  ;;  %v1225_v29 = vrot.slane %v2915_v17, 6  ;;  %v2957_v30 = vsel %vm5254_vm0, %v1247_v22, %v5271_v20  ;;  %v2963_v31 = vsel %vm5254_vm0, %v1254_v23, %v1247_v22  ;;  %v2967_v32 = vadd.s32 1, %v2872_v3 }
  0x18   : > { %vm722_vm11 = vmand %vm2930_vm9, %vm5253_vm3  ;;  %5417 = vst [vmem:[#allocation7_spill] sm:$0xff] %v2957_v30  ;;  %vm5250_vm12 = vcmp.ge.s32.totalorder %v2937_v24, 0  ;;  %vm5249_vm14 = vcmp.ge.s32.totalorder %v2944_v26, 0  ;;  %v2979_v35 = vsel %vm5251_vm1, %v1218_v27, %v1219_v28  ;;  %v2994_v39 = vadd.s32 1, %v2895_v9 }
  0x19   : > { %5418 = vst [vmem:[#allocation8_spill] sm:$0xff] %v2963_v31  ;;  %vm723_vm13 = vmand %vm2939_vm10, %vm5252_vm8  ;;  %v2576_v34 = vsel %vm722_vm11, 1.0, %v5314_v33  ;;  %v2985_v36 = vsel %vm5251_vm1, %v1225_v29, %v1218_v27  ;;  %vm5266_vm4 = vcmp.lt.s32.totalorder %v2967_v32, 8  ;;  %v1288_v42 = vrot.slane %v2917_v18, 1 }
  0x1a   : > { %5419 = vst [vmem:[#allocation9_spill] sm:$0xff] %v2979_v35  ;;  %5420 = vst [vmem:[#allocation10_spill] sm:$0xff] %v2985_v36  ;;  %v2577_v37 = vsel %vm723_vm13, 1.0, %v5314_v33  ;;  %v1418_v38 = vmul.f32 %v2576_v34, %v2963_v31  ;;  %v1289_v43 = vrot.slane %v2901_v12, 1  ;;  %vm5264_vm6 = vcmp.lt.s32.totalorder %v2867_v1, 6  ;;  %v2796_v34 = vld [vmem:[%s5247_s1 + $0x30] sm:$0xff]  }
  0x1b   : > { %vm690_vm15 = vmand %vm2930_vm9, %vm5250_vm12  ;;  %v1419_v40 = vmul.f32 %v2577_v37, %v2957_v30  ;;  %vm5255_vm7 = vcmp.lt.s32.totalorder %v2994_v39, 8  ;;  %v1290_v46 = vrot.slane %v2904_v13, 1  ;;  %v170_v55 = vadd.s32 4294967294, %v2882_v4  ;;  %2736 = vmatpush3.bf16.msra.mxu0 %v2796_v34 }
  0x1c   : > { %vm691_vm5 = vmand %vm2939_vm10, %vm5249_vm14  ;;  %v2568_v41 = vsel %vm690_vm15, 1.0, %v5314_v33  ;;  %v3027_v51 = vsel %vm5265_vm2, %v1288_v42, %v1289_v43  ;;  %v171_v58 = vadd.s32 4294967294, %v2893_v8  ;;  %v3042_v59 = vadd.s32 2, %v2872_v3 }
  0x1d   : > { %v2569_v44 = vsel %vm691_vm5, 1.0, %v5314_v33  ;;  %v1406_v45 = vmul.f32 %v2568_v41, %v2985_v36  ;;  %vm762_vm11 = vmand %vm2930_vm9, %vm5266_vm4  ;;  %v1426_v48 = vpack.c.bf16 %v1419_v40, %v1418_v38  ;;  %5421 = vst [vmem:[#allocation11_spill] sm:$0xff] %v3027_v51  ;;  %v3034_v53 = vsel %vm5265_vm2, %v1289_v43, %v1290_v46  ;;  %v2797_v41 = vld [vmem:[%s5247_s1 + $0x68] sm:$0xff]  }
  0x1e   : > { %v1407_v49 = vmul.f32 %v2569_v44, %v2979_v35  ;;  %vm763_vm13 = vmand %vm2939_vm10, %vm5255_vm7  ;;  %v2584_v50 = vsel %vm762_vm11, 1.0, %v5314_v33  ;;  %5422 = vst [vmem:[#allocation12_spill] sm:$0xff] %v3034_v53  ;;  %vm178_vm15 = vcmp.ge.s32.totalorder %v170_v55, 0  ;;  %vm186_vm5 = vcmp.lt.s32.totalorder %v170_v55, 8  ;;  %2737 = vmatprep.subr.bf16.mxu0 %v2797_v41 }
  0x1f   : > { %v2585_v52 = vsel %vm763_vm13, 1.0, %v5314_v33  ;;  %v1430_v54 = vmul.f32 %v2584_v50, %v3027_v51  ;;  %1736 = vrot.lane.b32.xlu0 %v1426_v48, %s2835_s18  ;;  %5423 = vst [vmem:[#allocation13_spill] sm:$0xff] %v3042_v59  ;;  %v3048_v61 = vadd.s32 2, %v2895_v9  ;;  %v474_v62 = vadd.s32 4294967295, %v2882_v4  ;;  %vm3055_vm14 = vmand %vm178_vm15, %vm186_vm5  ;;  %2738 = vmatpush3.bf16.msra.mxu0 %v2798_v60 }
  0x20   : > { %v1414_v56 = vpack.c.bf16 %v1407_v49, %v1406_v45  ;;  %v1431_v57 = vmul.f32 %v2585_v52, %v3034_v53  ;;  %vm179_vm11 = vcmp.ge.s32.totalorder %v171_v58, 0  ;;  %vm187_vm13 = vcmp.lt.s32.totalorder %v171_v58, 8  ;;  %vm394_vm5 = vmand %vm3055_vm14, %vm5266_vm4 }
  0x21   : > { %5424 = vst [vmem:[#allocation14_spill] sm:$0xff] %v3048_v61  ;;  %v5425_v2 = vmov 0  ;;  %vm5257_vm12 = vcmp.lt.s32.totalorder %v3042_v59, 8  ;;  %vm3060_vm1 = vmand %vm179_vm11, %vm187_vm13  ;;  %v5427_v3 = vmov 0  ;;  %v2504_v5 = vsel %vm3055_vm14, 1.0, %v5314_v33 }
  0x22   : > { %1724 = vrot.lane.b32.xlu1 %v1414_v56, %s2836_s23  ;;  %v1438_v0 = vpack.c.bf16 %v1431_v57, %v1430_v54  ;;  %v5426_v2 = vsel %vm3055_vm14, 4294967295, %v5425_v2  ;;  %v5428_v3 = vsel %vm3060_vm1, 4294967295, %v5427_v3  ;;  %vm5256_vm8 = vcmp.lt.s32.totalorder %v3048_v61, 8 }
  0x23   : > { %v475_v9 = vadd.s32 4294967295, %v2893_v8  ;;  %vm482_vm3 = vcmp.ge.s32.totalorder %v474_v62, 0  ;;  %v2505_v11 = vsel %vm3060_vm1, 1.0, %v5314_v33  ;;  %v1276_v22 = vmul.f32 %v2504_v5, %v2913_v16  ;;  %v2799_v5 = vld [vmem:[%s5247_s1 + $0x60] sm:$0xff]  }
  0x24   : > { %1776 = vrot.lane.b32.xlu0 %v1438_v0, %s2837_s24  ;;  %vm490_vm15 = vcmp.lt.s32.totalorder %v474_v62, 8  ;;  %v1317_v27 = vrot.slane %v2917_v18, 2  ;;  %v1277_v37 = vmul.f32 %v2505_v11, %v2915_v17  ;;  %v1318_v40 = vrot.slane %v2901_v12, 2  ;;  %2739 = vmatprep.subr.bf16.mxu0 %v2799_v5  ;;  %v2801_v5 = vld [vmem:[%s5247_s1 + $0x58] sm:$0xff]  }
  0x25   : > { %vm483_vm11 = vcmp.ge.s32.totalorder %v475_v9, 0  ;;  %vm491_vm13 = vcmp.lt.s32.totalorder %v475_v9, 8  ;;  %vm3083_vm0 = vmand %vm482_vm3, %vm490_vm15  ;;  %v5431_v43 = vmov 0  ;;  %v1324_v44 = vrot.slane %v2915_v17, 2 }
  0x26   : > { %vm3091_vm7 = vmand %vm483_vm11, %vm491_vm13  ;;  %v2512_v45 = vsel %vm394_vm5, 1.0, %v5314_v33  ;;  %v5260_v47 = vrot.slane %v2913_v16, 1  ;;  %v1295_v48 = vrot.slane %v2915_v17, 1  ;;  %v1284_v49 = vpack.c.bf16 %v1277_v37, %v1276_v22 }
  0x27   : > { %v5432_v43 = vsel %vm3091_vm7, 4294967295, %v5431_v43  ;;  %vm642_vm3 = vmand %vm3083_vm0, %vm5257_vm12  ;;  %v3105_v50 = vsel %vm5264_vm6, %v1317_v27, %v1318_v40  ;;  %v5261_v52 = vrot.slane %v2911_v15, 7  ;;  %v1253_v54 = vrot.slane %v2913_v16, 7 }
  0x28   : > { %5433 = vst [vmem:[#allocation15_spill] sm:$0xff] %v3105_v50  ;;  %vm643_vm15 = vmand %vm3091_vm7, %vm5256_vm8  ;;  %v2560_v55 = vsel %vm642_vm3, 1.0, %v5314_v33  ;;  %v3116_v56 = vsel %vm5264_vm6, %v1324_v44, %v1317_v27  ;;  %v3122_v57 = vsel %vm5265_vm2, %v5260_v47, %v1295_v48  ;;  %v3128_v58 = vsel %vm5265_vm2, %v1295_v48, %v1288_v42  ;;  %1640 = vrot.lane.b32.xlu1 %v1284_v49, %s2836_s23 }
  0x29   : > { %5434 = vst [vmem:[#allocation16_spill] sm:$0xff] %v3116_v56  ;;  %5435 = vst [vmem:[#allocation17_spill] sm:$0xff] %v3122_v57  ;;  %v2561_v62 = vsel %vm643_vm15, 1.0, %v5314_v33  ;;  %v1394_v63 = vmul.f32 %v2560_v55, %v3116_v56  ;;  %vm5437_vm5 = vcmp.lt.s32.totalorder %v2994_v39, 8  ;;  %v1305_v0 = vmul.f32 %v2512_v45, %v3122_v57  ;;  %v2800_v55 = vld [vmem:[%s5247_s1 + $0x20] sm:$0xff]  }
  0x2a   : > { %5436 = vst [vmem:[#allocation18_spill] sm:$0xff] %v3128_v58  ;;  %vm395_vm11 = vmand %vm3060_vm1, %vm5437_vm5  ;;  %vm5438_vm13 = vcmp.lt.s32.totalorder %v2867_v1, 1  ;;  %v1395_v9 = vmul.f32 %v2561_v62, %v3105_v50  ;;  %vm5440_vm3 = vcmp.ge.s32.totalorder %v2898_v10, 0  ;;  %v1319_v37 = vrot.slane %v2904_v13, 2  ;;  %2740 = vmatpush3.bf16.msra.mxu0 %v2800_v55 }
  0x2b   : > { %v3145_v42 = vsel %vm5438_vm13, %v1253_v54, %v1254_v23  ;;  %v2513_v11 = vsel %vm395_vm11, 1.0, %v5314_v33  ;;  %vm274_vm15 = vmand %vm3055_vm14, %vm5440_vm3  ;;  %v5259_v23 = vrot.slane %v2913_v16, 2  ;;  %v5258_v41 = vrot.slane %v2913_v16, 6  ;;  %2741 = vmatprep.subr.bf16.mxu0 %v2801_v5 }
  0x2c   : > { %5439 = vst [vmem:[#allocation19_spill] sm:$0xff] %v3145_v42  ;;  %vm5441_vm5 = vmmov %vm5438_vm13  ;;  %v1306_v27 = vmul.f32 %v2513_v11, %v3128_v58  ;;  %vm5443_vm13 = vcmp.ge.s32.totalorder %v2920_v19, 0  ;;  %v2496_v34 = vsel %vm274_vm15, 1.0, %v5314_v33  ;;  %v1402_v45 = vpack.c.bf16 %v1395_v9, %v1394_v63 }
  0x2d   : > { %v3160_v22 = vsel %vm5441_vm5, %v5261_v52, %v1253_v54  ;;  %vm275_vm11 = vmand %vm3060_vm1, %vm5443_vm13  ;;  %v3181_v54 = vsel %vm5264_vm6, %v5259_v23, %v1324_v44  ;;  %v3196_v44 = vsel %vm5264_vm6, %v1318_v40, %v1319_v37  ;;  %vm5446_vm13 = vcmp.lt.s32.totalorder %v2867_v1, 2 }
  0x2e   : > { %5442 = vst [vmem:[#allocation20_spill] sm:$0xff] %v3160_v22  ;;  %v2497_v48 = vsel %vm275_vm11, 1.0, %v5314_v33  ;;  %v1264_v49 = vmul.f32 %v2496_v34, %v3160_v22  ;;  %vm450_vm3 = vmand %vm3055_vm14, %vm5257_vm12  ;;  %v1313_v60 = vpack.c.bf16 %v1306_v27, %v1305_v0  ;;  %1712 = vrot.lane.b32.xlu0 %v1402_v45, %s2838_s12  ;;  %v3214_v40 = vsel %vm5446_vm13, %v5258_v41, %v1225_v29 }
  0x2f   : > { %5444 = vst [vmem:[#allocation21_spill] sm:$0xff] %v3181_v54  ;;  %v1265_v62 = vmul.f32 %v2497_v48, %v3145_v42  ;;  %vm451_vm15 = vmand %vm3060_vm1, %vm5256_vm8  ;;  %v2520_v63 = vsel %vm450_vm3, 1.0, %v5314_v33  ;;  %v818_v11 = vadd.s32 1, %v2882_v4  ;;  %v819_v45 = vadd.s32 1, %v2893_v8  ;;  %2742 = vmatpush3.bf16.msra.mxu0 %v2802_v25 }
  0x30   : > { %5445 = vst [vmem:[#allocation22_spill] sm:$0xff] %v3196_v44  ;;  %v2521_v0 = vsel %vm451_vm15, 1.0, %v5314_v33  ;;  %v1334_v9 = vmul.f32 %v2520_v63, %v3181_v54  ;;  %vm794_vm5 = vmand %vm2930_vm9, %vm5257_vm12  ;;  %1652 = vrot.lane.b32.xlu1 %v1313_v60, %s2835_s18  ;;  %vm5448_vm11 = vcmp.ge.s32.totalorder %v2937_v24, 0  ;;  %v5262_v25 = vrot.slane %v2907_v14, 2 }
  0x31   : > { %5447 = vst [vmem:[#allocation23_spill] sm:$0xff] %v3214_v40  ;;  %v1272_v27 = vpack.c.bf16 %v1265_v62, %v1264_v49  ;;  %v1335_v34 = vmul.f32 %v2521_v0, %v3116_v56  ;;  %vm795_vm9 = vmand %vm2939_vm10, %vm5256_vm8  ;;  %v2592_v21 = vsel %vm794_vm5, 1.0, %v5314_v33  ;;  %vm826_vm15 = vcmp.ge.s32.totalorder %v818_v11, 0  ;;  %v2803_v62 = vld [vmem:[%s5247_s1 + $0x50] sm:$0xff]  }
  0x32   : > { %v2593_v29 = vsel %vm795_vm9, 1.0, %v5314_v33  ;;  %v1442_v48 = vmul.f32 %v2592_v21, %v3105_v50  ;;  %vm506_vm3 = vmand %vm3083_vm0, %vm5448_vm11  ;;  %vm834_vm13 = vcmp.lt.s32.totalorder %v818_v11, 8  ;;  %vm5449_vm10 = vcmp.ge.s32.totalorder %v2944_v26, 0  ;;  %2743 = vmatprep.subr.bf16.mxu0 %v2803_v62 }
  0x33   : > { %v1342_v49 = vpack.c.bf16 %v1335_v34, %v1334_v9  ;;  %v1443_v55 = vmul.f32 %v2593_v29, %v3196_v44  ;;  %vm507_vm5 = vmand %vm3091_vm7, %vm5449_vm10  ;;  %v2528_v60 = vsel %vm506_vm3, 1.0, %v5314_v33  ;;  %vm827_vm9 = vcmp.ge.s32.totalorder %v819_v45, 0  ;;  %1628 = vrot.lane.b32.xlu0 %v1272_v27, %s2838_s12 }
  0x34   : > { %v2529_v63 = vsel %vm507_vm5, 1.0, %v5314_v33  ;;  %v1346_v5 = vmul.f32 %v2528_v60, %v3214_v40  ;;  %vm5450_vm11 = vcmp.ge.s32.totalorder %v2898_v10, 0  ;;  %vm835_vm12 = vcmp.lt.s32.totalorder %v819_v45, 8  ;;  %vm3263_vm5 = vmand %vm826_vm15, %vm834_vm13  ;;  %v2807_v45 = vld [vmem:[%s5247_s1 + $0x48] sm:$0xff]  }
  0x35   : > { %vm538_vm8 = vmand %vm3083_vm0, %vm5450_vm11  ;;  %v5269_v0 = vrot.slane %v2907_v14, 1  ;;  %1664 = vrot.lane.b32.xlu1 %v1342_v49, %s2833_s15  ;;  %v1450_v9 = vpack.c.bf16 %v1443_v55, %v1442_v48  ;;  %v1347_v34 = vmul.f32 %v2529_v63, %v2985_v36  ;;  %vm5451_vm3 = vcmp.ge.s32.totalorder %v2920_v19, 0  ;;  %v2805_v55 = vld [vmem:[%s5247_s1 + $0x10] sm:$0xff]  }
  0x36   : > { %vm539_vm10 = vmand %vm3091_vm7, %vm5451_vm3  ;;  %v2536_v27 = vsel %vm538_vm8, 1.0, %v5314_v33  ;;  %v1220_v21 = vrot.slane %v2904_v13, 6  ;;  %v5452_v48 = vmov 0  ;;  %v3269_v49 = vadd.s32 16, %v2867_v1  ;;  %2744 = vmatpush3.bf16.msra.mxu0 %v2805_v55 }
  0x37   : > { %v2537_v29 = vsel %vm539_vm10, 1.0, %v5314_v33  ;;  %v1358_v60 = vmul.f32 %v2536_v27, %v3145_v42  ;;  %v5453_v48 = vsel %vm3263_vm5, 4294967295, %v5452_v48  ;;  %v1354_v62 = vpack.c.bf16 %v1347_v34, %v1346_v5  ;;  %vm3277_vm8 = vmand %vm827_vm9, %vm835_vm12  ;;  %1788 = vrot.lane.b32.xlu0 %v1450_v9, %s2839_s26  ;;  %2745 = vmatprep.subr.bf16.mxu0 %v2807_v45 }
  0x38   : > { %5454 = vst [vmem:[#allocation24_spill] sm:$0xff] %v5453_v48  ;;  %v1359_v63 = vmul.f32 %v2537_v29, %v2963_v31  ;;  %v5455_v11 = vmov 0  ;;  %v2616_v27 = vsel %vm3263_vm5, 1.0, %v5314_v33  ;;  %v3290_v41 = vsel %vm5265_vm2, %v1290_v46, %v5269_v0  ;;  %vm954_vm12 = vmand %vm3263_vm5, %vm5266_vm4 }
  0x39   : > { %v5456_v11 = vsel %vm3277_vm8, 4294967295, %v5455_v11  ;;  %5458 = vst [vmem:[#allocation26_spill] sm:$0xff] %v3290_v41  ;;  %v2617_v5 = vsel %vm3277_vm8, 1.0, %v5314_v33  ;;  %v1478_v34 = vmul.f32 %v2616_v27, %v2901_v12  ;;  %vm5459_vm15 = vcmp.lt.s32.totalorder %v2867_v1, 2  ;;  %1676 = vrot.lane.b32.xlu1 %v1354_v62, %s2837_s24 }
  0x3a   : > { %5457 = vst [vmem:[#allocation25_spill] sm:$0xff] %v5456_v11  ;;  %v3310_v46 = vsel %vm5459_vm15, %v1219_v28, %v1220_v21  ;;  %v2544_v9 = vsel %vm3083_vm0, 1.0, %v5314_v33  ;;  %v1366_v29 = vpack.c.bf16 %v1359_v63, %v1358_v60  ;;  %v1479_v27 = vmul.f32 %v2617_v5, %v2904_v13  ;;  %v2808_v63 = vld [vmem:[%s5247_s1 + $0x8] sm:$0xff]  }
  0x3b   : > { %5460 = vst [vmem:[#allocation27_spill] sm:$0xff] %v3310_v46  ;;  %vm5461_vm13 = vcmp.lt.s32.totalorder %v2994_v39, 8  ;;  %v2624_v23 = vsel %vm954_vm12, 1.0, %v5314_v33  ;;  %v2545_v28 = vsel %vm3091_vm7, 1.0, %v5314_v33  ;;  %vm5462_vm11 = vcmp.ge.s32.totalorder %v2937_v24, 0  ;;  %2746 = vmatpush3.bf16.msra.mxu0 %v2808_v63 }
  0x3c   : > { %vm955_vm9 = vmand %vm3277_vm8, %vm5461_vm13  ;;  %v1490_v55 = vmul.f32 %v2624_v23, %v3034_v53  ;;  %v3337_v60 = vsel %vm5264_vm6, %v1319_v37, %v5262_v25  ;;  %v1370_v62 = vmul.f32 %v2544_v9, %v2915_v17  ;;  %v1486_v23 = vpack.c.bf16 %v1479_v27, %v1478_v34  ;;  %v2810_v37 = vld [vmem:[%s5247_s1 + $0x40] sm:$0xff]   ;;  %1688 = vrot.lane.b32.xlu0 %v1366_v29, %s2839_s26 }
  0x3d   : > { %v2625_v47 = vsel %vm955_vm9, 1.0, %v5314_v33  ;;  %vm850_vm3 = vmand %vm3263_vm5, %vm5462_vm11  ;;  %5463 = vst [vmem:[#allocation28_spill] sm:$0xff] %v3337_v60  ;;  %vm5464_vm10 = vcmp.ge.s32.totalorder %v2944_v26, 0  ;;  %v1010_v52 = vadd.s32 2, %v2882_v4  ;;  %vm5465_vm15 = vcmp.lt.s32.totalorder %v3042_v59, 8  ;;  %2747 = vmatprep.subr.bf16.mxu0 %v2810_v37 }
  0x3e   : > { %v1491_v45 = vmul.f32 %v2625_v47, %v3290_v41  ;;  %vm851_vm12 = vmand %vm3277_vm8, %vm5464_vm10  ;;  %v2600_v5 = vsel %vm850_vm3, 1.0, %v5314_v33  ;;  %v1371_v47 = vmul.f32 %v2545_v28, %v2917_v18  ;;  %v1011_v27 = vadd.s32 2, %v2893_v8  ;;  %1947 = vrot.lane.b32.xlu1 %v1486_v23, %s2838_s12 }
  0x3f   : > { %v2601_v9 = vsel %vm851_vm12, 1.0, %v5314_v33  ;;  %v1454_v34 = vmul.f32 %v2600_v5, %v2979_v35  ;;  %vm986_vm13 = vmand %vm3263_vm5, %vm5465_vm15  ;;  %vm5466_vm9 = vcmp.lt.s32.totalorder %v3048_v61, 8  ;;  %vm1018_vm3 = vcmp.ge.s32.totalorder %v1010_v52, 0 }
  0x40   : > { %v1498_v4 = vpack.c.bf16 %v1491_v45, %v1490_v55  ;;  %v1455_v25 = vmul.f32 %v2601_v9, %v3310_v46  ;;  %vm987_vm11 = vmand %vm3277_vm8, %vm5466_vm9  ;;  %v2632_v29 = vsel %vm986_vm13, 1.0, %v5314_v33  ;;  %vm1019_vm10 = vcmp.ge.s32.totalorder %v1011_v27, 0  ;;  %v2811_v55 = vld [vmem:[%s5247_s1] sm:$0xff]  }
  0x41   : > { %v2633_v5 = vsel %vm987_vm11, 1.0, %v5314_v33  ;;  %v1502_v28 = vmul.f32 %v2632_v29, %v3196_v44  ;;  %vm1026_vm12 = vcmp.lt.s32.totalorder %v1010_v52, 8  ;;  %vm3375_vm15 = vmand %vm3083_vm0, %vm5266_vm4  ;;  %v5467_v8 = vmov 0  ;;  %2748 = vmatpush3.bf16.msra.mxu0 %v2811_v55 }
  0x42   : > { %v5468_v8 = vsel %vm3375_vm15, 4294967295, %v5467_v8  ;;  %v1462_v63 = vpack.c.bf16 %v1455_v25, %v1454_v34  ;;  %v1503_v23 = vmul.f32 %v2633_v5, %v3337_v60  ;;  %vm1027_vm13 = vcmp.lt.s32.totalorder %v1011_v27, 8  ;;  %vm3383_vm9 = vmand %vm1018_vm3, %vm1026_vm12  ;;  %1959 = vrot.lane.b32.xlu0 %v1498_v4, %s2836_s23 }
  0x43   : > { %5469 = vst [vmem:[#allocation29_spill] sm:$0xff] %v5468_v8  ;;  %v5470_v45 = vmov 0  ;;  %v5263_v52 = vrot.slane %v2907_v14, 6  ;;  %vm3389_vm0 = vmand %vm1019_vm10, %vm1027_vm13  ;;  %v5473_v38 = vmov 0  ;;  %v149_v37 = vadd.s32 24, %v2867_v1 }
  0x44   : > { %v5471_v45 = vsel %vm3383_vm9, 4294967295, %v5470_v45  ;;  %v5474_v38 = vsel %vm3389_vm0, 4294967295, %v5473_v38  ;;  %v3395_v9 = vshra.s32 %v3269_v49, 3  ;;  %v3398_v25 = vand.u32 7, %v3269_v49  ;;  %1800 = vrot.lane.b32.xlu1 %v1462_v63, %s2840_s5 }
  0x45   : > { %5472 = vst [vmem:[#allocation30_spill] sm:$0xff] %v5471_v45  ;;  %5475 = vst [vmem:[#allocation31_spill] sm:$0xff] %v5474_v38  ;;  %v1510_v34 = vpack.c.bf16 %v1503_v23, %v1502_v28  ;;  %v1378_v27 = vpack.c.bf16 %v1371_v47, %v1370_v62  ;;  %vm5476_vm11 = vcmp.ge.s32.totalorder %v2937_v24, 0  ;;  %vm5477_vm10 = vcmp.lt.s32.totalorder %v2867_v1, 2 }
  0x46   : > { %vm1042_vm3 = vmand %vm3383_vm9, %vm5476_vm11  ;;  %v3411_v4 = vsel %vm5477_vm10, %v1220_v21, %v5263_v52  ;;  %vm5479_vm12 = vcmp.ge.s32.totalorder %v2944_v26, 0  ;;  %v3418_v62 = vshra.s32 %v149_v37, 3  ;;  %v3420_v47 = vand.u32 7, %v149_v37 }
  0x47   : > { %5478 = vst [vmem:[#allocation32_spill] sm:$0xff] %v3411_v4  ;;  %vm1043_vm13 = vmand %vm3389_vm0, %vm5479_vm12  ;;  %v2640_v49 = vsel %vm1042_vm3, 1.0, %v5314_v33  ;;  %v3423_v29 = vadd.s32 2, %v3398_v25  ;;  %v3426_v5 = vunpack.c.l.bf16 %v2891_v7  ;;  %v476_v55 = vadd.s32 4294967295, %v3395_v9  ;;  %1971 = vrot.lane.b32.xlu0 %v1510_v34, %s2835_s18 }
  0x48   : > { %v2641_v21 = vsel %vm1043_vm13, 1.0, %v5314_v33  ;;  %v1514_v28 = vmul.f32 %v2640_v49, %v3310_v46  ;;  %v3434_v23 = vadd.s32 2, %v3420_v47  ;;  %v477_v37 = vadd.s32 4294967295, %v3418_v62  ;;  %1700 = vrot.lane.b32.xlu1 %v1378_v27, %s2840_s5 }
  0x49   : > { %5480 = vst [vmem:[#allocation33_spill] sm:$0xff] %v3423_v29  ;;  %v1515_v63 = vmul.f32 %v2641_v21, %v3411_v4  ;;  %v3438_v52 = vadd.s32 4294967294, %v3398_v25  ;;  %vm5483_vm11 = vcmp.ge.s32.totalorder %v2898_v10, 0  ;;  %vm484_vm12 = vcmp.ge.s32.totalorder %v476_v55, 0 }
  0x4a   : > { %5481 = vst [vmem:[#allocation34_spill] sm:$0xff] %v3434_v23  ;;  %vm3444_vm3 = vmand %vm3383_vm9, %vm5483_vm11  ;;  %vm492_vm13 = vcmp.lt.s32.totalorder %v476_v55, 8  ;;  %v3451_v34 = vadd.s32 4294967294, %v3420_v47  ;;  %vm5487_vm6 = vcmp.ge.s32.totalorder %v2920_v19, 0  ;;  %vm485_vm4 = vcmp.ge.s32.totalorder %v477_v37, 0 }
  0x4b   : > { %5482 = vst [vmem:[#allocation35_spill] sm:$0xff] %v3438_v52  ;;  %vm3457_vm2 = vmand %vm3389_vm0, %vm5487_vm6  ;;  %v1522_v21 = vpack.c.bf16 %v1515_v63, %v1514_v28  ;;  %vm493_vm8 = vcmp.lt.s32.totalorder %v477_v37, 8  ;;  %v5490_v27 = vmov 0  ;;  %v5493_v55 = vmov 0 }
  0x4c   : > { %5486 = vst [vmem:[#allocation36_spill] sm:$0xff] %v3451_v34  ;;  %vm3462_vm5 = vmand %vm484_vm12, %vm492_vm13  ;;  %v1249_v0 = vrot.slane %v2904_v13, 7  ;;  %vm5496_vm11 = vcmp.lt.s32.totalorder %v3423_v29, 8  ;;  %v172_v63 = vadd.s32 4294967294, %v3395_v9  ;;  %v173_v37 = vadd.s32 4294967294, %v3418_v62 }
  0x4d   : > { %v5491_v27 = vsel %vm3462_vm5, 4294967295, %v5490_v27  ;;  %vm3466_vm10 = vmand %vm485_vm4, %vm493_vm8  ;;  %1983 = vrot.lane.b32.xlu0 %v1522_v21, %s2833_s15  ;;  %vm677_vm8 = vcmp.lt.s32.totalorder %v3418_v62, 8  ;;  %vm5497_vm13 = vcmp.lt.s32.totalorder %v3434_v23, 8  ;;  %vm5284_vm6 = vcmp.ge.s32.totalorder %v3438_v52, 0 }
  0x4e   : > { %5492 = vst [vmem:[#allocation37_spill] sm:$0xff] %v5491_v27  ;;  %v5494_v55 = vsel %vm3466_vm10, 4294967295, %v5493_v55  ;;  %vm644_vm12 = vmand %vm3462_vm5, %vm5496_vm11  ;;  %v3491_v20 = vadd.s32 4294967295, %v3398_v25  ;;  %vm5499_vm11 = vcmp.lt.s32.totalorder %v2967_v32, 8  ;;  %v3512_v32 = vadd.s32 4294967295, %v3420_v47 }
  0x4f   : > { %5495 = vst [vmem:[#allocation38_spill] sm:$0xff] %v5494_v55  ;;  %vm645_vm15 = vmand %vm3466_vm10, %vm5497_vm13  ;;  %v2562_v21 = vsel %vm644_vm12, 1.0, %v5314_v33  ;;  %vm5502_vm12 = vcmp.lt.s32.totalorder %v3395_v9, 8  ;;  %vm5503_vm13 = vcmp.ge.s32.totalorder %v3395_v9, 0  ;;  %v2648_v11 = vsel %vm3444_vm3, 1.0, %v5314_v33 }
  0x50   : > { %5498 = vst [vmem:[#allocation39_spill] sm:$0xff] %v3491_v20  ;;  %vm3497_vm4 = vmand %vm3383_vm9, %vm5499_vm11  ;;  %v2563_v61 = vsel %vm645_vm15, 1.0, %v5314_v33  ;;  %v1396_v59 = vmul.f32 %v2562_v21, %v3196_v44  ;;  %vm5507_vm15 = vcmp.ge.s32.totalorder %v3418_v62, 0  ;;  %v2649_v48 = vsel %vm3457_vm2, 1.0, %v5314_v33 }
  0x51   : > { %vm3507_vm1 = vmand %vm5503_vm13, %vm5502_vm12  ;;  %5506 = vst [vmem:[#allocation40_spill] sm:$0xff] %v3512_v32  ;;  %v1397_v19 = vmul.f32 %v2563_v61, %v3337_v60  ;;  %vm180_vm12 = vcmp.ge.s32.totalorder %v172_v63, 0  ;;  %vm188_vm13 = vcmp.lt.s32.totalorder %v172_v63, 8  ;;  %vm189_vm7 = vcmp.lt.s32.totalorder %v173_v37, 8 }
  0x52   : > { %vm3522_vm11 = vmand %vm5507_vm15, %vm677_vm8  ;;  %v5510_v61 = vrot.slane %v2907_v14, 7  ;;  %vm5511_vm8 = vcmp.lt.s32.totalorder %v2867_v1, 1  ;;  %v5513_v10 = vrot.slane %v2901_v12, 7  ;;  %vm5516_vm2 = vcmp.ge.s32.totalorder %v3451_v34, 0 }
  0x53   : > { %vm692_vm3 = vmand %vm3507_vm1, %vm5284_vm6  ;;  %v1403_v49 = vpack.c.bf16 %v1397_v19, %v1396_v59  ;;  %vm5300_vm14 = vcmp.ge.s32.totalorder %v3491_v20, 0  ;;  %v2657_v19 = vsel %vm3389_vm0, 1.0, %v5314_v33  ;;  %v3588_v40 = vadd.s32 1, %v3398_v25 }
  0x54   : > { %v3537_v7 = vsel %vm5511_vm8, %v1249_v0, %v5510_v61  ;;  %vm5514_vm15 = vmmov %vm5511_vm8  ;;  %v2570_v17 = vsel %vm692_vm3, 1.0, %v5314_v33  ;;  %v2656_v61 = vsel %vm3383_vm9, 1.0, %v5314_v33  ;;  %vm5520_vm3 = vcmp.ge.s32.totalorder %v173_v37, 0 }
  0x55   : > { %5512 = vst [vmem:[#allocation41_spill] sm:$0xff] %v3537_v7  ;;  %v3543_v56 = vsel %vm5514_vm15, %v5513_v10, %v1249_v0  ;;  %vm693_vm6 = vmand %vm3522_vm11, %vm5516_vm2  ;;  %v1408_v22 = vmul.f32 %v2570_v17, %v3310_v46  ;;  %v5517_v10 = vmov 0  ;;  %vm5299_vm15 = vcmp.ge.s32.totalorder %v3512_v32, 0  ;;  %1714 = vrot.lane.b32.xlu1 %v1403_v49, %s2838_s12 }
  0x56   : > { %5515 = vst [vmem:[#allocation42_spill] sm:$0xff] %v3543_v56  ;;  %v2571_v42 = vsel %vm693_vm6, 1.0, %v5314_v33  ;;  %vm3557_vm8 = vmand %vm180_vm12, %vm188_vm13  ;;  %v5521_v0 = vmov 0  ;;  %v1526_v63 = vmul.f32 %v2648_v11, %v3543_v56  ;;  %v1527_v45 = vmul.f32 %v2649_v48, %v3537_v7 }
  0x57   : > { %v5518_v10 = vsel %vm3557_vm8, 4294967295, %v5517_v10  ;;  %v1409_v59 = vmul.f32 %v2571_v42, %v3411_v4  ;;  %vm3569_vm6 = vmand %vm5520_vm3, %vm189_vm7  ;;  %v2506_v17 = vsel %vm3557_vm8, 1.0, %v5314_v33  ;;  %v1538_v49 = vmul.f32 %v2656_v61, %v2904_v13  ;;  %5524 = vst [vmem:[#allocation45_spill] sm:$0xff] %v3588_v40 }
  0x58   : > { %5519 = vst [vmem:[#allocation43_spill] sm:$0xff] %v5518_v10  ;;  %v5522_v0 = vsel %vm3569_vm6, 4294967295, %v5521_v0  ;;  %vm276_vm12 = vmand %vm3557_vm8, %vm5300_vm14  ;;  %v2507_v42 = vsel %vm3569_vm6, 1.0, %v5314_v33  ;;  %v1278_v37 = vmul.f32 %v2506_v17, %v2917_v18  ;;  %v3597_v8 = vadd.s32 1, %v3420_v47 }
  0x59   : > { %5523 = vst [vmem:[#allocation44_spill] sm:$0xff] %v5522_v0  ;;  %v1415_v58 = vpack.c.bf16 %v1409_v59, %v1408_v22  ;;  %vm277_vm7 = vmand %vm3569_vm6, %vm5299_vm15  ;;  %v2498_v48 = vsel %vm276_vm12, 1.0, %v5314_v33  ;;  %v1279_v11 = vmul.f32 %v2507_v42, %v2901_v12  ;;  %v1539_v25 = vmul.f32 %v2657_v19, %v2907_v14 }
  0x5a   : > { %5525 = vst [vmem:[#allocation46_spill] sm:$0xff] %v3597_v8  ;;  %v2499_v17 = vsel %vm277_vm7, 1.0, %v5314_v33  ;;  %v1266_v61 = vmul.f32 %v2498_v48, %v2963_v31  ;;  %vm724_vm13 = vmand %vm3507_vm1, %vm5300_vm14  ;;  %vm5305_vm2 = vcmp.lt.s32.totalorder %v3588_v40, 8  ;;  %vm5304_vm12 = vcmp.lt.s32.totalorder %v3597_v8, 8 }
  0x5b   : > { %1726 = vrot.lane.b32.xlu0 %v1415_v58, %s2836_s23  ;;  %v1267_v22 = vmul.f32 %v2499_v17, %v2957_v30  ;;  %v1285_v59 = vpack.c.bf16 %v1279_v11, %v1278_v37  ;;  %vm725_vm3 = vmand %vm3522_vm11, %vm5299_vm15  ;;  %v2578_v47 = vsel %vm724_vm13, 1.0, %v5314_v33  ;;  %v2664_v58 = vsel %vm3497_vm4, 1.0, %v5314_v33 }
  0x5c   : > { %v2579_v19 = vsel %vm725_vm3, 1.0, %v5314_v33  ;;  %vm396_vm7 = vmand %vm3557_vm8, %vm5305_vm2  ;;  %v1420_v37 = vmul.f32 %v2578_v47, %v3543_v56  ;;  %v5302_v11 = vrot.slane %v3426_v5, 1  ;;  %v1534_v17 = vpack.c.bf16 %v1527_v45, %v1526_v63 }
  0x5d   : > { %v1273_v42 = vpack.c.bf16 %v1267_v22, %v1266_v61  ;;  %v1421_v48 = vmul.f32 %v2579_v19, %v3537_v7  ;;  %vm397_vm13 = vmand %vm3569_vm6, %vm5304_vm12  ;;  %v2514_v31 = vsel %vm396_vm7, 1.0, %v5314_v33  ;;  %vm5526_vm3 = vcmp.lt.s32.totalorder %v3423_v29, 8 }
  0x5e   : > { %vm452_vm4 = vmand %vm3557_vm8, %vm5526_vm3  ;;  %v1546_v61 = vpack.c.bf16 %v1539_v25, %v1538_v49  ;;  %v2515_v22 = vsel %vm397_vm13, 1.0, %v5314_v33  ;;  %vm5527_vm15 = vcmp.lt.s32.totalorder %v3434_v23, 8  ;;  %v820_v63 = vadd.s32 1, %v3395_v9 }
  0x5f   : > { %1630 = vrot.lane.b32.xlu1 %v1273_v42, %s2838_s12  ;;  %1642 = vrot.lane.b32.xlu0 %v1285_v59, %s2836_s23  ;;  %vm453_vm14 = vmand %vm3569_vm6, %vm5527_vm15  ;;  %v2522_v45 = vsel %vm452_vm4, 1.0, %v5314_v33  ;;  %vm5528_vm7 = vcmp.lt.s32.totalorder %v2994_v39, 8  ;;  %v3651_v49 = vmul.f32 %v2664_v58, %v3290_v41  ;;  %v821_v25 = vadd.s32 1, %v3418_v62 }
  0x60   : > { %v2523_v47 = vsel %vm453_vm14, 1.0, %v5314_v33  ;;  %vm1147_vm3 = vmand %vm3389_vm0, %vm5528_vm7  ;;  %v1427_v59 = vpack.c.bf16 %v1421_v48, %v1420_v37  ;;  %v1307_v19 = vmul.f32 %v2514_v31, %v3027_v51  ;;  %v5529_v28 = vrot.slane %v2907_v14, 1 }
  0x61   : > { %v2665_v42 = vsel %vm1147_vm3, 1.0, %v5314_v33  ;;  %vm5530_vm14 = vcmp.lt.s32.totalorder %v2867_v1, 7  ;;  %vm764_vm15 = vmand %vm3507_vm1, %vm5305_vm2  ;;  %v1308_v58 = vmul.f32 %v2515_v22, %v3034_v53  ;;  %v1336_v37 = vmul.f32 %v2522_v45, %v3105_v50 }
  0x62   : > { %v3662_v0 = vsel %vm5530_vm14, %v5529_v28, %v5302_v11  ;;  %vm765_vm13 = vmand %vm3522_vm11, %vm5304_vm12  ;;  %v2586_v31 = vsel %vm764_vm15, 1.0, %v5314_v33  ;;  %v5532_v48 = vrot.slane %v3426_v5, 2  ;;  %v5533_v28 = vrot.slane %v2907_v14, 2 }
  0x63   : > { %5531 = vst [vmem:[#allocation47_spill] sm:$0xff] %v3662_v0  ;;  %vm5534_vm4 = vcmp.lt.s32.totalorder %v2867_v1, 6  ;;  %1995 = vrot.lane.b32.xlu1 %v1534_v17, %s2837_s24  ;;  %2007 = vrot.lane.b32.xlu0 %v1546_v61, %s2839_s26  ;;  %v1337_v22 = vmul.f32 %v2523_v47, %v3196_v44  ;;  %v2587_v45 = vsel %vm765_vm13, 1.0, %v5314_v33  ;;  %vm5536_vm7 = vcmp.ge.s32.totalorder %v3438_v52, 0 }
  0x64   : > { %v3681_v11 = vsel %vm5534_vm4, %v5533_v28, %v5532_v48  ;;  %vm508_vm3 = vmand %vm3462_vm5, %vm5536_vm7  ;;  %vm836_vm15 = vcmp.lt.s32.totalorder %v820_v63, 8  ;;  %v1551_v10 = vmul.f32 %v2665_v42, %v3662_v0  ;;  %vm5537_vm4 = vcmp.ge.s32.totalorder %v3451_v34, 0 }
  0x65   : > { %5535 = vst [vmem:[#allocation48_spill] sm:$0xff] %v3681_v11  ;;  %vm509_vm12 = vmand %vm3466_vm10, %vm5537_vm4  ;;  %v2530_v17 = vsel %vm508_vm3, 1.0, %v5314_v33  ;;  %vm829_vm2 = vcmp.ge.s32.totalorder %v821_v25, 0  ;;  %v5308_v61 = vrot.slane %v3426_v5, 6  ;;  %v3699_v47 = vmul.f32 %v2586_v31, %v3290_v41 }
  0x66   : > { %v3702_v48 = vmul.f32 %v2587_v45, %v3662_v0  ;;  %v2531_v28 = vsel %vm509_vm12, 1.0, %v5314_v33  ;;  %vm5538_vm13 = vcmp.lt.s32.totalorder %v3423_v29, 8  ;;  %vm837_vm14 = vcmp.lt.s32.totalorder %v821_v25, 8 }
  0x67   : > { %vm796_vm7 = vmand %vm3507_vm1, %vm5538_vm13  ;;  %v1314_v42 = vpack.c.bf16 %v1308_v58, %v1307_v19  ;;  %v1348_v44 = vmul.f32 %v2530_v17, %v2979_v35  ;;  %v1349_v38 = vmul.f32 %v2531_v28, %v3310_v46  ;;  %vm5539_vm3 = vcmp.lt.s32.totalorder %v3434_v23, 8  ;;  %1738 = vrot.lane.b32.xlu1 %v1427_v59, %s2835_s18  ;;  %1766 = vrot.lane.b32.xlu0 %v2888_v6, %s2833_s15 }
  0x68   : > { %vm797_vm4 = vmand %vm3522_vm11, %vm5539_vm3  ;;  %v2594_v31 = vsel %vm796_vm7, 1.0, %v5314_v33  ;;  %v1343_v36 = vpack.c.bf16 %v1337_v22, %v1336_v37  ;;  %vm5540_vm1 = vcmp.ge.s32.totalorder %v820_v63, 0  ;;  %v5541_v19 = vmov 0 }
  0x69   : > { %v2595_v45 = vsel %vm797_vm4, 1.0, %v5314_v33  ;;  %vm3722_vm12 = vmand %vm5540_vm1, %vm836_vm15  ;;  %v2546_v21 = vsel %vm3462_vm5, 1.0, %v5314_v33  ;;  %v2547_v59 = vsel %vm3466_vm10, 1.0, %v5314_v33  ;;  %v1558_v58 = vpack.c.bf16 %v1551_v10, %v3651_v49 }
  0x6a   : > { %v5542_v19 = vsel %vm3722_vm12, 4294967295, %v5541_v19  ;;  %vm3734_vm11 = vmand %vm829_vm2, %vm837_vm14  ;;  %v5544_v6 = vmov 0  ;;  %v2618_v63 = vsel %vm3722_vm12, 1.0, %v5314_v33  ;;  %v5547_v37 = vrot.slane %v2907_v14, 6 }
  0x6b   : > { %5543 = vst [vmem:[#allocation49_spill] sm:$0xff] %v5542_v19  ;;  %v5545_v6 = vsel %vm3734_vm11, 4294967295, %v5544_v6  ;;  %vm5548_vm15 = vcmp.lt.s32.totalorder %v2867_v1, 2  ;;  %v1439_v10 = vpack.c.bf16 %v3702_v48, %v3699_v47  ;;  %v3753_v49 = vmul.f32 %v2594_v31, %v3337_v60  ;;  %1654 = vrot.lane.b32.xlu1 %v1314_v42, %s2835_s18  ;;  %1666 = vrot.lane.b32.xlu0 %v1343_v36, %s2833_s15 }
  0x6c   : > { %5546 = vst [vmem:[#allocation50_spill] sm:$0xff] %v5545_v6  ;;  %v3747_v22 = vsel %vm5548_vm15, %v5547_v37, %v5308_v61  ;;  %v2619_v25 = vsel %vm3734_vm11, 1.0, %v5314_v33  ;;  %vm5550_vm2 = vcmp.ge.s32.totalorder %v3491_v20, 0  ;;  %v150_v28 = vadd.s32 32, %v2867_v1 }
  0x6d   : > { %5549 = vst [vmem:[#allocation51_spill] sm:$0xff] %v3747_v22  ;;  %vm540_vm14 = vmand %vm3462_vm5, %vm5550_vm2  ;;  %v1355_v37 = vpack.c.bf16 %v1349_v38, %v1348_v44  ;;  %v3764_v61 = vmul.f32 %v2595_v45, %v3681_v11  ;;  %vm5551_vm13 = vcmp.ge.s32.totalorder %v3512_v32, 0  ;;  %v3771_v47 = vmul.f32 %v2546_v21, %v2901_v12 }
  0x6e   : > { %vm541_vm7 = vmand %vm3466_vm10, %vm5551_vm13  ;;  %v3774_v48 = vmul.f32 %v2547_v59, %v2904_v13  ;;  %v1480_v44 = vmul.f32 %v2618_v63, %v2907_v14  ;;  %v1481_v38 = vmul.f32 %v2619_v25, %v3426_v5  ;;  %vm5552_vm3 = vcmp.ge.s32.totalorder %v3438_v52, 0 }
  0x6f   : > { %vm852_vm4 = vmand %vm3722_vm12, %vm5552_vm3  ;;  %v151_v45 = vadd.s32 40, %v2867_v1  ;;  %v2538_v21 = vsel %vm540_vm14, 1.0, %v5314_v33  ;;  %v2539_v59 = vsel %vm541_vm7, 1.0, %v5314_v33  ;;  %vm5553_vm1 = vcmp.ge.s32.totalorder %v3451_v34, 0  ;;  %2019 = vrot.lane.b32.xlu1 %v1558_v58, %s2840_s5  ;;  %1678 = vrot.lane.b32.xlu0 %v1355_v37, %s2837_s24 }
  0x70   : > { %vm853_vm15 = vmand %vm3734_vm11, %vm5553_vm1  ;;  %v2602_v42 = vsel %vm852_vm4, 1.0, %v5314_v33  ;;  %v3793_v36 = vshra.s32 %v150_v28, 3  ;;  %vm5554_vm2 = vcmp.lt.s32.totalorder %v3588_v40, 8  ;;  %v3807_v46 = vand.u32 7, %v150_v28 }
  0x71   : > { %v2603_v63 = vsel %vm853_vm15, 1.0, %v5314_v33  ;;  %v1456_v25 = vmul.f32 %v2602_v42, %v3411_v4  ;;  %vm3801_vm14 = vmand %vm3722_vm12, %vm5554_vm2  ;;  %v3805_v17 = vshra.s32 %v151_v45, 3  ;;  %v1451_v53 = vpack.c.bf16 %v3764_v61, %v3753_v49 }
  0x72   : > { %v1457_v35 = vmul.f32 %v2603_v63, %v3747_v22  ;;  %vm5557_vm13 = vcmp.lt.s32.totalorder %v3597_v8, 8  ;;  %v5560_v33 = vrot.slane %v2911_v15, 1  ;;  %v5561_v12 = vrot.slane %v3426_v5, 1 }
  0x73   : > { %vm3816_vm7 = vmand %vm3734_vm11, %vm5557_vm13  ;;  %vm5562_vm3 = vcmp.lt.s32.totalorder %v2867_v1, 7  ;;  %v3828_v50 = vand.u32 7, %v151_v45  ;;  %v1487_v61 = vpack.c.bf16 %v1481_v38, %v1480_v44  ;;  %v1379_v49 = vpack.c.bf16 %v3774_v48, %v3771_v47  ;;  %1778 = vrot.lane.b32.xlu1 %v1439_v10, %s2837_s24 }
  0x74   : > { %v3826_v28 = vsel %vm5562_vm3, %v5561_v12, %v5560_v33  ;;  %vm5564_vm4 = vcmp.lt.s32.totalorder %v3423_v29, 8  ;;  %v3839_v63 = vadd.s32 2, %v3807_v46  ;;  %v478_v12 = vadd.s32 4294967295, %v3793_v36 }
  0x75   : > { %5563 = vst [vmem:[#allocation52_spill] sm:$0xff] %v3826_v28  ;;  %vm988_vm1 = vmand %vm3722_vm12, %vm5564_vm4  ;;  %v1360_v33 = vmul.f32 %v2538_v21, %v2957_v30  ;;  %v1361_v58 = vmul.f32 %v2539_v59, %v3543_v56  ;;  %vm5566_vm15 = vcmp.lt.s32.totalorder %v3434_v23, 8  ;;  %v5567_v37 = vrot.slane %v2911_v15, 2  ;;  %1949 = vrot.lane.b32.xlu0 %v1487_v61, %s2838_s12 }
  0x76   : > { %5565 = vst [vmem:[#allocation53_spill] sm:$0xff] %v3839_v63  ;;  %vm989_vm2 = vmand %vm3734_vm11, %vm5566_vm15  ;;  %v5568_v47 = vrot.slane %v3426_v5, 2  ;;  %vm5569_vm13 = vcmp.lt.s32.totalorder %v2867_v1, 6  ;;  %v3857_v44 = vadd.s32 2, %v3828_v50  ;;  %v1463_v38 = vpack.c.bf16 %v1457_v35, %v1456_v25 }
  0x77   : > { %v5571_v45 = vmov 0.0   ;;  %v479_v6 = vadd.s32 4294967295, %v3805_v17  ;;  %vm486_vm4 = vcmp.ge.s32.totalorder %v478_v12, 0  ;;  %v1012_v35 = vadd.s32 2, %v3395_v9  ;;  %1790 = vrot.lane.b32.xlu1 %v1451_v53, %s2839_s26 }
  0x78   : > { %v3854_v48 = vsel %vm5569_vm13, %v5568_v47, %v5567_v37  ;;  %5570 = vst [vmem:[#allocation54_spill] sm:$0xff] %v3857_v44  ;;  %v2626_v21 = vsel %vm3801_vm14, 1.0, %v5571_v45  ;;  %v2627_v59 = vsel %vm3816_vm7, 1.0, %v5571_v45  ;;  %v2634_v19 = vsel %vm988_vm1, 1.0, %v5571_v45 }
  0x79   : > { %v2635_v23 = vsel %vm989_vm2, 1.0, %v5571_v45  ;;  %vm487_vm15 = vcmp.ge.s32.totalorder %v479_v6, 0  ;;  %vm494_vm13 = vcmp.lt.s32.totalorder %v478_v12, 8  ;;  %vm495_vm14 = vcmp.lt.s32.totalorder %v479_v6, 8  ;;  %1802 = vrot.lane.b32.xlu0 %v1463_v38, %s2840_s5 }
  0x7a   : > { %v1492_v31 = vmul.f32 %v2626_v21, %v3662_v0  ;;  %v1493_v25 = vmul.f32 %v2627_v59, %v3826_v28  ;;  %vm3875_vm1 = vmand %vm486_vm4, %vm494_vm13  ;;  %v5572_v42 = vmov 0  ;;  %v1013_v37 = vadd.s32 2, %v3418_v62 }
  0x7b   : > { %v5573_v42 = vsel %vm3875_vm1, 4294967295, %v5572_v42  ;;  %v3881_v10 = vmul.f32 %v2634_v19, %v3681_v11  ;;  %vm3883_vm2 = vmand %vm487_vm15, %vm495_vm14  ;;  %v5575_v61 = vmov 0  ;;  %vm1020_vm3 = vcmp.ge.s32.totalorder %v1012_v35, 0 }
  0x7c   : > { %5574 = vst [vmem:[#allocation55_spill] sm:$0xff] %v5573_v42  ;;  %v5576_v61 = vsel %vm3883_vm2, 4294967295, %v5575_v61  ;;  %vm1028_vm11 = vcmp.lt.s32.totalorder %v1012_v35, 8  ;;  %v174_v9 = vadd.s32 4294967294, %v3793_v36  ;;  %v3889_v6 = vmul.f32 %v2635_v23, %v3854_v48 }
  0x7d   : > { %5577 = vst [vmem:[#allocation56_spill] sm:$0xff] %v5576_v61  ;;  %vm5578_vm4 = vcmp.lt.s32.totalorder %v3839_v63, 8  ;;  %vm1021_vm7 = vcmp.ge.s32.totalorder %v1013_v37, 0  ;;  %vm1029_vm12 = vcmp.lt.s32.totalorder %v1013_v37, 8  ;;  %v175_v62 = vadd.s32 4294967294, %v3805_v17  ;;  %1702 = vrot.lane.b32.xlu0 %v1379_v49, %s2840_s5 }
  0x7e   : > { %vm646_vm13 = vmand %vm3875_vm1, %vm5578_vm4  ;;  %v1367_v19 = vpack.c.bf16 %v1361_v58, %v1360_v33  ;;  %vm5579_vm15 = vcmp.lt.s32.totalorder %v3857_v44, 8  ;;  %v3905_v47 = vadd.s32 4294967295, %v3807_v46  ;;  %v1499_v21 = vpack.c.bf16 %v1493_v25, %v1492_v31 }
  0x7f   : > { %vm647_vm14 = vmand %vm3883_vm2, %vm5579_vm15  ;;  %v2564_v23 = vsel %vm646_vm13, 1.0, %v5571_v45  ;;  %v5581_v33 = vmov 0  ;;  %v3916_v58 = vadd.s32 4294967295, %v3828_v50  ;;  %v5585_v12 = vmov 0 }
  0x80   : > { %5580 = vst [vmem:[#allocation57_spill] sm:$0xff] %v3905_v47  ;;  %v2565_v59 = vsel %vm647_vm14, 1.0, %v5571_v45  ;;  %v1398_v53 = vmul.f32 %v2564_v23, %v3681_v11  ;;  %vm3911_vm4 = vmand %vm1020_vm3, %vm1028_vm11  ;;  %vm190_vm14 = vcmp.lt.s32.totalorder %v174_v9, 8  ;;  %v3926_v31 = vadd.s32 4294967294, %v3807_v46  ;;  %1690 = vrot.lane.b32.xlu1 %v1367_v19, %s2839_s26 }
  0x81   : > { %v5582_v33 = vsel %vm3911_vm4, 4294967295, %v5581_v33  ;;  %5584 = vst [vmem:[#allocation59_spill] sm:$0xff] %v3916_v58  ;;  %v1399_v38 = vmul.f32 %v2565_v59, %v3854_v48  ;;  %vm3921_vm13 = vmand %vm1021_vm7, %vm1029_vm12  ;;  %v1511_v35 = vpack.c.bf16 %v3889_v6, %v3881_v10  ;;  %vm5589_vm11 = vcmp.ge.s32.totalorder %v3438_v52, 0 }
  0x82   : > { %5583 = vst [vmem:[#allocation58_spill] sm:$0xff] %v5582_v33  ;;  %v5586_v12 = vsel %vm3921_vm13, 4294967295, %v5585_v12  ;;  %5588 = vst [vmem:[#allocation61_spill] sm:$0xff] %v3926_v31  ;;  %vm191_vm8 = vcmp.lt.s32.totalorder %v175_v62, 8  ;;  %v3935_v25 = vadd.s32 4294967294, %v3828_v50  ;;  %vm5591_vm12 = vcmp.ge.s32.totalorder %v3451_v34, 0 }
  0x83   : > { %5587 = vst [vmem:[#allocation60_spill] sm:$0xff] %v5586_v12  ;;  %vm1044_vm3 = vmand %vm3911_vm4, %vm5589_vm11  ;;  %v1404_v37 = vpack.c.bf16 %v1399_v38, %v1398_v53  ;;  %v5592_v10 = vrot.slane %v2911_v15, 6  ;;  %v5593_v6 = vrot.slane %v3426_v5, 6  ;;  %vm5594_vm11 = vcmp.lt.s32.totalorder %v2867_v1, 2 }
  0x84   : > { %5590 = vst [vmem:[#allocation62_spill] sm:$0xff] %v3935_v25  ;;  %vm1045_vm7 = vmand %vm3921_vm13, %vm5591_vm12  ;;  %vm5336_vm6 = vcmp.ge.s32.totalorder %v3905_v47, 0  ;;  %v2642_v49 = vsel %vm1044_vm3, 1.0, %v5571_v45  ;;  %vm5595_vm0 = vcmp.ge.s32.totalorder %v174_v9, 0  ;;  %v5596_v59 = vmov 0  ;;  %1961 = vrot.lane.b32.xlu1 %v1499_v21, %s2836_s23 }
  0x85   : > { %v3949_v23 = vsel %vm5594_vm11, %v5593_v6, %v5592_v10  ;;  %v2643_v19 = vsel %vm1045_vm7, 1.0, %v5571_v45  ;;  %vm3957_vm9 = vmand %vm5595_vm0, %vm190_vm14  ;;  %vm5355_vm12 = vcmp.ge.s32.totalorder %v3916_v58, 0  ;;  %vm671_vm10 = vcmp.ge.s32.totalorder %v3805_v17, 0  ;;  %1716 = vrot.lane.b32.xlu0 %v1404_v37, %s2838_s12 }
  0x86   : > { %v5597_v59 = vsel %vm3957_vm9, 4294967295, %v5596_v59  ;;  %vm5599_vm11 = vcmp.ge.s32.totalorder %v175_v62, 0  ;;  %v5600_v53 = vmov 0  ;;  %vm5340_vm15 = vcmp.ge.s32.totalorder %v3926_v31, 0  ;;  %vm278_vm0 = vmand %vm3957_vm9, %vm5336_vm6 }
  0x87   : > { %5598 = vst [vmem:[#allocation63_spill] sm:$0xff] %v5597_v59  ;;  %vm3964_vm5 = vmand %vm5599_vm11, %vm191_vm8  ;;  %vm678_vm3 = vcmp.lt.s32.totalorder %v3793_v36, 8  ;;  %vm679_vm7 = vcmp.lt.s32.totalorder %v3805_v17, 8  ;;  %v2508_v9 = vsel %vm3957_vm9, 1.0, %v5571_v45  ;;  %vm5339_vm8 = vcmp.ge.s32.totalorder %v3935_v25, 0 }
  0x88   : > { %v5601_v53 = vsel %vm3964_vm5, 4294967295, %v5600_v53  ;;  %v2509_v62 = vsel %vm3964_vm5, 1.0, %v5571_v45  ;;  %v2658_v38 = vsel %vm3911_vm4, 1.0, %v5571_v45  ;;  %v2659_v10 = vsel %vm3921_vm13, 1.0, %v5571_v45  ;;  %vm279_vm14 = vmand %vm3964_vm5, %vm5355_vm12  ;;  %1973 = vrot.lane.b32.xlu1 %v1511_v35, %s2835_s18 }
  0x89   : > { %5602 = vst [vmem:[#allocation64_spill] sm:$0xff] %v5601_v53  ;;  %v1516_v6 = vmul.f32 %v2642_v49, %v3747_v22  ;;  %v1517_v29 = vmul.f32 %v2643_v19, %v3949_v23  ;;  %v2500_v34 = vsel %vm278_vm0, 1.0, %v5571_v45  ;;  %v1251_v52 = vrot.slane %v3426_v5, 7  ;;  %vm4019_vm0 = vmand %vm671_vm10, %vm679_vm7 }
  0x8a   : > { %v2501_v30 = vsel %vm279_vm14, 1.0, %v5571_v45  ;;  %v1268_v55 = vmul.f32 %v2500_v34, %v3543_v56  ;;  %vm5603_vm11 = vcmp.ge.s32.totalorder %v3793_v36, 0  ;;  %v4009_v37 = vmul.f32 %v2508_v9, %v2904_v13  ;;  %vm695_vm10 = vmand %vm4019_vm0, %vm5339_vm8 }
  0x8b   : > { %vm4004_vm6 = vmand %vm5603_vm11, %vm678_vm3  ;;  %v4012_v49 = vmul.f32 %v2509_v62, %v2907_v14  ;;  %v1269_v19 = vmul.f32 %v2501_v30, %v3537_v7  ;;  %v4024_v56 = vmul.f32 %v2658_v38, %v3426_v5  ;;  %v4027_v27 = vmul.f32 %v2659_v10, %v2911_v15 }
  0x8c   : > { %v4030_v13 = vadd.s32 1, %v3807_v46  ;;  %vm694_vm3 = vmand %vm4004_vm6, %vm5340_vm15  ;;  %v4037_v30 = vadd.s32 1, %v3828_v50  ;;  %v1523_v9 = vpack.c.bf16 %v1517_v29, %v1516_v6  ;;  %v5610_v38 = vrot.slane %v2907_v14, 7 }
  0x8d   : > { %v1274_v62 = vpack.c.bf16 %v1269_v19, %v1268_v55  ;;  %v2572_v46 = vsel %vm694_vm3, 1.0, %v5571_v45  ;;  %vm5611_vm7 = vcmp.lt.s32.totalorder %v2867_v1, 1  ;;  %v2573_v50 = vsel %vm695_vm10, 1.0, %v5571_v45 }
  0x8e   : > { %5608 = vst [vmem:[#allocation65_spill] sm:$0xff] %v4030_v13  ;;  %5609 = vst [vmem:[#allocation66_spill] sm:$0xff] %v4037_v30  ;;  %v4049_v10 = vsel %vm5611_vm7, %v5610_v38, %v1251_v52  ;;  %v1410_v35 = vmul.f32 %v2572_v46, %v3747_v22  ;;  %vm5613_vm14 = vcmp.ge.s32.totalorder %v3491_v20, 0  ;;  %v5614_v29 = vrot.slane %v2911_v15, 7  ;;  %1985 = vrot.lane.b32.xlu1 %v1523_v9, %s2833_s15 }
  0x8f   : > { %5612 = vst [vmem:[#allocation67_spill] sm:$0xff] %v4049_v10  ;;  %vm1076_vm11 = vmand %vm3911_vm4, %vm5613_vm14  ;;  %v1286_v6 = vpack.c.bf16 %v4012_v49, %v4009_v37  ;;  %1632 = vrot.lane.b32.xlu0 %v1274_v62, %s2838_s12  ;;  %v1411_v19 = vmul.f32 %v2573_v50, %v3949_v23  ;;  %vm5617_vm10 = vcmp.ge.s32.totalorder %v3512_v32, 0  ;;  %vm5357_vm14 = vcmp.lt.s32.totalorder %v4030_v13, 8  ;;  %v4083_v49 = vld [vmem:[%s2879_s14 + $0x10] sm:$0xff]  }
  0x90   : > { %vm5615_vm3 = vmmov %vm5611_vm7  ;;  %v2650_v46 = vsel %vm1076_vm11, 1.0, %v5571_v45  ;;  %vm5356_vm15 = vcmp.lt.s32.totalorder %v4037_v30, 8  ;;  %v5620_v38 = vrot.slane %v2911_v15, 1  ;;  %v5627_v51 = vrot.slane %v2911_v15, 6 }
  0x91   : > { %v4061_v55 = vsel %vm5615_vm3, %v1251_v52, %v5614_v29  ;;  %vm1077_vm7 = vmand %vm3921_vm13, %vm5617_vm10  ;;  %v1528_v37 = vmul.f32 %v2650_v46, %v4049_v10  ;;  %vm5618_vm3 = vcmp.ge.s32.totalorder %v3905_v47, 0  ;;  %v1416_v62 = vpack.c.bf16 %v1411_v19, %v1410_v35 }
  0x92   : > { %5616 = vst [vmem:[#allocation68_spill] sm:$0xff] %v4061_v55  ;;  %v2651_v52 = vsel %vm1077_vm7, 1.0, %v5571_v45  ;;  %vm726_vm8 = vmand %vm4004_vm6, %vm5618_vm3  ;;  %v5619_v46 = vrot.slane %v2913_v16, 1  ;;  %vm5621_vm10 = vcmp.lt.s32.totalorder %v2867_v1, 7  ;;  %v4107_v19 = vadd.s32 1, %v3793_v36 }
  0x93   : > { %v1529_v50 = vmul.f32 %v2651_v52, %v4061_v55  ;;  %vm727_vm11 = vmand %vm4019_vm0, %vm5355_vm12  ;;  %v2580_v29 = vsel %vm726_vm8, 1.0, %v5571_v45  ;;  %v4110_v52 = vadd.s32 1, %v3805_v17  ;;  %vm5622_vm3 = vcmp.lt.s32.totalorder %v3588_v40, 8  ;;  %1728 = vrot.lane.b32.xlu1 %v1416_v62, %s2836_s23 }
  0x94   : > { %v4098_v32 = vsel %vm5621_vm10, %v5620_v38, %v5619_v46  ;;  %v2581_v9 = vsel %vm727_vm11, 1.0, %v5571_v45  ;;  %v1422_v35 = vmul.f32 %v2580_v29, %v4049_v10  ;;  %vm398_vm7 = vmand %vm3957_vm9, %vm5357_vm14  ;;  %v152_v29 = vadd.s32 48, %v2867_v1 }
  0x95   : > { %v1535_v20 = vpack.c.bf16 %v1529_v50, %v1528_v37  ;;  %v1423_v18 = vmul.f32 %v2581_v9, %v4061_v55  ;;  %vm399_vm8 = vmand %vm3964_vm5, %vm5356_vm15  ;;  %v2516_v38 = vsel %vm398_vm7, 1.0, %v5571_v45  ;;  %v5623_v37 = vrot.slane %v2913_v16, 2 }
  0x96   : > { %v2517_v46 = vsel %vm399_vm8, 1.0, %v5571_v45  ;;  %vm1148_vm11 = vmand %vm3911_vm4, %vm5622_vm3  ;;  %v5624_v50 = vrot.slane %v2911_v15, 2  ;;  %vm5625_vm10 = vcmp.lt.s32.totalorder %v2867_v1, 6  ;;  %v5626_v55 = vrot.slane %v2913_v16, 6 }
  0x97   : > { %vm5628_vm7 = vcmp.lt.s32.totalorder %v2867_v1, 2  ;;  %v153_v40 = vadd.s32 56, %v2867_v1  ;;  %1997 = vrot.lane.b32.xlu0 %v1535_v20, %s2837_s24  ;;  %v1428_v33 = vpack.c.bf16 %v1423_v18, %v1422_v35  ;;  %v1309_v57 = vmul.f32 %v2516_v38, %v3290_v41  ;;  %1644 = vrot.lane.b32.xlu1 %v1286_v6, %s2836_s23 }
  0x98   : > { %v4130_v9 = vsel %vm5625_vm10, %v5624_v50, %v5623_v37  ;;  %v4138_v54 = vsel %vm5628_vm7, %v5627_v51, %v5626_v55  ;;  %v1310_v37 = vmul.f32 %v2517_v46, %v3662_v0  ;;  %vm5629_vm8 = vcmp.lt.s32.totalorder %v3597_v8, 8 }
  0x99   : > { %vm1149_vm3 = vmand %vm3921_vm13, %vm5629_vm8  ;;  %v2548_v51 = vsel %vm3875_vm1, 1.0, %v5571_v45  ;;  %v2666_v1 = vsel %vm1148_vm11, 1.0, %v5571_v45  ;;  %vm5630_vm10 = vcmp.lt.s32.totalorder %v3839_v63, 8  ;;  %vm830_vm12 = vcmp.ge.s32.totalorder %v4107_v19, 0 }
  0x9a   : > { %v2667_v55 = vsel %vm1149_vm3, 1.0, %v5571_v45  ;;  %vm454_vm7 = vmand %vm3957_vm9, %vm5630_vm10  ;;  %vm5631_vm14 = vcmp.lt.s32.totalorder %v3857_v44, 8  ;;  %v2549_v20 = vsel %vm3883_vm2, 1.0, %v5571_v45  ;;  %v4168_v62 = vshra.s32 %v152_v29, 3 }
  0x9b   : > { %vm455_vm8 = vmand %vm3964_vm5, %vm5631_vm14  ;;  %v2524_v18 = vsel %vm454_vm7, 1.0, %v5571_v45  ;;  %v4170_v35 = vand.u32 7, %v152_v29  ;;  %vm5632_vm11 = vcmp.lt.s32.totalorder %v4030_v13, 8  ;;  %v4178_v46 = vmul.f32 %v2548_v51, %v2907_v14  ;;  %1740 = vrot.lane.b32.xlu0 %v1428_v33, %s2835_s18 }
  0x9c   : > { %v2525_v38 = vsel %vm455_vm8, 1.0, %v5571_v45  ;;  %vm766_vm3 = vmand %vm4004_vm6, %vm5632_vm11  ;;  %v4180_v50 = vshra.s32 %v153_v40, 3  ;;  %v4182_v0 = vand.u32 7, %v153_v40  ;;  %v1315_v29 = vpack.c.bf16 %v1310_v37, %v1309_v57 }
  0x9d   : > { %v1552_v53 = vmul.f32 %v2666_v1, %v3826_v28  ;;  %v1553_v59 = vmul.f32 %v2667_v55, %v4098_v32  ;;  %vm5633_vm14 = vcmp.lt.s32.totalorder %v4037_v30, 8  ;;  %vm838_vm7 = vcmp.lt.s32.totalorder %v4107_v19, 8 }
  0x9e   : > { %vm767_vm10 = vmand %vm4019_vm0, %vm5633_vm14  ;;  %v4194_v14 = vmul.f32 %v2524_v18, %v3337_v60  ;;  %v2588_v40 = vsel %vm766_vm3, 1.0, %v5571_v45  ;;  %vm5634_vm8 = vcmp.ge.s32.totalorder %v3926_v31, 0  ;;  %v4203_v57 = vmul.f32 %v2549_v20, %v3426_v5 }
  0x9f   : > { %v2589_v6 = vsel %vm767_vm10, 1.0, %v5571_v45  ;;  %vm510_vm11 = vmand %vm3875_vm1, %vm5634_vm8  ;;  %v1339_v33 = vmul.f32 %v2525_v38, %v3681_v11  ;;  %vm5635_vm14 = vcmp.ge.s32.totalorder %v3935_v25, 0  ;;  %v4212_v51 = vadd.s32 2, %v4170_v35  ;;  %1656 = vrot.lane.b32.xlu0 %v1315_v29, %s2835_s18 }
  0xa0   : > { %vm511_vm15 = vmand %vm3883_vm2, %vm5635_vm14  ;;  %v2532_v37 = vsel %vm510_vm11, 1.0, %v5571_v45  ;;  %v4215_v1 = vadd.s32 4294967295, %v4168_v62  ;;  %vm5636_vm3 = vcmp.lt.s32.totalorder %v3839_v63, 8  ;;  %vm839_vm8 = vcmp.lt.s32.totalorder %v4110_v52, 8 }
  0xa1   : > { %v2533_v55 = vsel %vm511_vm15, 1.0, %v5571_v45  ;;  %vm798_vm10 = vmand %vm4004_vm6, %vm5636_vm3  ;;  %v4224_v18 = vadd.s32 2, %v4182_v0  ;;  %v4227_v20 = vadd.s32 4294967295, %v4180_v50  ;;  %v5637_v38 = vpack.c.bf16 %v4027_v27, %v4024_v56 }
  0xa2   : > { %v1559_v12 = vpack.c.bf16 %v1553_v59, %v1552_v53  ;;  %v1434_v41 = vmul.f32 %v2588_v40, %v3826_v28  ;;  %v1435_v21 = vmul.f32 %v2589_v6, %v4098_v32  ;;  %vm5638_vm6 = vcmp.lt.s32.totalorder %v3857_v44, 8  ;;  %vm4252_vm11 = vmand %vm830_vm12, %vm838_vm7 }
  0xa3   : > { %2009 = vrot.lane.b32.xlu1 %v5637_v38, %s2839_s26  ;;  %vm799_vm15 = vmand %vm4019_vm0, %vm5638_vm6  ;;  %v2596_v11 = vsel %vm798_vm10, 1.0, %v5571_v45  ;;  %v4242_v60 = vmul.f32 %v2532_v37, %v3411_v4  ;;  %v4245_v56 = vmul.f32 %v2533_v55, %v3747_v22  ;;  %v5639_v59 = vmov 0  ;;  %v5689_v4 = vld [vmem:[#allocation11_spill] sm:$0xff] }
  0xa4   : > { %v2597_v27 = vsel %vm799_vm15, 1.0, %v5571_v45  ;;  %v5640_v59 = vsel %vm4252_vm11, 4294967295, %v5639_v59  ;;  %v1344_v34 = vpack.c.bf16 %v1339_v33, %v4194_v14  ;;  %vm5642_vm0 = vcmp.ge.s32.totalorder %v4110_v52, 0  ;;  %2021 = vrot.lane.b32.xlu0 %v1559_v12, %s2840_s5  ;;  %v4310_v33 = vpop.permute.xlu0 %1764 }
  0xa5   : > { %5641 = vst [vmem:[#allocation69_spill] sm:$0xff] %v5640_v59  ;;  %vm4263_vm14 = vmand %vm5642_vm0, %vm839_vm8  ;;  %v5643_v29 = vmov 0  ;;  %v4270_v19 = vadd.s32 2, %v3793_v36  ;;  %v1446_v40 = vmul.f32 %v2596_v11, %v3854_v48  ;;  %v1447_v6 = vmul.f32 %v2597_v27, %v4130_v9 }
  0xa6   : > { %v5644_v29 = vsel %vm4263_vm14, 4294967295, %v5643_v29  ;;  %v2620_v14 = vsel %vm4252_vm11, 1.0, %v5571_v45  ;;  %vm5646_vm7 = vcmp.ge.s32.totalorder %v3905_v47, 0  ;;  %v1440_v11 = vpack.c.bf16 %v1435_v21, %v1434_v41 }
  0xa7   : > { %5645 = vst [vmem:[#allocation70_spill] sm:$0xff] %v5644_v29  ;;  %vm542_vm10 = vmand %vm3875_vm1, %vm5646_vm7  ;;  %1768 = vrot.lane.b32.xlu1 %v4083_v49, %s2833_s15  ;;  %v2621_v36 = vsel %vm4263_vm14, 1.0, %v5571_v45  ;;  %vm5647_vm15 = vcmp.ge.s32.totalorder %v3916_v58, 0  ;;  %vm5648_vm8 = vcmp.lt.s32.totalorder %v2994_v39, 8  ;;  %vm5649_vm3 = vnez %v5432_v43 }
  0xa8   : > { %vm543_vm0 = vmand %vm3883_vm2, %vm5647_vm15  ;;  %v2540_v52 = vsel %vm542_vm10, 1.0, %v5571_v45  ;;  %v1356_v41 = vpack.c.bf16 %v4245_v56, %v4242_v60  ;;  %vm5652_vm12 = vcmp.ge.s32.totalorder %v3926_v31, 0  ;;  %v1015_v39 = vadd.s32 2, %v3805_v17  ;;  %1780 = vrot.lane.b32.xlu0 %v1440_v11, %s2837_s24 }
  0xa9   : > { %vm4299_vm6 = vmand %vm5649_vm3, %vm5648_vm8  ;;  %v2541_v49 = vsel %vm543_vm0, 1.0, %v5571_v45  ;;  %v1482_v43 = vmul.f32 %v2620_v14, %v2911_v15  ;;  %vm5653_vm3 = vcmp.ge.s32.totalorder %v3935_v25, 0  ;;  %vm5655_vm5 = vnez %v5426_v2  ;;  %v5665_v14 = vld [vmem:[#allocation17_spill] sm:$0xff] }
  0xaa   : > { %vm854_vm10 = vmand %vm4252_vm11, %vm5652_vm12  ;;  %vm5654_vm12 = vcmp.ge.s32.totalorder %v2937_v24, 0  ;;  %vm5658_vm9 = vcmp.ge.s32.totalorder %v2944_v26, 0  ;;  %vm5659_vm2 = vnez %v5428_v3  ;;  %v1452_v55 = vpack.c.bf16 %v1447_v6, %v1446_v40 }
  0xab   : > { %vm855_vm8 = vmand %vm4263_vm14, %vm5653_vm3  ;;  %v2604_v60 = vsel %vm854_vm10, 1.0, %v5571_v45  ;;  %v1483_v38 = vmul.f32 %v2621_v36, %v2913_v16  ;;  %v1362_v21 = vmul.f32 %v2540_v52, %v3537_v7  ;;  %1668 = vrot.lane.b32.xlu1 %v1344_v34, %s2833_s15  ;;  %v1363_v26 = vmul.f32 %v2541_v49, %v4049_v10 }
  0xac   : > { %vm4326_vm15 = vmand %vm5655_vm5, %vm5654_vm12  ;;  %v2605_v24 = vsel %vm855_vm8, 1.0, %v5571_v45  ;;  %vm5662_vm5 = vcmp.lt.s32.totalorder %v4030_v13, 8  ;;  %v176_v3 = vadd.s32 4294967294, %v4168_v62  ;;  %v4355_v56 = vadd.s32 4294967294, %v4180_v50  ;;  %1792 = vrot.lane.b32.xlu0 %v1452_v55, %s2839_s26 }
  0xad   : > { %vm4334_vm1 = vmand %vm5659_vm2, %vm5658_vm9  ;;  %vm5663_vm9 = vcmp.lt.s32.totalorder %v4037_v30, 8  ;;  %v4358_v27 = vmul.f32 %v2604_v60, %v3949_v23  ;;  %v1459_v34 = vmul.f32 %v2605_v24, %v4138_v54  ;;  %vm5664_vm3 = vcmp.lt.s32.totalorder %v3839_v63, 8 }
  0xae   : > { %vm958_vm10 = vmand %vm4252_vm11, %vm5662_vm5  ;;  %vm5666_vm12 = vcmp.lt.s32.totalorder %v3857_v44, 8  ;;  %v4374_v52 = vadd.s32 4294967295, %v4170_v35  ;;  %v4377_v49 = vadd.s32 4294967295, %v4182_v0  ;;  %v1488_v60 = vpack.c.bf16 %v1483_v38, %v1482_v43  ;;  %v4392_v43 = vpop.permute.xlu1 %1724 }
  0xaf   : > { %vm959_vm2 = vmand %vm4263_vm14, %vm5663_vm9  ;;  %v2628_v2 = vsel %vm958_vm10, 1.0, %v5571_v45  ;;  %vm5667_vm10 = vcmp.lt.s32.totalorder %v4215_v1, 8  ;;  %vm5668_vm9 = vcmp.ge.s32.totalorder %v4215_v1, 0  ;;  %1680 = vrot.lane.b32.xlu1 %v1356_v41, %s2837_s24  ;;  %v1368_v53 = vpack.c.bf16 %v1363_v26, %v1362_v21  ;;  %v5676_v21 = vld [vmem:[#allocation21_spill] sm:$0xff] }
  0xb0   : > { %v2629_v40 = vsel %vm959_vm2, 1.0, %v5571_v45  ;;  %v1494_v6 = vmul.f32 %v2628_v2, %v4098_v32  ;;  %vm990_vm8 = vmand %vm4252_vm11, %vm5664_vm3  ;;  %v4380_v2 = vpop.permute.xlu0 %1736  ;;  %v4403_v1 = vadd.s32 4294967294, %v4170_v35  ;;  %v1464_v41 = vpack.c.bf16 %v1459_v34, %v4358_v27 }
  0xb1   : > { %v1495_v11 = vmul.f32 %v2629_v40, %v5665_v14  ;;  %vm991_vm5 = vmand %vm4263_vm14, %vm5666_vm12  ;;  %v2636_v36 = vsel %vm990_vm8, 1.0, %v5571_v45  ;;  %vm5671_vm12 = vcmp.lt.s32.totalorder %v4227_v20, 8  ;;  %vm5675_vm3 = vcmp.lt.s32.totalorder %v4212_v51, 8  ;;  %1692 = vrot.lane.b32.xlu0 %v1368_v53, %s2839_s26 }
  0xb2   : > { %v2637_v24 = vsel %vm991_vm5, 1.0, %v5571_v45  ;;  %vm4386_vm2 = vmand %vm5668_vm9, %vm5667_vm10  ;;  %vm5672_vm5 = vcmp.ge.s32.totalorder %v4227_v20, 0  ;;  %v4407_v55 = vmul.f32 %v2636_v36, %v4130_v9  ;;  %vm5677_vm10 = vcmp.lt.s32.totalorder %v4224_v18, 8  ;;  %v4475_v61 = vpop.permute.xlu1 %1640 }
  0xb3   : > { %vm4398_vm0 = vmand %vm5672_vm5, %vm5671_vm12  ;;  %v1500_v20 = vpack.c.bf16 %v1495_v11, %v1494_v6  ;;  %v1507_v26 = vmul.f32 %v2637_v24, %v5676_v21  ;;  %vm5385_vm7 = vcmp.ge.s32.totalorder %v4374_v52, 0  ;;  %vm5679_vm12 = vcmp.ge.s32.totalorder %v4270_v19, 0  ;;  %v5682_v11 = vld [vmem:[#allocation29_spill] sm:$0xff]  ;;  %1951 = vrot.lane.b32.xlu1 %v1488_v60, %s2838_s12 }
  0xb4   : > { %vm648_vm8 = vmand %vm4386_vm2, %vm5675_vm3  ;;  %vm5678_vm3 = vcmp.lt.s32.totalorder %v4270_v19, 8  ;;  %v5680_v6 = vmov 0  ;;  %vm5683_vm11 = vnez %v5682_v11  ;;  %v2553_v24 = vsel %vm4299_vm6, 1.0, %v5571_v45  ;;  %v5688_v11 = vld [vmem:[#allocation18_spill] sm:$0xff]  ;;  %v4456_v53 = vpop.permute.xlu0 %1776 }
  0xb5   : > { %vm649_vm9 = vmand %vm4398_vm0, %vm5677_vm10  ;;  %v2566_v27 = vsel %vm648_vm8, 1.0, %v5571_v45  ;;  %v2552_v36 = vsel %vm5683_vm11, 1.0, %v5571_v45  ;;  %vm5684_vm8 = vcmp.lt.s32.totalorder %v1015_v39, 8  ;;  %vm5685_vm10 = vcmp.ge.s32.totalorder %v1015_v39, 0  ;;  %1963 = vrot.lane.b32.xlu0 %v1500_v20, %s2836_s23 }
  0xb6   : > { %v2567_v34 = vsel %vm649_vm9, 1.0, %v5571_v45  ;;  %vm4428_vm5 = vmand %vm5679_vm12, %vm5678_vm3  ;;  %v5686_v19 = vmov 0  ;;  %v4447_v29 = vadd.s32 4294967294, %v4182_v0  ;;  %v1382_v59 = vmul.f32 %v2552_v36, %v5688_v11 }
  0xb7   : > { %v5681_v6 = vsel %vm4428_vm5, 4294967295, %v5680_v6  ;;  %vm4442_vm9 = vmand %vm5685_vm10, %vm5684_vm8  ;;  %v1383_v12 = vmul.f32 %v2553_v24, %v5689_v4  ;;  %vm5690_vm11 = vcmp.ge.s32.totalorder %v3926_v31, 0  ;;  %v2488_v39 = vsel %vm4326_vm15, 1.0, %v5571_v45  ;;  %1804 = vrot.lane.b32.xlu1 %v1464_v41, %s2840_s5 }
  0xb8   : > { %v5687_v19 = vsel %vm4442_vm9, 4294967295, %v5686_v19  ;;  %vm1046_vm6 = vmand %vm4428_vm5, %vm5690_vm11  ;;  %v2489_v60 = vsel %vm4334_vm1, 1.0, %v5571_v45  ;;  %v4467_v36 = vmul.f32 %v2566_v27, %v4130_v9  ;;  %v1401_v24 = vmul.f32 %v2567_v34, %v5676_v21  ;;  %v5696_v34 = vld [vmem:[#allocation23_spill] sm:$0xff] }
  0xb9   : > { %vm5691_vm10 = vcmp.ge.s32.totalorder %v3935_v25, 0  ;;  %v2644_v31 = vsel %vm1046_vm6, 1.0, %v5571_v45  ;;  %v1390_v37 = vpack.c.bf16 %v1383_v12, %v1382_v59  ;;  %vm5692_vm15 = vcmp.lt.s32.totalorder %v176_v3, 8 }
  0xba   : > { %vm1047_vm11 = vmand %vm4442_vm9, %vm5691_vm10  ;;  %vm5693_vm12 = vcmp.ge.s32.totalorder %v176_v3, 0  ;;  %v1235_v27 = vmul.f32 %v2488_v39, %v4138_v54  ;;  %v1236_v25 = vmul.f32 %v2489_v60, %v5696_v34  ;;  %v1512_v59 = vpack.c.bf16 %v1507_v26, %v4407_v55  ;;  %v2806_v55 = vld [vmem:[%s5247_s1 + $0xb8] sm:$0xff]   ;;  %v1713_v60 = vpop.permute.xlu0 %1712 }
  0xbb   : > { %v2645_v42 = vsel %vm1047_vm11, 1.0, %v5571_v45  ;;  %vm4480_vm1 = vmand %vm5693_vm12, %vm5692_vm15  ;;  %v1518_v12 = vmul.f32 %v2644_v31, %v4138_v54  ;;  %vm5697_vm12 = vcmp.lt.s32.totalorder %v4355_v56, 8  ;;  %vm5698_vm6 = vcmp.ge.s32.totalorder %v4355_v56, 0 }
  0xbc   : > { %v1519_v3 = vmul.f32 %v2645_v42, %v5696_v34  ;;  %vm4496_vm10 = vmand %vm5698_vm6, %vm5697_vm12  ;;  %v5699_v44 = vmov 0  ;;  %vm5389_vm11 = vcmp.ge.s32.totalorder %v4447_v29, 0  ;;  %vm681_vm3 = vcmp.lt.s32.totalorder %v4180_v50, 8  ;;  %1975 = vrot.lane.b32.xlu0 %v1512_v59, %s2835_s18 }
  0xbd   : > { %v5700_v44 = vsel %vm4496_vm10, 4294967295, %v5699_v44  ;;  %vm280_vm15 = vmand %vm4480_vm1, %vm5385_vm7  ;;  %vm5392_vm8 = vcmask 130048   ;;  %vm5390_vm14 = vcmask 261120   ;;  %v1405_v42 = vpack.c.bf16 %v1401_v24, %v4467_v36 }
  0xbe   : > { %vm5701_vm4 = vcmp.ge.s32.totalorder %v4377_v49, 0  ;;  %v2502_v31 = vsel %vm280_vm15, 1.0, %v5571_v45  ;;  %v2510_v56 = vsel %vm4480_vm1, 1.0, %v5571_v45  ;;  %v2660_v41 = vsel %vm4428_vm5, 1.0, %v5571_v45 }
  0xbf   : > { %vm281_vm12 = vmand %vm4496_vm10, %vm5701_vm4  ;;  %v1270_v26 = vmul.f32 %v2502_v31, %v4049_v10  ;;  %vm5702_vm4 = vcmp.lt.s32.totalorder %v4168_v62, 8  ;;  %vm5703_vm6 = vcmp.ge.s32.totalorder %v4168_v62, 0  ;;  %v2511_v36 = vsel %vm4496_vm10, 1.0, %v5571_v45  ;;  %v5707_v10 = vld [vmem:[#allocation68_spill] sm:$0xff] }
  0xc0   : > { %v2503_v20 = vsel %vm281_vm12, 1.0, %v5571_v45  ;;  %vm4527_vm15 = vmand %vm5703_vm6, %vm5702_vm4  ;;  %v1243_v24 = vpack.c.bf16 %v1236_v25, %v1235_v27  ;;  %v5706_v63 = vpack.c.bf16 %v4203_v57, %v4178_v46  ;;  %v1524_v31 = vpack.c.bf16 %v1519_v3, %v1518_v12  ;;  %v1653_v27 = vpop.permute.xlu1 %1652 }
  0xc1   : > { %v1271_v7 = vmul.f32 %v2503_v20, %v5707_v10  ;;  %vm5708_vm12 = vcmp.ge.s32.totalorder %v4180_v50, 0  ;;  %v1881_v25 = vsel %vm5392_vm8, %v1390_v37, %v1713_v60  ;;  %vm5711_vm6 = vcmp.ge.s32.totalorder %v4403_v1, 0 }
  0xc2   : > { %1704 = vrot.lane.b32.xlu1 %v5706_v63, %s2840_s5  ;;  %vm4544_vm4 = vmand %vm5708_vm12, %vm681_vm3  ;;  %v2661_v63 = vsel %vm4442_vm9, 1.0, %v5571_v45  ;;  %v5386_v46 = vmov 0   ;;  %v4558_v57 = vadd.s32 1, %v4170_v35  ;;  %v4561_v59 = vadd.s32 1, %v4182_v0  ;;  %v2809_v0 = vld [vmem:[%s5247_s1 + $0xb0] sm:$0xff]   ;;  %1987 = vrot.lane.b32.xlu0 %v1524_v31, %s2833_s15 }
  0xc3   : > { %vm696_vm13 = vmand %vm4527_vm15, %vm5711_vm6  ;;  %2318 = vmatprep.subr.bf16.mxu1 %v5386_v46  ;;  %v1282_v12 = vmul.f32 %v2510_v56, %v3426_v5  ;;  %v1283_v3 = vmul.f32 %v2511_v36, %v2911_v15  ;;  %v4571_v20 = vmul.f32 %v2660_v41, %v2913_v16  ;;  %v1275_v35 = vpack.c.bf16 %v1271_v7, %v1270_v26  ;;  %v1629_v5 = vpop.permute.xlu0 %1628  ;;  %v5715_v36 = vld [vmem:[#allocation20_spill] sm:$0xff] }
  0xc4   : > { %vm697_vm3 = vmand %vm4544_vm4, %vm5389_vm11  ;;  %v2574_v37 = vsel %vm696_vm13, 1.0, %v5571_v45  ;;  %2319 = vmatpush1.bf16.msra.mxu1 %v2806_v55  ;;  %v1892_v8 = vsel %vm5390_vm14, %v1881_v25, %v4392_v43  ;;  %vm5712_vm13 = vcmp.ge.s32.totalorder %v3905_v47, 0  ;;  %v5713_v56 = vmov 0   ;;  %v1665_v55 = vpop.permute.xlu1 %1664  ;;  %v5790_v47 = vld [vmem:[#allocation42_spill] sm:$0xff] }
  0xc5   : > { %v2575_v60 = vsel %vm697_vm3, 1.0, %v5571_v45  ;;  %v1412_v46 = vmul.f32 %v2574_v37, %v4138_v54  ;;  %vm1078_vm12 = vmand %vm4428_vm5, %vm5712_vm13  ;;  %2320 = vmatprep.subr.bf16.mxu1 %v5713_v56  ;;  %vm5714_vm6 = vcmp.ge.s32.totalorder %v3916_v58, 0  ;;  %v1811_v41 = vsel %vm5392_vm8, %v1243_v24, %v1629_v5  ;;  %v5717_v37 = vld [vmem:[#allocation19_spill] sm:$0xff]  ;;  %v5719_v5 = vld [vmem:[#allocation4_spill] sm:$0xff] }
  0xc6   : > { %1718 = vrot.lane.b32.xlu1 %v1405_v42, %s2838_s12  ;;  %v1413_v7 = vmul.f32 %v2575_v60, %v5696_v34  ;;  %vm1079_vm3 = vmand %vm4442_vm9, %vm5714_vm6  ;;  %v2652_v43 = vsel %vm1078_vm12, 1.0, %v5571_v45  ;;  %vm5394_vm13 = vcmp.lt.s32.totalorder %v4558_v57, 8  ;;  %v1823_v31 = vsel %vm5390_vm14, %v1811_v41, %v4475_v61  ;;  %v2812_v61 = vld [vmem:[%s5247_s1 + $0xa8] sm:$0xff]  }
  0xc7   : > { %v2653_v26 = vsel %vm1079_vm3, 1.0, %v5571_v45  ;;  %v1530_v42 = vmul.f32 %v2652_v43, %v5715_v36  ;;  %vm5716_vm11 = vcmp.ge.s32.totalorder %v4374_v52, 0  ;;  %vm5393_vm6 = vcmp.lt.s32.totalorder %v4561_v59, 8  ;;  %v1789_v58 = vpop.permute.xlu0 %1788 }
  0xc8   : > { %vm728_vm7 = vmand %vm4527_vm15, %vm5716_vm11  ;;  %v1417_v25 = vpack.c.bf16 %v1413_v7, %v1412_v46  ;;  %v1531_v24 = vmul.f32 %v2653_v26, %v5717_v37  ;;  %vm5718_vm12 = vcmp.ge.s32.totalorder %v4377_v49, 0  ;;  %v1543_v43 = vmul.f32 %v2661_v63, %v5719_v5  ;;  %2321 = vmatpush1.bf16.msra.mxu1 %v2809_v0 }
  0xc9   : > { %vm729_vm3 = vmand %vm4544_vm4, %vm5718_vm12  ;;  %v2582_v60 = vsel %vm728_vm7, 1.0, %v5571_v45  ;;  %vm5720_vm11 = vcmask 392192   ;;  %v1287_v46 = vpack.c.bf16 %v1283_v3, %v1282_v12  ;;  %2322 = vmatprep.subr.bf16.mxu1 %v5713_v56  ;;  %vm5395_vm12 = vcmask 654336  }
  0xca   : > { %v1900_v41 = vsel %vm5720_vm11, %v1892_v8, %v4380_v2  ;;  %vm5721_vm14 = vmmov %vm5720_vm11  ;;  %v2583_v26 = vsel %vm729_vm3, 1.0, %v5571_v45  ;;  %1634 = vrot.lane.b32.xlu1 %v1275_v35, %s2838_s12  ;;  %1730 = vrot.lane.b32.xlu0 %v1417_v25, %s2836_s23  ;;  %v1536_v63 = vpack.c.bf16 %v1531_v24, %v1530_v42  ;;  %v1424_v8 = vmul.f32 %v2582_v60, %v5715_v36  ;;  %v2813_v35 = vld [vmem:[%s5247_s1 + $0xa0] sm:$0xff]  }
  0xcb   : > { %v1832_v7 = vsel %vm5721_vm14, %v1823_v31, %v1653_v27  ;;  %vm400_vm7 = vmand %vm4480_vm1, %vm5394_vm13  ;;  %v1425_v2 = vmul.f32 %v2583_v26, %v5717_v37  ;;  %v1677_v27 = vpop.permute.xlu1 %1676  ;;  %vm5722_vm3 = vcmask 523264   ;;  %v1548_v31 = vpack.c.bf16 %v1543_v43, %v4571_v20  ;;  %v1689_v25 = vpop.permute.xlu0 %1688 }
  0xcc   : > { %vm401_vm14 = vmand %vm4496_vm10, %vm5393_vm6  ;;  %v2518_v12 = vsel %vm400_vm7, 1.0, %v5571_v45  ;;  %v1908_v0 = vsel %vm5722_vm3, %v1900_v41, %v4310_v33  ;;  %2323 = vmatpush1.bf16.msra.mxu1 %v2812_v61  ;;  %vm5396_vm8 = vcmask 785408   ;;  %vm5724_vm7 = vcmp.lt.s32.totalorder %v4030_v13, 8  ;;  %v2824_v61 = vld [vmem:[%s2879_s14 + $0x18] sm:$0xff]  }
  0xcd   : > { %v2519_v3 = vsel %vm401_vm14, 1.0, %v5571_v45  ;;  %vm5723_vm11 = vmmov %vm5722_vm3  ;;  %2324 = vmatprep.subr.bf16.mxu1 %v5713_v56  ;;  %v1429_v33 = vpack.c.bf16 %v1425_v2, %v1424_v8  ;;  %v1311_v24 = vmul.f32 %v2518_v12, %v3826_v28  ;;  %vm5725_vm3 = vcmp.lt.s32.totalorder %v4037_v30, 8  ;;  %v5799_v28 = vld [vmem:[#allocation14_spill] sm:$0xff]  ;;  %v5801_v30 = vld [vmem:[#allocation31_spill] sm:$0xff] }
  0xce   : > { %v1841_v42 = vsel %vm5723_vm11, %v1832_v7, %v1665_v55  ;;  %vm1150_vm14 = vmand %vm4428_vm5, %vm5724_vm7  ;;  %1999 = vrot.lane.b32.xlu1 %v1536_v63, %s2837_s24  ;;  %1646 = vrot.lane.b32.xlu0 %v1287_v46, %s2836_s23  ;;  %v1312_v55 = vmul.f32 %v2519_v3, %v4098_v32  ;;  %v1916_v43 = vsel %vm5395_vm12, %v1908_v0, %v4456_v53  ;;  %vm5726_vm7 = vcmp.lt.s32.totalorder %v4212_v51, 8  ;;  %v2814_v63 = vld [vmem:[%s5247_s1 + $0x98] sm:$0xff]  }
  0xcf   : > { %v4649_v60 = vpop.permute.xlu1 %1947  ;;  %vm1151_vm11 = vmand %vm4442_vm9, %vm5725_vm3  ;;  %v2668_v20 = vsel %vm1150_vm14, 1.0, %v5571_v45  ;;  %v824_v46 = vadd.s32 1, %v4168_v62  ;;  %v1924_v7 = vsel %vm5396_vm8, %v1916_v43, %v1789_v58  ;;  %vm5727_vm13 = vcmp.lt.s32.totalorder %v4224_v18, 8 }
  0xd0   : > { %v2669_v41 = vsel %vm1151_vm11, 1.0, %v5571_v45  ;;  %vm456_vm6 = vmand %vm4480_vm1, %vm5726_vm7  ;;  %vm5399_vm3 = vcmask 916480   ;;  %v825_v53 = vadd.s32 1, %v4180_v50  ;;  %2325 = vmatpush1.bf16.msra.mxu1 %v2813_v35  ;;  %v1850_v8 = vsel %vm5395_vm12, %v1841_v42, %v1677_v27  ;;  %v4688_v35 = vpop.permute.xlu0 %1959 }
  0xd1   : > { %vm457_vm14 = vmand %vm4496_vm10, %vm5727_vm13  ;;  %v2526_v26 = vsel %vm456_vm6, 1.0, %v5571_v45  ;;  %v1554_v2 = vmul.f32 %v2668_v20, %v5665_v14  ;;  %v1555_v58 = vmul.f32 %v2669_v41, %v5688_v11  ;;  %vm5728_vm13 = vcmp.lt.s32.totalorder %v4558_v57, 8  ;;  %2326 = vmatprep.subr.bf16.mxu1 %v5713_v56 }
  0xd2   : > { %v2527_v12 = vsel %vm457_vm14, 1.0, %v5571_v45  ;;  %vm768_vm6 = vmand %vm4527_vm15, %vm5728_vm13  ;;  %1742 = vrot.lane.b32.xlu1 %v1429_v33, %s2835_s18  ;;  %2011 = vrot.lane.b32.xlu0 %v1548_v31, %s2839_s26  ;;  %v1316_v3 = vpack.c.bf16 %v1312_v55, %v1311_v24  ;;  %v1340_v27 = vmul.f32 %v2526_v26, %v3854_v48  ;;  %vm5729_vm11 = vcmp.lt.s32.totalorder %v4561_v59, 8  ;;  %v2815_v55 = vld [vmem:[%s5247_s1 + $0x90] sm:$0xff]  }
  0xd3   : > { %v1341_v0 = vmul.f32 %v2527_v12, %v4130_v9  ;;  %v1801_v42 = vpop.permute.xlu1 %1800  ;;  %vm769_vm7 = vmand %vm4544_vm4, %vm5729_vm11  ;;  %v2590_v20 = vsel %vm768_vm6, 1.0, %v5571_v45  ;;  %vm5730_vm14 = vcmp.ge.s32.totalorder %v4403_v1, 0  ;;  %vm832_vm12 = vcmp.ge.s32.totalorder %v824_v46, 0 }
  0xd4   : > { %v2591_v43 = vsel %vm769_vm7, 1.0, %v5571_v45  ;;  %v1932_v33 = vsel %vm5399_vm3, %v1924_v7, %v1801_v42  ;;  %vm512_vm13 = vmand %vm4386_vm2, %vm5730_vm14  ;;  %vm840_vm8 = vcmp.lt.s32.totalorder %v824_v46, 8  ;;  %vm5731_vm9 = vcmask 785408   ;;  %2327 = vmatpush1.bf16.msra.mxu1 %v2814_v63  ;;  %v2816_v46 = vld [vmem:[%s5247_s1 + $0x88] sm:$0xff]  }
  0xd5   : > { %v1859_v31 = vsel %vm5731_vm9, %v1850_v8, %v1689_v25  ;;  %2285 = vmatprep.mubr.bf16.mxu0 %v1932_v33  ;;  %vm5732_vm5 = vcmp.ge.s32.totalorder %v4447_v29, 0  ;;  %v2534_v24 = vsel %vm512_vm13, 1.0, %v5571_v45  ;;  %vm833_vm6 = vcmp.ge.s32.totalorder %v825_v53, 0  ;;  %2328 = vmatprep.subr.bf16.mxu1 %v5713_v56 }
  0xd6   : > { %vm513_vm11 = vmand %vm4398_vm0, %vm5732_vm5  ;;  %vm841_vm7 = vcmp.lt.s32.totalorder %v825_v53, 8  ;;  %v1560_v41 = vpack.c.bf16 %v1555_v58, %v1554_v2  ;;  %v1436_v7 = vmul.f32 %v2590_v20, %v5665_v14  ;;  %v1437_v25 = vmul.f32 %v2591_v43, %v5688_v11  ;;  %1658 = vrot.lane.b32.xlu1 %v1316_v3, %s2835_s18  ;;  %1770 = vrot.lane.b32.xlu0 %v2824_v61, %s2833_s15  ;;  %v4735_v3 = vpop.permute.xlu0 %1971  ;;  %v5739_v20 = vld [vmem:[#allocation16_spill] sm:$0xff] }
  0xd7   : > { %v2535_v26 = vsel %vm513_vm11, 1.0, %v5571_v45  ;;  %vm5733_vm9 = vcmp.lt.s32.totalorder %v4212_v51, 8  ;;  %v1345_v63 = vpack.c.bf16 %v1341_v0, %v1340_v27  ;;  %v1352_v8 = vmul.f32 %v2534_v24, %v3949_v23  ;;  %v1701_v58 = vpop.permute.xlu1 %1700  ;;  %vm4739_vm11 = vmand %vm833_vm6, %vm841_vm7  ;;  %v5740_v24 = vld [vmem:[#allocation5_spill] sm:$0xff] }
  0xd8   : > { %vm800_vm5 = vmand %vm4527_vm15, %vm5733_vm9  ;;  %v1353_v2 = vmul.f32 %v2535_v26, %v4138_v54  ;;  %vm5734_vm14 = vcmp.lt.s32.totalorder %v4224_v18, 8  ;;  %v1868_v42 = vsel %vm5399_vm3, %v1859_v31, %v1701_v58  ;;  %v5737_v54 = vmov 0  ;;  %2329 = vmatpush1.bf16.msra.mxu1 %v2815_v55 }
  0xd9   : > { %vm801_vm13 = vmand %vm4544_vm4, %vm5734_vm14  ;;  %v2598_v39 = vsel %vm800_vm5, 1.0, %v5571_v45  ;;  %2286 = vmatmul.mubr.bf16.vlgmr.msra.gmra.mxu0 %v1868_v42  ;;  %v5738_v54 = vsel %vm4739_vm11, 4294967295, %v5737_v54  ;;  %v1441_v27 = vpack.c.bf16 %v1437_v25, %v1436_v7  ;;  %v2623_v53 = vsel %vm4739_vm11, 1.0, %v5571_v45  ;;  %2330 = vmatprep.subr.bf16.mxu1 %v5713_v56  ;;  %v5745_v42 = vld [vmem:[#allocation2_spill] sm:$0xff] }
  0xda   : > { %v2599_v12 = vsel %vm801_vm13, 1.0, %v5571_v45  ;;  %vm4731_vm15 = vmand %vm832_vm12, %vm840_vm8  ;;  %v1448_v0 = vmul.f32 %v2598_v39, %v5676_v21  ;;  %2023 = vrot.lane.b32.xlu1 %v1560_v41, %s2840_s5  ;;  %1670 = vrot.lane.b32.xlu0 %v1345_v63, %s2833_s15  ;;  %v1357_v33 = vpack.c.bf16 %v1353_v2, %v1352_v8  ;;  %v1485_v55 = vmul.f32 %v2623_v53, %v5740_v24  ;;  %v4786_v58 = vpop.permute.xlu0 %1983  ;;  %v5751_v53 = vld [vmem:[#allocation6_spill] sm:$0xff] }
  0xdb   : > { %v2622_v22 = vsel %vm4731_vm15, 1.0, %v5571_v45  ;;  %v1449_v43 = vmul.f32 %v2599_v12, %v5739_v20  ;;  %vm5741_vm8 = vcmp.ge.s32.totalorder %v4374_v52, 0  ;;  %vm5742_vm12 = vcmp.ge.s32.totalorder %v4377_v49, 0 }
  0xdc   : > { %v1484_v31 = vmul.f32 %v2622_v22, %v5719_v5  ;;  %vm544_vm4 = vmand %vm4386_vm2, %vm5741_vm8  ;;  %v2550_v41 = vsel %vm4386_vm2, 1.0, %v5571_v45  ;;  %2331 = vmatpush1.bf16.msra.mxu1 %v2816_v46  ;;  %v2817_v5 = vld [vmem:[%s5247_s1 + $0x80] sm:$0xff]   ;;  %vm5743_vm7 = vcmp.ge.s32.totalorder %v4403_v1, 0  ;;  %v2551_v63 = vsel %vm4398_vm0, 1.0, %v5571_v45  ;;  %v5747_v22 = vld [vmem:[#allocation24_spill] sm:$0xff] }
  0xdd   : > { %vm545_vm6 = vmand %vm4398_vm0, %vm5742_vm12  ;;  %v2542_v7 = vsel %vm544_vm4, 1.0, %v5571_v45  ;;  %v1453_v25 = vpack.c.bf16 %v1449_v43, %v1448_v0  ;;  %v1016_v8 = vadd.s32 2, %v4168_v62  ;;  %2332 = vmatprep.subr.bf16.mxu1 %v5713_v56  ;;  %vm5744_vm5 = vcmp.ge.s32.totalorder %v4447_v29, 0 }
  0xde   : > { %v2543_v26 = vsel %vm545_vm6, 1.0, %v5571_v45  ;;  %vm856_vm9 = vmand %vm4731_vm15, %vm5743_vm7  ;;  %1782 = vrot.lane.b32.xlu1 %v1441_v27, %s2837_s24  ;;  %1682 = vrot.lane.b32.xlu0 %v1357_v33, %s2837_s24  ;;  %v1489_v2 = vpack.c.bf16 %v1485_v55, %v1484_v31  ;;  %v1364_v39 = vmul.f32 %v2542_v7, %v5707_v10  ;;  %vm5746_vm13 = vcmp.ge.s32.totalorder %v5745_v42, 0  ;;  %v5753_v33 = vld [vmem:[#allocation25_spill] sm:$0xff]  ;;  %v5757_v55 = vld [vmem:[#allocation10_spill] sm:$0xff] }
  0xdf   : > { %v1365_v12 = vmul.f32 %v2543_v26, %v5715_v36  ;;  %vm857_vm14 = vmand %vm4739_vm11, %vm5744_vm5  ;;  %v2606_v62 = vsel %vm856_vm9, 1.0, %v5571_v45  ;;  %vm5748_vm8 = vnez %v5747_v22  ;;  %v1017_v43 = vadd.s32 2, %v4180_v50  ;;  %v2818_v26 = vld [vmem:[%s5247_s1 + $0xc0] sm:$0xff]   ;;  %v5789_v36 = vld [vmem:[#allocation7_spill] sm:$0xff] }
  0xe0   : > { %vm4799_vm4 = vmand %vm5748_vm8, %vm5746_vm13  ;;  %v2607_v27 = vsel %vm857_vm14, 1.0, %v5571_v45  ;;  %v1460_v0 = vmul.f32 %v2606_v62, %v5696_v34  ;;  %vm5752_vm12 = vcmp.ge.s32.totalorder %v5751_v53, 0  ;;  %vm5754_vm6 = vnez %v5753_v33  ;;  %2333 = vmatpush1.bf16.msra.mxu1 %v2817_v5  ;;  %v4827_v5 = vpop.permute.xlu1 %1714  ;;  %v5770_v22 = vld [vmem:[#allocation38_spill] sm:$0xff] }
  0xe1   : > { %vm4810_vm7 = vmand %vm5754_vm6, %vm5752_vm12  ;;  %v1461_v7 = vmul.f32 %v2607_v27, %v5757_v55  ;;  %vm5758_vm9 = vcmp.lt.s32.totalorder %v4558_v57, 8  ;;  %v1376_v50 = vmul.f32 %v2550_v41, %v2911_v15  ;;  %v1377_v34 = vmul.f32 %v2551_v63, %v2913_v16  ;;  %2348 = vmatprep.subr.bf16.mxu1 %v5713_v56  ;;  %v4840_v41 = vpop.permute.xlu0 %1726 }
  0xe2   : > { %vm960_vm5 = vmand %vm4731_vm15, %vm5758_vm9  ;;  %1794 = vrot.lane.b32.xlu1 %v1453_v25, %s2839_s26  ;;  %1953 = vrot.lane.b32.xlu0 %v1489_v2, %s2838_s12  ;;  %v1369_v62 = vpack.c.bf16 %v1365_v12, %v1364_v39  ;;  %vm5759_vm13 = vcmp.lt.s32.totalorder %v4561_v59, 8  ;;  %vm5760_vm6 = vcmp.lt.s32.totalorder %v4212_v51, 8  ;;  %v5764_v2 = vld [vmem:[#allocation37_spill] sm:$0xff]  ;;  %v5768_v12 = vld [vmem:[#allocation46_spill] sm:$0xff]  ;;  %vm5771_vm3 = vnez %v5770_v22 }
  0xe3   : > { %v1465_v42 = vpack.c.bf16 %v1461_v7, %v1460_v0  ;;  %vm961_vm8 = vmand %vm4739_vm11, %vm5759_vm13  ;;  %v2630_v15 = vsel %vm960_vm5, 1.0, %v5571_v45  ;;  %vm5761_vm13 = vcmp.lt.s32.totalorder %v4224_v18, 8  ;;  %vm5765_vm12 = vnez %v5764_v2  ;;  %v5787_v22 = vld [vmem:[#allocation9_spill] sm:$0xff] }
  0xe4   : > { %v2631_v16 = vsel %vm961_vm8, 1.0, %v5571_v45  ;;  %v1496_v56 = vmul.f32 %v2630_v15, %v5688_v11  ;;  %vm992_vm9 = vmand %vm4731_vm15, %vm5760_vm6  ;;  %2349 = vmatpush2.bf16.msra.mxu1 %v2818_v26  ;;  %v5762_v11 = vld [vmem:[#allocation45_spill] sm:$0xff]  ;;  %vm5769_vm6 = vcmp.lt.s32.totalorder %v5768_v12, 8  ;;  %v1381_v0 = vpack.c.bf16 %v1377_v34, %v1376_v50  ;;  %v5778_v15 = vld [vmem:[#allocation15_spill] sm:$0xff] }
  0xe5   : > { %v1497_v25 = vmul.f32 %v2631_v16, %v5689_v4  ;;  %vm993_vm5 = vmand %vm4739_vm11, %vm5761_vm13  ;;  %v2638_v63 = vsel %vm992_vm9, 1.0, %v5571_v45  ;;  %vm5763_vm8 = vcmp.lt.s32.totalorder %v5762_v11, 8  ;;  %vm5774_vm9 = vcmp.lt.s32.totalorder %v1016_v8, 8  ;;  %v5786_v11 = vld [vmem:[#allocation3_spill] sm:$0xff]  ;;  %v5854_v50 = vld [vmem:[#allocation22_spill] sm:$0xff] }
  0xe6   : > { %vm4852_vm10 = vmand %vm5765_vm12, %vm5763_vm8  ;;  %v2639_v53 = vsel %vm993_vm5, 1.0, %v5571_v45  ;;  %vm5775_vm13 = vcmp.ge.s32.totalorder %v1016_v8, 0  ;;  %1694 = vrot.lane.b32.xlu1 %v1369_v62, %s2839_s26  ;;  %1806 = vrot.lane.b32.xlu0 %v1465_v42, %s2840_s5  ;;  %v1508_v26 = vmul.f32 %v2638_v63, %v5739_v20  ;;  %vm5780_vm12 = vcmp.ge.s32.totalorder %v1017_v43, 0  ;;  %v4897_v42 = vpop.permute.xlu1 %1630 }
  0xe7   : > { %vm4860_vm14 = vmand %vm5771_vm3, %vm5769_vm6  ;;  %v1501_v7 = vpack.c.bf16 %v1497_v25, %v1496_v56  ;;  %v1509_v16 = vmul.f32 %v2639_v53, %v5778_v15  ;;  %vm5779_vm3 = vcmp.lt.s32.totalorder %v1017_v43, 8  ;;  %vm5783_vm5 = vcmp.ge.s32.totalorder %v4403_v1, 0  ;;  %v4899_v56 = vpop.permute.xlu0 %1642 }
  0xe8   : > { %vm4867_vm11 = vmand %vm5775_vm13, %vm5774_vm9  ;;  %v2608_v43 = vsel %vm4799_vm4, 1.0, %v5571_v45  ;;  %v2609_v62 = vsel %vm4810_vm7, 1.0, %v5571_v45  ;;  %vm5784_vm9 = vcmp.ge.s32.totalorder %v4447_v29, 0  ;;  %vm5785_vm4 = vcmp.ge.s32.totalorder %v4374_v52, 0 }
  0xe9   : > { %vm4877_vm8 = vmand %vm5780_vm12, %vm5779_vm3  ;;  %v2662_v8 = vsel %vm4867_vm11, 1.0, %v5571_v45  ;;  %v1513_v12 = vpack.c.bf16 %v1509_v16, %v1508_v26  ;;  %vm5788_vm3 = vcmp.ge.s32.totalorder %v4377_v49, 0  ;;  %v1466_v10 = vmul.f32 %v2608_v43, %v5789_v36 }
  0xea   : > { %vm1048_vm6 = vmand %vm4867_vm11, %vm5783_vm5  ;;  %v2663_v34 = vsel %vm4877_vm8, 1.0, %v5571_v45  ;;  %v1544_v31 = vmul.f32 %v2662_v8, %v5740_v24  ;;  %1965 = vrot.lane.b32.xlu1 %v1501_v7, %s2836_s23  ;;  %1706 = vrot.lane.b32.xlu0 %v1381_v0, %s2840_s5  ;;  %v1467_v24 = vmul.f32 %v2609_v62, %v5790_v47  ;;  %vm5792_vm5 = vcmp.lt.s32.totalorder %v4558_v57, 8  ;;  %v1996_v0 = vpop.permute.xlu1 %1995  ;;  %s5225_s23 = scalar_lea.vmem %s5248_s2, %s2723_s11 }
  0xeb   : > { %vm1049_vm13 = vmand %vm4877_vm8, %vm5784_vm9  ;;  %v2646_v25 = vsel %vm1048_vm6, 1.0, %v5571_v45  ;;  %v1545_v2 = vmul.f32 %v2663_v34, %v5786_v11  ;;  %v5791_v34 = vld [vmem:[#allocation8_spill] sm:$0xff]  ;;  %v2008_v16 = vpop.permute.xlu0 %2007  ;;  %vm5793_vm9 = vcmp.lt.s32.totalorder %v4561_v59, 8  ;;  %v5794_v11 = vld [vmem:[#allocation13_spill] sm:$0xff] }
  0xec   : > { %v2647_v63 = vsel %vm1049_vm13, 1.0, %v5571_v45  ;;  %v1520_v46 = vmul.f32 %v2646_v25, %v5757_v55  ;;  %vm1080_vm7 = vmand %vm4867_vm11, %vm5785_vm4  ;;  %vm5795_vm4 = vcmp.lt.s32.totalorder %v5794_v11, 8 }
  0xed   : > { %v1521_v53 = vmul.f32 %v2647_v63, %v5787_v22  ;;  %vm1081_vm12 = vmand %vm4877_vm8, %vm5788_vm3  ;;  %v2654_v25 = vsel %vm1080_vm7, 1.0, %v5571_v45  ;;  %v1549_v43 = vpack.c.bf16 %v1545_v2, %v1544_v31  ;;  %v1474_v2 = vpack.c.bf16 %v1467_v24, %v1466_v10  ;;  %v5809_v10 = vld [vmem:[#allocation36_spill] sm:$0xff] }
  0xee   : > { %v2655_v8 = vsel %vm1081_vm12, 1.0, %v5571_v45  ;;  %v1532_v7 = vmul.f32 %v2654_v25, %v5791_v34  ;;  %vm1152_vm6 = vmand %vm4867_vm11, %vm5792_vm5  ;;  %v5796_v25 = vld [vmem:[#allocation30_spill] sm:$0xff]  ;;  %1977 = vrot.lane.b32.xlu1 %v1513_v12, %s2835_s18  ;;  %vm5800_vm12 = vcmp.lt.s32.totalorder %v5799_v28, 8  ;;  %vm5802_vm5 = vnez %v5801_v30  ;;  %v5811_v24 = vld [vmem:[#allocation44_spill] sm:$0xff] }
  0xef   : > { %v1525_v26 = vpack.c.bf16 %v1521_v53, %v1520_v46  ;;  %v1533_v63 = vmul.f32 %v2655_v8, %v5789_v36  ;;  %vm1153_vm13 = vmand %vm4877_vm8, %vm5793_vm9  ;;  %v2670_v47 = vsel %vm1152_vm6, 1.0, %v5571_v45  ;;  %vm5797_vm7 = vnez %v5796_v25  ;;  %v5798_v53 = vld [vmem:[#allocation12_spill] sm:$0xff]  ;;  %v1767_v28 = vpop.permute.xlu0 %1766 }
  0xf0   : > { %v2671_v62 = vsel %vm1153_vm13, 1.0, %v5571_v45  ;;  %vm1178_vm3 = vmand %vm5797_vm7, %vm5795_vm4  ;;  %v1556_v46 = vmul.f32 %v2670_v47, %v5689_v4  ;;  %v5803_v25 = vld [vmem:[#allocation28_spill] sm:$0xff]  ;;  %v2554_v12 = vsel %vm4852_vm10, 1.0, %v5571_v45  ;;  %v2555_v4 = vsel %vm4860_vm14, 1.0, %v5571_v45  ;;  %v5807_v47 = vld [vmem:[#allocation43_spill] sm:$0xff] }
  0xf1   : > { %1989 = vrot.lane.b32.xlu0 %v1525_v26, %s2833_s15  ;;  %v1537_v36 = vpack.c.bf16 %v1533_v63, %v1532_v7  ;;  %v1557_v8 = vmul.f32 %v2671_v62, %v5798_v53  ;;  %vm1179_vm6 = vmand %vm5802_vm5, %vm5800_vm12  ;;  %v2672_v31 = vsel %vm1178_vm3, 1.0, %v5571_v45  ;;  %v1739_v7 = vpop.permute.xlu1 %1738  ;;  %v5804_v26 = vld [vmem:[#allocation48_spill] sm:$0xff]  ;;  %v5805_v63 = vld [vmem:[#allocation35_spill] sm:$0xff]  ;;  %vm5808_vm13 = vnez %v5807_v47 }
  0xf2   : > { %v2673_v11 = vsel %vm1179_vm6, 1.0, %v5571_v45  ;;  %v1562_v13 = vmul.f32 %v2672_v31, %v5803_v25  ;;  %vm5806_vm9 = vcmp.ge.s32.totalorder %v5805_v63, 0  ;;  %vm5810_vm7 = vcmp.ge.s32.totalorder %v5809_v10, 0 }
  0xf3   : > { %v1563_v30 = vmul.f32 %v2673_v11, %v5804_v26  ;;  %vm220_vm4 = vmand %vm5808_vm13, %vm5806_vm9  ;;  %vm5812_vm3 = vnez %v5811_v24  ;;  %2001 = vrot.lane.b32.xlu1 %v1537_v36, %s2837_s24  ;;  %v1561_v39 = vpack.c.bf16 %v1557_v8, %v1556_v46  ;;  %vm5813_vm10 = vcmask 130048   ;;  %v5814_v11 = vld [vmem:[#allocation26_spill] sm:$0xff]  ;;  %v4975_v47 = vpop.permute.xlu0 %1666  ;;  %v5825_v8 = vld [vmem:[#allocation60_spill] sm:$0xff] }
  0xf4   : > { %vm221_vm12 = vmand %vm5812_vm3, %vm5810_vm7  ;;  %v2029_v62 = vsel %vm5813_vm10, %v1474_v2, %v4649_v60  ;;  %v1384_v31 = vmul.f32 %v2554_v12, %v5798_v53  ;;  %v1385_v25 = vmul.f32 %v2555_v4, %v5814_v11  ;;  %vm5815_vm14 = vcmask 261120   ;;  %v5818_v60 = vld [vmem:[#allocation33_spill] sm:$0xff]  ;;  %v5820_v46 = vld [vmem:[#allocation58_spill] sm:$0xff] }
  0xf5   : > { %2013 = vrot.lane.b32.xlu0 %v1549_v43, %s2839_s26  ;;  %v1570_v27 = vpack.c.bf16 %v1563_v30, %v1562_v13  ;;  %v2040_v26 = vsel %vm5815_vm14, %v2029_v62, %v4688_v35  ;;  %v1655_v63 = vpop.permute.xlu1 %1654  ;;  %vm5816_vm5 = vmmov %vm5813_vm10  ;;  %vm5817_vm6 = vcmask 392192   ;;  %v2490_v13 = vsel %vm220_vm4, 1.0, %v5571_v45  ;;  %v5823_v53 = vld [vmem:[#allocation34_spill] sm:$0xff] }
  0xf6   : > { %v2048_v43 = vsel %vm5817_vm6, %v2040_v26, %v4735_v3  ;;  %v2491_v36 = vsel %vm221_vm12, 1.0, %v5571_v45  ;;  %vm5819_vm9 = vcmp.lt.s32.totalorder %v5818_v60, 8  ;;  %vm5821_vm13 = vnez %v5820_v46 }
  0xf7   : > { %2709 = vmatprep.mubr.msk.bf16.mxu1 %vm5816_vm5, %v1570_v27  ;;  %vm1180_vm7 = vmand %vm5821_vm13, %vm5819_vm9  ;;  %vm5822_vm3 = vcmask 523264   ;;  %2025 = vrot.lane.b32.xlu1 %v1561_v39, %s2840_s5  ;;  %vm5824_vm10 = vcmp.lt.s32.totalorder %v5823_v53, 8  ;;  %vm5826_vm14 = vnez %v5825_v8  ;;  %v1391_v2 = vpack.c.bf16 %v1385_v25, %v1384_v31  ;;  %v1679_v27 = vpop.permute.xlu0 %1678  ;;  %v5857_v8 = vld [vmem:[#allocation39_spill] sm:$0xff] }
  0xf8   : > { %v2056_v35 = vsel %vm5822_vm3, %v2048_v43, %v4786_v58  ;;  %vm1181_vm5 = vmand %vm5826_vm14, %vm5824_vm10  ;;  %v2674_v3 = vsel %vm1180_vm7, 1.0, %v5571_v45  ;;  %vm5827_vm4 = vcmask 654336   ;;  %v1237_v10 = vmul.f32 %v2490_v13, %v5757_v55 }
  0xf9   : > { %v2064_v12 = vsel %vm5827_vm4, %v2056_v35, %v1996_v0  ;;  %v2675_v4 = vsel %vm1181_vm5, 1.0, %v5571_v45  ;;  %v1564_v30 = vmul.f32 %v2674_v3, %v3854_v48  ;;  %v1238_v58 = vmul.f32 %v2491_v36, %v5787_v22  ;;  %v2020_v39 = vpop.permute.xlu1 %2019  ;;  %v5859_v3 = vld [vmem:[#allocation49_spill] sm:$0xff] }
  0xfa   : > { %vm5828_vm12 = vcmask 785408   ;;  %v1565_v62 = vmul.f32 %v2675_v4, %v4130_v9  ;;  %vm5829_vm6 = vcmask 916480   ;;  %vm5830_vm9 = vcmp.lt.s32.totalorder %v4558_v57, 8  ;;  %v5863_v4 = vld [vmem:[#allocation50_spill] sm:$0xff] }
  0xfb   : > { %v2072_v24 = vsel %vm5828_vm12, %v2064_v12, %v2008_v16  ;;  %vm616_vm13 = vmand %vm4386_vm2, %vm5830_vm9  ;;  %vm5831_vm7 = vcmp.lt.s32.totalorder %v4561_v59, 8  ;;  %vm5832_vm10 = vcmp.ge.s32.totalorder %v4403_v1, 0  ;;  %vm5833_vm2 = vcmask 130048   ;;  %v5021_v22 = vpop.permute.xlu0 %1949  ;;  %v5861_v12 = vld [vmem:[#allocation40_spill] sm:$0xff] }
  0xfc   : > { %v2080_v11 = vsel %vm5829_vm6, %v2072_v24, %v2020_v39  ;;  %v1571_v0 = vpack.c.bf16 %v1565_v62, %v1564_v30  ;;  %vm617_vm3 = vmand %vm4398_vm0, %vm5831_vm7  ;;  %v2558_v48 = vsel %vm616_vm13, 1.0, %v5571_v45  ;;  %v1884_v40 = vsel %vm5833_vm2, %v1391_v2, %v4827_v5  ;;  %v5838_v5 = vld [vmem:[#allocation51_spill] sm:$0xff]  ;;  %v5865_v39 = vld [vmem:[#allocation41_spill] sm:$0xff] }
  0xfd   : > { %2351 = vmatmul.mubr.bf16.vlgmr.msra.gmra.mxu1 %v2080_v11  ;;  %v2559_v55 = vsel %vm617_vm3, 1.0, %v5571_v45  ;;  %v5013_v9 = vmul.f32 %v2558_v48, %v4098_v32  ;;  %vm224_vm14 = vmand %vm4480_vm1, %vm5832_vm10  ;;  %v1244_v57 = vpack.c.bf16 %v1238_v58, %v1237_v10  ;;  %v1779_v59 = vpop.permute.xlu1 %1778  ;;  %vm5835_vm5 = vcmp.ge.s32.totalorder %v4447_v29, 0  ;;  %v5866_v62 = vld [vmem:[#allocation67_spill] sm:$0xff] }
  0xfe   : > { %vm5834_vm0 = vmmov %vm5833_vm2  ;;  %v5025_v38 = vmul.f32 %v2559_v55, %v5665_v14  ;;  %vm5836_vm4 = vnez %v5700_v44  ;;  %v2494_v32 = vsel %vm224_vm14, 1.0, %v5571_v45  ;;  %vm5837_vm1 = vcmask 261120   ;;  %v5867_v55 = vld [vmem:[#allocation53_spill] sm:$0xff] }
  0xff   : > { %2710 = vmatprep.mubr.msk.bf16.mxu1 %vm5834_vm0, %v1571_v0  ;;  %vm225_vm12 = vmand %vm5836_vm4, %vm5835_vm5  ;;  %v1894_v1 = vsel %vm5837_vm1, %v1884_v40, %v4840_v41  ;;  %v5036_v16 = vmul.f32 %v2494_v32, %v5838_v5  ;;  %vm5839_vm6 = vcmask 392192   ;;  %vm5840_vm9 = vcmask 523264   ;;  %v5870_v40 = vld [vmem:[#allocation54_spill] sm:$0xff] }
 0x100   : > { %v2495_v17 = vsel %vm225_vm12, 1.0, %v5571_v45  ;;  %v1902_v31 = vsel %vm5839_vm6, %v1894_v1, %v1739_v7  ;;  %v1393_v14 = vpack.c.bf16 %v5025_v38, %v5013_v9  ;;  %vm5841_vm13 = vcmp.ge.s32.totalorder %v4374_v52, 0  ;;  %vm5842_vm3 = vmmov %vm5834_vm0  ;;  %v1803_v7 = vpop.permute.xlu0 %1802 }
 0x101   : > { %v5042_v29 = vmul.f32 %v2495_v17, %v3949_v23  ;;  %v1910_v44 = vsel %vm5840_vm9, %v1902_v31, %v1767_v28  ;;  %vm888_vm7 = vmand %vm4731_vm15, %vm5841_vm13  ;;  %v1814_v41 = vsel %vm5842_vm3, %v1244_v57, %v4897_v42  ;;  %vm5843_vm10 = vcmask 654336   ;;  %v1791_v26 = vpop.permute.xlu1 %1790 }
 0x102   : > { %v1918_v25 = vsel %vm5843_vm10, %v1910_v44, %v1779_v59  ;;  %vm5844_vm14 = vcmp.ge.s32.totalorder %v4377_v49, 0  ;;  %vm5845_vm2 = vnez %v5738_v54  ;;  %v2614_v23 = vsel %vm888_vm7, 1.0, %v5571_v45  ;;  %vm5846_vm5 = vmmov %vm5837_vm1 }
 0x103   : > { %v1246_v43 = vpack.c.bf16 %v5042_v29, %v5036_v16  ;;  %vm889_vm0 = vmand %vm5845_vm2, %vm5844_vm14  ;;  %v1825_v52 = vsel %vm5846_vm5, %v1814_v41, %v4899_v56  ;;  %vm5847_vm15 = vcmask 785408   ;;  %v5064_v28 = vmul.f32 %v2614_v23, %v5717_v37  ;;  %v5875_v41 = vld [vmem:[#allocation65_spill] sm:$0xff]  ;;  %v5880_v23 = vld [vmem:[#allocation66_spill] sm:$0xff] }
 0x104   : > { %v1926_v61 = vsel %vm5847_vm15, %v1918_v25, %v1791_v26  ;;  %v2615_v42 = vsel %vm889_vm0, 1.0, %v5571_v45  ;;  %vm5848_vm4 = vcmp.lt.s32.totalorder %v4212_v51, 8  ;;  %vm5849_vm1 = vmmov %vm5839_vm6  ;;  %vm5850_vm6 = vcmask 916480   ;;  %v1703_v36 = vpop.permute.xlu0 %1702 }
 0x105   : > { %vm1184_vm12 = vmand %vm4867_vm11, %vm5848_vm4  ;;  %v1834_v49 = vsel %vm5849_vm1, %v1825_v52, %v1655_v63  ;;  %v1935_v54 = vsel %vm5850_vm6, %v1926_v61, %v1803_v7  ;;  %v5073_v13 = vmul.f32 %v2615_v42, %v5791_v34  ;;  %vm5851_vm9 = vcmp.lt.s32.totalorder %v4224_v18, 8  ;;  %v1691_v34 = vpop.permute.xlu1 %1690  ;;  %v5882_v52 = vld [vmem:[#allocation56_spill] sm:$0xff] }
 0x106   : > { %vm1185_vm13 = vmand %vm4877_vm8, %vm5851_vm9  ;;  %v2678_v37 = vsel %vm1184_vm12, 1.0, %v5571_v45  ;;  %vm5852_vm7 = vcmask 523264   ;;  %2293 = vmatprep.mubr.bf16.mxu0 %v1935_v54  ;;  %vm5860_vm14 = vnez %v5859_v3  ;;  %vm5862_vm0 = vcmp.ge.s32.totalorder %v5861_v12, 0  ;;  %v5888_v54 = vld [vmem:[#allocation63_spill] sm:$0xff] }
 0x107   : > { %v1843_v51 = vsel %vm5852_vm7, %v1834_v49, %v4975_v47  ;;  %v2679_v33 = vsel %vm1185_vm13, 1.0, %v5571_v45  ;;  %v5084_v56 = vmul.f32 %v2678_v37, %v5778_v15  ;;  %vm5853_vm11 = vmmov %vm5843_vm10  ;;  %v1477_v18 = vpack.c.bf16 %v5073_v13, %v5064_v28  ;;  %v5886_v49 = vld [vmem:[#allocation61_spill] sm:$0xff] }
 0x108   : > { %v1852_v63 = vsel %vm5853_vm11, %v1843_v51, %v1679_v27  ;;  %v5090_v60 = vmul.f32 %v2679_v33, %v5854_v50  ;;  %vm5855_vm8 = vmmov %vm5847_vm15  ;;  %v1717_v53 = vpop.permute.xlu0 %1716  ;;  %vm5858_vm10 = vcmp.ge.s32.totalorder %v5857_v8, 0  ;;  %vm5864_vm5 = vnez %v5863_v4  ;;  %v5896_v50 = vld [vmem:[#allocation47_spill] sm:$0xff] }
 0x109   : > { %v1861_v46 = vsel %vm5855_vm8, %v1852_v63, %v1691_v34  ;;  %vm5856_vm3 = vmmov %vm5850_vm6  ;;  %v1962_v15 = vpop.permute.xlu1 %1961  ;;  %vm5868_vm4 = vcmp.lt.s32.totalorder %v5867_v55, 8  ;;  %vm5869_vm12 = vnez %v5681_v6  ;;  %vm5871_vm6 = vcmp.lt.s32.totalorder %v5870_v40, 8  ;;  %v5891_v63 = vld [vmem:[#allocation62_spill] sm:$0xff]  ;;  %v5893_v34 = vld [vmem:[#allocation64_spill] sm:$0xff] }
 0x10a   : > { %v1871_v47 = vsel %vm5856_vm3, %v1861_v46, %v1703_v36  ;;  %v1573_v35 = vpack.c.bf16 %v5090_v60, %v5084_v56  ;;  %vm884_vm2 = vmand %vm5860_vm14, %vm5858_vm10  ;;  %vm5872_vm9 = vnez %v5687_v19  ;;  %vm5873_vm7 = vcmask 130048   ;;  %v5877_v19 = vld [vmem:[#allocation55_spill] sm:$0xff] }
 0x10b   : > { %2294 = vmatmul.mubr.bf16.gmra.mxu0 %v1871_v47  ;;  %vm885_vm15 = vmand %vm5864_vm5, %vm5862_vm0  ;;  %v2610_v10 = vsel %vm884_vm2, 1.0, %v5571_v45  ;;  %vm5874_vm11 = vcmask 261120   ;;  %vm5876_vm8 = vcmp.lt.s32.totalorder %v5875_v41, 8  ;;  %vm5878_vm3 = vnez %v5877_v19  ;;  %v5897_v47 = vld [vmem:[#allocation52_spill] sm:$0xff] }
 0x10c   : > { %v1633_v30 = vpop.permute.xlu0 %1632  ;;  %v2611_v58 = vsel %vm885_vm15, 1.0, %v5571_v45  ;;  %v1468_v27 = vmul.f32 %v2610_v10, %v5865_v39  ;;  %vm1182_vm1 = vmand %vm5869_vm12, %vm5868_vm4  ;;  %vm5879_vm14 = vcmask 392192   ;;  %vm5881_vm2 = vcmp.lt.s32.totalorder %v5880_v23, 8  ;;  %v5899_v10 = vld [vmem:[#allocation27_spill] sm:$0xff] }
 0x10d   : > { %v1974_v2 = vpop.permute.xlu1 %1973  ;;  %v1469_v11 = vmul.f32 %v2611_v58, %v5866_v62  ;;  %vm1183_vm13 = vmand %vm5872_vm9, %vm5871_vm6  ;;  %v2676_v1 = vsel %vm1182_vm1, 1.0, %v5571_v45  ;;  %vm5883_vm0 = vnez %v5882_v52  ;;  %vm5884_vm15 = vcmask 523264  }
 0x10e   : > { %v2677_v17 = vsel %vm1183_vm13, 1.0, %v5571_v45  ;;  %v1566_v31 = vmul.f32 %v2676_v1, %v5676_v21  ;;  %vm614_vm10 = vmand %vm5878_vm3, %vm5876_vm8  ;;  %vm5885_vm4 = vcmask 654336   ;;  %vm5887_vm12 = vcmp.ge.s32.totalorder %v5886_v49, 0 }
 0x10f   : > { %v1475_v57 = vpack.c.bf16 %v1469_v11, %v1468_v27  ;;  %v1567_v6 = vmul.f32 %v2677_v17, %v5739_v20  ;;  %vm615_vm5 = vmand %vm5883_vm0, %vm5881_vm2  ;;  %v2556_v61 = vsel %vm614_vm10, 1.0, %v5571_v45  ;;  %vm5889_vm1 = vnez %v5888_v54 }
 0x110   : > { %v1998_v48 = vpop.permute.xlu0 %1997  ;;  %v2557_v42 = vsel %vm615_vm5, 1.0, %v5571_v45  ;;  %vm222_vm6 = vmand %vm5889_vm1, %vm5887_vm12  ;;  %vm5890_vm9 = vcmask 785408   ;;  %vm5892_vm13 = vcmp.ge.s32.totalorder %v5891_v63, 0  ;;  %vm5895_vm8 = vcmask 916480   ;;  %v5924_v63 = vld [vmem:[#allocation20_spill] sm:$0xff] }
 0x111   : > { %v1986_v24 = vpop.permute.xlu1 %1985  ;;  %v2032_v5 = vsel %vm5873_vm7, %v1475_v57, %v5021_v22  ;;  %v1572_v22 = vpack.c.bf16 %v1567_v6, %v1566_v31  ;;  %vm5894_vm7 = vnez %v5893_v34  ;;  %v1386_v46 = vmul.f32 %v2556_v61, %v5896_v50  ;;  %vm5904_vm0 = vmmov %vm5884_vm15  ;;  %v5921_v61 = vld [vmem:[#allocation70_spill] sm:$0xff] }
 0x112   : > { %v2042_v44 = vsel %vm5874_vm11, %v2032_v5, %v1962_v15  ;;  %vm223_vm11 = vmand %vm5894_vm7, %vm5892_vm13  ;;  %v1387_v15 = vmul.f32 %v2557_v42, %v5897_v47  ;;  %vm5898_vm3 = vcmask 130048   ;;  %v2492_v8 = vsel %vm222_vm6, 1.0, %v5571_v45 }
 0x113   : > { %v2050_v7 = vsel %vm5879_vm14, %v2042_v44, %v1974_v2  ;;  %v2493_v3 = vsel %vm223_vm11, 1.0, %v5571_v45  ;;  %v1239_v58 = vmul.f32 %v2492_v8, %v5899_v10  ;;  %vm5901_vm10 = vmmov %vm5898_vm3  ;;  %vm5902_vm14 = vcmask 261120  }
 0x114   : > { %v1741_v32 = vpop.permute.xlu0 %1740  ;;  %v2058_v21 = vsel %vm5884_vm15, %v2050_v7, %v1986_v24  ;;  %v1392_v4 = vpack.c.bf16 %v1387_v15, %v1386_v46  ;;  %v5900_v24 = vld [vmem:[#allocation32_spill] sm:$0xff]  ;;  %vm5903_vm2 = vcmask 392192   ;;  %vm5905_vm5 = vmmov %vm5898_vm3 }
 0x115   : > { %v1729_v0 = vpop.permute.xlu1 %1728  ;;  %v2066_v20 = vsel %vm5885_vm4, %v2058_v21, %v1998_v48  ;;  %v1240_v39 = vmul.f32 %v2493_v3, %v5900_v24  ;;  %vm5906_vm15 = vmmov %vm5885_vm4  ;;  %v5917_v21 = vld [vmem:[#allocation69_spill] sm:$0xff] }
 0x116   : > { %v1887_v11 = vsel %vm5901_vm10, %v1392_v4, %v1717_v53  ;;  %vm5907_vm4 = vmmov %vm5902_vm14 }
 0x117   : > { %v1245_v48 = vpack.c.bf16 %v1240_v39, %v1239_v58  ;;  %v1896_v55 = vsel %vm5902_vm14, %v1887_v11, %v1729_v0  ;;  %vm5908_vm12 = vmmov %vm5890_vm9 }
 0x118   : > { %v1657_v26 = vpop.permute.xlu0 %1656  ;;  %v1904_v1 = vsel %vm5903_vm2, %v1896_v55, %v1741_v32  ;;  %vm5909_vm1 = vmmov %vm5903_vm2  ;;  %vm5922_vm2 = vnez %v5921_v61 }
 0x119   : > { %v1645_v59 = vpop.permute.xlu1 %1644  ;;  %v1817_v5 = vsel %vm5905_vm5, %v1245_v48, %v1633_v30  ;;  %vm5910_vm6 = vmmov %vm5895_vm8 }
 0x11a   : > { %v1827_v6 = vsel %vm5907_vm4, %v1817_v5, %v1645_v59  ;;  %vm5912_vm13 = vmmov %vm5906_vm15  ;;  %v5915_v59 = vld [vmem:[#allocation57_spill] sm:$0xff] }
 0x11b   : > { %v1836_v53 = vsel %vm5909_vm1, %v1827_v6, %v1657_v26  ;;  %vm5913_vm7 = vmmov %vm5908_vm12 }
 0x11c   : > { %v2022_v33 = vpop.permute.xlu0 %2021  ;;  %vm5914_vm11 = vmmov %vm5910_vm6 }
 0x11d   : > { %v2010_v25 = vpop.permute.xlu1 %2009 }
 0x11e   : > { %v2074_v37 = vsel %vm5890_vm9, %v2066_v20, %v2010_v25  ;;  %vm5911_vm9 = vmmov %vm5904_vm0 }
 0x11f   : > { %v2083_v36 = vsel %vm5895_vm8, %v2074_v37, %v2022_v33  ;;  %vm5916_vm8 = vcmp.ge.s32.totalorder %v5915_v59, 0 }
 0x120   : > { %2359 = vmatmul.mubr.bf16.gmra.mxu1 %v2083_v36  ;;  %v1781_v12 = vpop.permute.xlu0 %1780 }
 0x121   : > { %v1769_v51 = vpop.permute.xlu1 %1768  ;;  %2711 = vmatprep.mubr.msk.bf16.mxu1 %vm5898_vm3, %v1572_v22  ;;  %vm5918_vm3 = vnez %v5917_v21  ;;  %v5919_v22 = vld [vmem:[#allocation59_spill] sm:$0xff] }
 0x122   : > { %v1912_v17 = vsel %vm5904_vm0, %v1904_v1, %v1769_v51  ;;  %vm886_vm10 = vmand %vm5918_vm3, %vm5916_vm8  ;;  %vm5920_vm14 = vcmp.ge.s32.totalorder %v5919_v22, 0  ;;  %v5923_v51 = vld [vmem:[#allocation68_spill] sm:$0xff] }
 0x123   : > { %v1920_v31 = vsel %vm5906_vm15, %v1912_v17, %v1781_v12  ;;  %vm887_vm0 = vmand %vm5922_vm2, %vm5920_vm14  ;;  %v2612_v42 = vsel %vm886_vm10, 1.0, %v5571_v45 }
 0x124   : > { %v1793_v62 = vpop.permute.xlu0 %1792  ;;  %v2613_v49 = vsel %vm887_vm0, 1.0, %v5571_v45  ;;  %v1470_v33 = vmul.f32 %v2612_v42, %v5923_v51  ;;  %vm5925_vm15 = vmmov %vm5907_vm4 }
 0x125   : > { %v1669_v2 = vpop.permute.xlu1 %1668  ;;  %v1928_v44 = vsel %vm5908_vm12, %v1920_v31, %v1793_v62  ;;  %v1471_v34 = vmul.f32 %v2613_v49, %v5924_v63  ;;  %vm5926_vm4 = vmmov %vm5909_vm1 }
 0x126   : > { %v1845_v25 = vsel %vm5911_vm9, %v1836_v53, %v1669_v2  ;;  %vm5927_vm12 = vmmov %vm5911_vm9 }
 0x127   : > { %v1476_v46 = vpack.c.bf16 %v1471_v34, %v1470_v33  ;;  %vm5928_vm1 = vmmov %vm5912_vm13 }
 0x128   : > { %v1693_v57 = vpop.permute.xlu0 %1692  ;;  %vm5930_vm9 = vmmov %vm5914_vm11 }
 0x129   : > { %v1681_v27 = vpop.permute.xlu1 %1680  ;;  %vm5934_vm8 = vmmov %vm5926_vm4 }
 0x12a   : > { %v1854_v32 = vsel %vm5912_vm13, %v1845_v25, %v1681_v27  ;;  %vm5931_vm13 = vmmov %vm5905_vm5 }
 0x12b   : > { %v1863_v7 = vsel %vm5913_vm7, %v1854_v32, %v1693_v57  ;;  %vm5935_vm3 = vmmov %vm5927_vm12 }
 0x12c   : > { %v1964_v19 = vpop.permute.xlu0 %1963  ;;  %vm5936_vm10 = vmmov %vm5905_vm5 }
 0x12d   : > { %v1952_v40 = vpop.permute.xlu1 %1951  ;;  %vm5937_vm14 = vmmov %vm5928_vm1 }
 0x12e   : > { %v2035_v8 = vsel %vm5905_vm5, %v1476_v46, %v1952_v40 }
 0x12f   : > { %v2044_v3 = vsel %vm5925_vm15, %v2035_v8, %v1964_v19 }
 0x130   : > { %v1976_v23 = vpop.permute.xlu0 %1975 }
 0x131   : > { %v1805_v41 = vpop.permute.xlu1 %1804  ;;  %v2052_v4 = vsel %vm5926_vm4, %v2044_v3, %v1976_v23 }
 0x132   : > { %v1938_v0 = vsel %vm5910_vm6, %v1928_v44, %v1805_v41  ;;  %vm5929_vm6 = vmmov %vm5913_vm7 }
 0x133   : > { %2301 = vmatprep.mubr.bf16.mxu0 %v1938_v0  ;;  %vm5932_vm7 = vmmov %vm5905_vm5 }
 0x134   : > { %v1988_v20 = vpop.permute.xlu0 %1987  ;;  %vm5939_vm0 = vmmov %vm5929_vm6 }
 0x135   : > { %v1705_v30 = vpop.permute.xlu1 %1704  ;;  %v2060_v45 = vsel %vm5927_vm12, %v2052_v4, %v1988_v20  ;;  %vm5940_vm5 = vmmov %vm5926_vm4 }
 0x136   : > { %v1874_v52 = vsel %vm5914_vm11, %v1863_v7, %v1705_v30  ;;  %vm5933_vm11 = vmmov %vm5925_vm15 }
 0x137   : > { %2302 = vmatmul.mubr.bf16.gmra.mxu0 %v1874_v52  ;;  %vm5938_vm2 = vmmov %vm5933_vm11 }
 0x138   : > { %vm5941_vm15 = vmmov %vm5930_vm9 }
 0x139   : > { %v1719_v26 = vpop.permute.xlu1 %1718  ;;  %vm5942_vm4 = vmmov %vm5935_vm3 }
 0x13a   : > { %v1890_v48 = vsel %vm5932_vm7, %v1393_v14, %v1719_v26  ;;  %vm5943_vm12 = vmmov %vm5928_vm1 }
 0x13c   : > { %v1731_v37 = vpop.permute.xlu0 %1730 }
 0x13d   : > { %v1635_v54 = vpop.permute.xlu1 %1634  ;;  %v1898_v55 = vsel %vm5933_vm11, %v1890_v48, %v1731_v37  ;;  %vm5949_vm11 = vmmov %vm5935_vm3 }
 0x13e   : > { %v1820_v56 = vsel %vm5936_vm10, %v1246_v43, %v1635_v54 }
 0x140   : > { %v1647_v50 = vpop.permute.xlu0 %1646 }
 0x141   : > { %v2000_v36 = vpop.permute.xlu1 %1999 }
 0x142   : > { %v2068_v10 = vsel %vm5928_vm1, %v2060_v45, %v2000_v36  ;;  %vm5944_vm1 = vmmov %vm5939_vm0 }
 0x144   : > { %v2012_v15 = vpop.permute.xlu0 %2011 }
 0x145   : > { %v1743_v47 = vpop.permute.xlu1 %1742  ;;  %v2076_v58 = vsel %vm5929_vm6, %v2068_v10, %v2012_v15  ;;  %vm5945_vm6 = vmmov %vm5930_vm9 }
 0x146   : > { %v1906_v1 = vsel %vm5934_vm8, %v1898_v55, %v1743_v47  ;;  %vm5950_vm8 = vmmov %vm5943_vm12 }
 0x147   : > { %vm5952_vm10 = vmmov %vm5945_vm6 }
 0x148   : > { %v1771_v12 = vpop.permute.xlu0 %1770 }
 0x149   : > { %v1659_v2 = vpop.permute.xlu1 %1658  ;;  %v1914_v17 = vsel %vm5935_vm3, %v1906_v1, %v1771_v12  ;;  %vm5951_vm3 = vmmov %vm5939_vm0 }
 0x14c   : > { %v1671_v39 = vpop.permute.xlu0 %1670 }
 0x14d   : > { %v2024_v24 = vpop.permute.xlu1 %2023 }
 0x14e   : > { %v2086_v27 = vsel %vm5930_vm9, %v2076_v58, %v2024_v24  ;;  %vm5946_vm9 = vmmov %vm5932_vm7 }
 0x14f   : > { %2367 = vmatmul.mubr.bf16.gmra.mxu1 %v2086_v27  ;;  %vm5948_vm7 = vmmov %vm5940_vm5 }
 0x150   : > { %2712 = vmatprep.mubr.msk.bf16.mxu1 %vm5931_vm13, %v1573_v35  ;;  %v1683_v11 = vpop.permute.xlu0 %1682  ;;  %v1829_v35 = vsel %vm5938_vm2, %v1820_v56, %v1647_v50  ;;  %vm5947_vm13 = vmmov %vm5938_vm2 }
 0x151   : > { %v1783_v62 = vpop.permute.xlu1 %1782  ;;  %v1838_v5 = vsel %vm5940_vm5, %v1829_v35, %v1659_v2 }
 0x152   : > { %v1922_v60 = vsel %vm5937_vm14, %v1914_v17, %v1783_v62  ;;  %v1847_v6 = vsel %vm5942_vm4, %v1838_v5, %v1671_v39  ;;  %vm2415_vm14 = vcmask 191488  }
 0x153   : > { %v1856_v44 = vsel %vm5943_vm12, %v1847_v6, %v1683_v11 }
 0x154   : > { %v1954_v57 = vpop.permute.xlu0 %1953 }
 0x155   : > { %v1795_v40 = vpop.permute.xlu1 %1794  ;;  %v2038_v19 = vsel %vm5946_vm9, %v1477_v18, %v1954_v57 }
 0x156   : > { %v1930_v9 = vsel %vm5939_vm0, %v1922_v60, %v1795_v40 }
 0x158   : > { %v1807_v14 = vpop.permute.xlu0 %1806 }
 0x159   : > { %v1695_v38 = vpop.permute.xlu1 %1694  ;;  %v1941_v31 = vsel %vm5941_vm15, %v1930_v9, %v1807_v14 }
 0x15a   : > { %2309 = vmatprep.mubr.bf16.mxu0 %v1941_v31  ;;  %v1865_v16 = vsel %vm5944_vm1, %v1856_v44, %v1695_v38 }
 0x15c   : > { %v1707_v43 = vpop.permute.xlu0 %1706 }
 0x15d   : > { %v1966_v29 = vpop.permute.xlu1 %1965  ;;  %v1877_v41 = vsel %vm5945_vm6, %v1865_v16, %v1707_v43 }
 0x15e   : > { %2310 = vmatmul.mubr.bf16.gmra.mxu0 %v1877_v41  ;;  %v2046_v53 = vsel %vm5947_vm13, %v2038_v19, %v1966_v29 }
 0x161   : > { %v1978_v0 = vpop.permute.xlu1 %1977 }
 0x162   : > { %v2054_v32 = vsel %vm5948_vm7, %v2046_v53, %v1978_v0 }
 0x163   : > { %v1990_v25 = vpop.permute.xlu0 %1989 }
 0x164   : > { %v2062_v7 = vsel %vm5949_vm11, %v2054_v32, %v1990_v25 }
 0x165   : > { %v2002_v30 = vpop.permute.xlu1 %2001 }
 0x166   : > { %v2070_v23 = vsel %vm5950_vm8, %v2062_v7, %v2002_v30 }
 0x167   : > { %v2014_v52 = vpop.permute.xlu0 %2013 }
 0x168   : > { %v2078_v59 = vsel %vm5951_vm3, %v2070_v23, %v2014_v52 }
 0x169   : > { %v2026_v21 = vpop.permute.xlu1 %2025 }
 0x16a   : > { %v2089_v28 = vsel %vm5952_vm10, %v2078_v59, %v2026_v21 }
 0x16b   : > { %2375 = vmatmul.mubr.bf16.gmra.mxu1 %v2089_v28 }
 0x199   : > { %v2749_v13 = vpop.f32.mrf.mxu0 }
 0x19b   : > { %v2750_v18 = vpop.f32.mrf.mxu0 }
 0x19c   : > { %v2751_v20 = vadd.f32 %v2750_v18, %v2749_v13 }
 0x19d   : > { %v2752_v26 = vpop.f32.mrf.mxu0 }
 0x19f   : > { %v2753_v22 = vpop.f32.mrf.mxu0 }
 0x1a0   : > { %v2754_v54 = vadd.f32 %v2753_v22, %v2752_v26 }
 0x1bd   : > { %v2352_v61 = vpop.f32.mrf.mxu1 }
 0x1be   : > { %v2353_v42 = vadd.f32 %v2751_v20, %v2352_v61 }
 0x1bf   : > { %v2354_v49 = vpop.f32.mrf.mxu1 }
 0x1c0   : > { %v2725_v37 = vpack.c.bf16 %v2353_v42, %v2353_v42 }
 0x1c1   : > { %v2355_v51 = vpop.f32.mrf.mxu1 }
 0x1c2   : > { %2416 = vst.msk [vmem:[%s5225_s23] sm:$0xf] %vm2415_vm14, %v2725_v37  ;;  %v2356_v33 = vadd.f32 %v2754_v54, %v2355_v51 }
 0x1c3   : > { %v2357_v63 = vpop.f32.mrf.mxu1 }
 0x1c4   : > { %v2726_v34 = vpack.c.bf16 %v2356_v33, %v2356_v33 }
 0x1c6   : > { %2417 = vst.msk [vmem:[%s5225_s23 + $0x4] sm:$0xf] %vm2415_vm14, %v2726_v34 }
 0x1cb   : > { %v2755_v36 = vpop.f32.mrf.mxu0 }
 0x1cd   : > { %v2756_v50 = vpop.f32.mrf.mxu0 }
 0x1ce   : > { %v2757_v47 = vadd.f32 %v2756_v50, %v2755_v36 }
 0x1cf   : > { %v2758_v46 = vpop.f32.mrf.mxu0 }
 0x1d1   : > { %v2759_v15 = vpop.f32.mrf.mxu0 }
 0x1d2   : > { %v2760_v12 = vadd.f32 %v2759_v15, %v2758_v46 }
 0x1e0   : > { %v2360_v8 = vpop.f32.mrf.mxu1 }
 0x1e1   : > { %v2361_v3 = vadd.f32 %v2757_v47, %v2360_v8 }
 0x1e2   : > { %v2362_v2 = vpop.f32.mrf.mxu1 }
 0x1e3   : > { %v2727_v4 = vpack.c.bf16 %v2361_v3, %v2361_v3 }
 0x1e4   : > { %v2363_v45 = vpop.f32.mrf.mxu1 }
 0x1e5   : > { %2418 = vst.msk [vmem:[%s5225_s23 + $0x8] sm:$0xf] %vm2415_vm14, %v2727_v4  ;;  %v2364_v10 = vadd.f32 %v2760_v12, %v2363_v45 }
 0x1e6   : > { %v2365_v58 = vpop.f32.mrf.mxu1 }
 0x1e7   : > { %v2728_v24 = vpack.c.bf16 %v2364_v10, %v2364_v10 }
 0x1e9   : > { %2419 = vst.msk [vmem:[%s5225_s23 + $0xc] sm:$0xf] %vm2415_vm14, %v2728_v24 }
 0x1f7   : > { %v2761_v39 = vpop.f32.mrf.mxu0 }
 0x1f9   : > { %v2762_v27 = vpop.f32.mrf.mxu0 }
 0x1fa   : > { %v2763_v11 = vadd.f32 %v2762_v27, %v2761_v39 }
 0x1fb   : > { %v2764_v62 = vpop.f32.mrf.mxu0 }
 0x1fd   : > { %v2765_v48 = vpop.f32.mrf.mxu0 }
 0x1fe   : > { %v2766_v1 = vadd.f32 %v2765_v48, %v2764_v62 }
 0x20f   : > { %v2368_v55 = vpop.f32.mrf.mxu1 }
 0x210   : > { %v2369_v40 = vadd.f32 %v2763_v11, %v2368_v55 }
 0x211   : > { %v2370_v57 = vpop.f32.mrf.mxu1 }
 0x212   : > { %v2729_v17 = vpack.c.bf16 %v2369_v40, %v2369_v40 }
 0x213   : > { %v2371_v56 = vpop.f32.mrf.mxu1 }
 0x214   : > { %2420 = vst.msk [vmem:[%s5225_s23 + $0x10] sm:$0xf] %vm2415_vm14, %v2729_v17  ;;  %v2372_v60 = vadd.f32 %v2766_v1, %v2371_v56 }
 0x215   : > { %v2373_v35 = vpop.f32.mrf.mxu1 }
 0x216   : > { %v2730_v9 = vpack.c.bf16 %v2372_v60, %v2372_v60 }
 0x218   : > { %2421 = vst.msk [vmem:[%s5225_s23 + $0x14] sm:$0xf] %vm2415_vm14, %v2730_v9 }
 0x21e   : > { %v2767_v38 = vpop.f32.mrf.mxu0 }
 0x220   : > { %v2768_v14 = vpop.f32.mrf.mxu0 }
 0x221   : > { %v2769_v31 = vadd.f32 %v2768_v14, %v2767_v38 }
 0x222   : > { %v2770_v5 = vpop.f32.mrf.mxu0 }
 0x224   : > { %v2771_v6 = vpop.f32.mrf.mxu0 }
 0x225   : > { %v2772_v43 = vadd.f32 %v2771_v6, %v2770_v5 }
 0x22b   : > { %v2376_v44 = vpop.f32.mrf.mxu1 }
 0x22c   : > { %v2377_v16 = vadd.f32 %v2769_v31, %v2376_v44 }
 0x22d   : > { %v2378_v29 = vpop.f32.mrf.mxu1 }
 0x22e   : > { %v2731_v41 = vpack.c.bf16 %v2377_v16, %v2377_v16 }
 0x22f   : > { %v2379_v19 = vpop.f32.mrf.mxu1 }
 0x230   : > { %2422 = vst.msk [vmem:[%s5225_s23 + $0x18] sm:$0xf] %vm2415_vm14, %v2731_v41  ;;  %v2380_v53 = vadd.f32 %v2772_v43, %v2379_v19 }
 0x231   : > { %v2381_v0 = vpop.f32.mrf.mxu1 }
 0x232   : > { %v2732_v25 = vpack.c.bf16 %v2380_v53, %v2380_v53 }
 0x234   : > { %2423 = vst.msk [vmem:[%s5225_s23 + $0x1c] sm:$0xf] %vm2415_vm14, %v2732_v25 }
 0x235 PF: > { %s12_s9 = sadd.s32 1, %s2831_s9  }
 0x236   : > { %p9_p4 = scmp.ge.s32.totalorder %s12_s9, 4  }
 0x238   :  { %11 = sbr.rel (!%p9_p4) target bundleno = 1 (0x1), region = 58 }

</bundles_post_ra>
